<compile_context>
chip_gen: v7x
topology: tpu7x:2x2x1
jax: 0.10.0
libtpu: 0.0.40
codegen_flags: <defaults>
</compile_context>

<pallas_src>
import jax
import jax.numpy as jnp
import numpy as np
from jax.experimental import pallas as pl
from jax.experimental.pallas import tpu as pltpu

EPS = 1e-5


def _round_up(x, m):
    return ((x + m - 1) // m) * m


# ----------------------------------------------------------------------------
# Kernel 1: conv1 (3x3, pad=1) on a row band + partial BN statistics.
#   xa_ref : (1, TH, W+2, Ci)   rows [i*TH, i*TH+TH) of the padded input
#   xb_ref : (1, 2,  W+2, Ci)   the two halo rows below the band
# ----------------------------------------------------------------------------
def _conv_stats_kernel(xa_ref, xb_ref, w_ref, b_ref, y_ref, st_ref):
    _, TH, Wp2, Ck = xa_ref.shape
    W = Wp2 - 2
    Co = y_ref.shape[3]

    band = jnp.concatenate([xa_ref[0], xb_ref[0]], axis=0)        # (TH+2, W+2, Ck) bf16
    # im2col slab along W, built once and reused for all 3 H-taps: K = 3*Ck
    xw = jnp.concatenate(
        [band[:, 0:W, :], band[:, 1:W + 1, :], band[:, 2:W + 2, :]], axis=-1)

    acc = jnp.broadcast_to(b_ref[...], (TH * W, Co)).astype(jnp.float32)  # bias init
    for di in range(3):                                            # 3 deep-K matmuls
        patch = xw[di:di + TH].reshape(TH * W, 3 * Ck)
        acc = acc + jnp.dot(patch, w_ref[di], preferred_element_type=jnp.float32)

    y_ref[...] = acc.reshape(1, TH, W, Co)

    s = jnp.sum(acc, axis=0, keepdims=True)                        # (1, Co)
    q = jnp.sum(acc * acc, axis=0, keepdims=True)                  # (1, Co)
    st_ref[...] = jnp.concatenate(
        [s, q, jnp.zeros((6, Co), jnp.float32)], axis=0).reshape(1, 1, 8, Co)


# ----------------------------------------------------------------------------
# Kernel 2: BN1 (folded affine) + conv2 (3x3, pad=1) + partial BN2 statistics.
#   ym_ref : (1, TH, W, C)  pre-BN conv1 band
#   yt_ref : (1, 1,  W, C)  row above the band (clamped; zeroed at the top edge)
#   yb_ref : (1, 1,  W, C)  row below the band (clamped; zeroed at the bottom)
# ----------------------------------------------------------------------------
def _bn_conv_stats_kernel(ym_ref, yt_ref, yb_ref, a_ref, c_ref, w_ref, b_ref,
                          y2_ref, st_ref):
    i = pl.program_id(1)
    nb = pl.num_programs(1)
    _, TH, W, C = ym_ref.shape
    Co = y2_ref.shape[3]

    a = a_ref[...].reshape(1, 1, C)
    c = c_ref[...].reshape(1, 1, C)

    mid = ym_ref[0] * a + c                                        # (TH, W, C) f32
    top = (yt_ref[0] * a + c) * (i > 0).astype(jnp.float32)        # zero at image top
    bot = (yb_ref[0] * a + c) * (i < nb - 1).astype(jnp.float32)   # zero at image bottom

    band = jnp.concatenate([top, mid, bot], axis=0)                # (TH+2, W, C)
    zcol = jnp.zeros((TH + 2, 1, C), jnp.float32)                  # zero only the border
    band = jnp.concatenate([zcol, band, zcol], axis=1).astype(jnp.bfloat16)

    xw = jnp.concatenate(
        [band[:, 0:W, :], band[:, 1:W + 1, :], band[:, 2:W + 2, :]], axis=-1)

    acc = jnp.broadcast_to(b_ref[...], (TH * W, Co)).astype(jnp.float32)
    for di in range(3):
        patch = xw[di:di + TH].reshape(TH * W, 3 * C)
        acc = acc + jnp.dot(patch, w_ref[di], preferred_element_type=jnp.float32)

    y2_ref[...] = acc.reshape(1, TH, W, Co)

    s = jnp.sum(acc, axis=0, keepdims=True)
    q = jnp.sum(acc * acc, axis=0, keepdims=True)
    st_ref[...] = jnp.concatenate(
        [s, q, jnp.zeros((6, Co), jnp.float32)], axis=0).reshape(1, 1, 8, Co)


# ----------------------------------------------------------------------------
# Kernel 3: BN2 (folded affine) + ReLU + 2x2 max-pool, both outputs written.
# ----------------------------------------------------------------------------
def _bn_relu_pool_kernel(y_ref, a_ref, c_ref, x_ref, p_ref):
    _, TH, W, C = y_ref.shape
    a = a_ref[...].reshape(1, 1, C)
    c = c_ref[...].reshape(1, 1, C)

    x = jnp.maximum(y_ref[0] * a + c, 0.0)                         # (TH, W, C)
    x_ref[...] = x.reshape(1, TH, W, C)

    # 2x2 max-pool: H pairs via a leading-dim reshape, W pairs via static slices.
    mh = jnp.max(x.reshape(TH // 2, 2, W, C), axis=1)              # (TH/2, W, C)
    cols = [jnp.max(mh[:, 2 * k:2 * k + 2, :], axis=1, keepdims=True)
            for k in range(W // 2)]
    p = jnp.concatenate(cols, axis=1)                              # (TH/2, W/2, C)
    p_ref[...] = p.reshape(1, TH // 2, W // 2, C)


# ----------------------------------------------------------------------------
# Wrapper: PyTorch-compatible NCHW in / (x, pooled) NCHW out.
# ----------------------------------------------------------------------------
def encoder_block_forward(x_nchw, params, *, tile_h=8):
    N, Cin, H, W = x_nchw.shape
    Cout = params["c1_w"].shape[0]
    assert H % 2 == 0 and W % 2 == 0, "MaxPool2d(2,2) needs even spatial dims"

    Cpi = _round_up(Cin, 128)
    Cpo = _round_up(Cout, 128)
    TH = tile_h if (H % tile_h == 0 and tile_h % 2 == 0) else H
    NB = H // TH
    f32 = jnp.float32
    cnt = float(N * H * W)

    cparams = pltpu.CompilerParams(
        dimension_semantics=("parallel", "parallel"),
        vmem_limit_bytes=32 * 1024 * 1024,   # re-derive per chip (v7x: 64 MiB physical)
    )

    # ---- boundary layout glue (would vanish in an NHWC end-to-end network) ----
    x_nhwc = jnp.transpose(x_nchw, (0, 2, 3, 1)).astype(jnp.bfloat16)
    x_pad = jnp.pad(x_nhwc, ((0, 0), (1, 1), (1, 1), (0, Cpi - Cin)))

    def prep_w(w, cpi, cpo):
        # torch (O, I, 3, 3) -> (3, 3*cpi, cpo): K index = kw*cpi + cin
        O, I = w.shape[0], w.shape[1]
        w = jnp.transpose(w, (2, 3, 1, 0))
        w = jnp.pad(w, ((0, 0), (0, 0), (0, cpi - I), (0, cpo - O)))
        return w.reshape(3, 3 * cpi, cpo).astype(jnp.bfloat16)

    def prep_vec(v):
        return jnp.pad(v, (0, Cpo - Cout)).reshape(1, Cpo).astype(f32)

    w1 = prep_w(params["c1_w"], Cpi, Cpo)
    w2 = prep_w(params["c2_w"], Cpo, Cpo)
    b1 = prep_vec(params["c1_b"])
    b2 = prep_vec(params["c2_b"])

    def finalize_bn(stats, gamma, beta):
        s = jnp.sum(stats[:, :, 0, :], axis=(0, 1))
        q = jnp.sum(stats[:, :, 1, :], axis=(0, 1))
        mean = s / cnt
        var = jnp.maximum(q / cnt - mean * mean, 0.0)
        g = jnp.pad(gamma, (0, Cpo - Cout))
        be = jnp.pad(beta, (0, Cpo - Cout))
        inv = jax.lax.rsqrt(var + EPS)
        a = (g * inv).reshape(1, Cpo).astype(f32)
        c = (be - mean * g * inv).reshape(1, Cpo).astype(f32)
        return a, c

    band_spec = lambda cc: pl.BlockSpec((1, TH, W, cc), lambda n, i: (n, i, 0, 0))
    stat_spec = pl.BlockSpec((1, 1, 8, Cpo), lambda n, i: (n, i, 0, 0))
    vec_spec = pl.BlockSpec((1, Cpo), lambda n, i: (0, 0))

    # ---- pass 1: conv1 + partial stats ----
    y1, st1 = pl.pallas_call(
        _conv_stats_kernel,
        grid=(N, NB),
        in_specs=[
            pl.BlockSpec((1, TH, W + 2, Cpi), lambda n, i: (n, i, 0, 0)),
            pl.BlockSpec((1, 2, W + 2, Cpi),
                         lambda n, i: (n, (i + 1) * (TH // 2), 0, 0)),
            pl.BlockSpec((3, 3 * Cpi, Cpo), lambda n, i: (0, 0, 0)),
            vec_spec,
        ],
        out_specs=(band_spec(Cpo), stat_spec),
        out_shape=(jax.ShapeDtypeStruct((N, H, W, Cpo), f32),
                   jax.ShapeDtypeStruct((N, NB, 8, Cpo), f32)),
        compiler_params=cparams,
    )(x_pad, x_pad, w1, b1)

    a1, c1 = finalize_bn(st1, params["bn1_g"], params["bn1_b"])

    # ---- pass 2: BN1 + conv2 + partial stats ----
    y2, st2 = pl.pallas_call(
        _bn_conv_stats_kernel,
        grid=(N, NB),
        in_specs=[
            band_spec(Cpo),
            pl.BlockSpec((1, 1, W, Cpo),
                         lambda n, i: (n, jnp.maximum(i * TH - 1, 0), 0, 0)),
            pl.BlockSpec((1, 1, W, Cpo),
                         lambda n, i: (n, jnp.minimum(i * TH + TH, H - 1), 0, 0)),
            vec_spec,   # a1
            vec_spec,   # c1
            pl.BlockSpec((3, 3 * Cpo, Cpo), lambda n, i: (0, 0, 0)),
            vec_spec,   # b2
        ],
        out_specs=(band_spec(Cpo), stat_spec),
        out_shape=(jax.ShapeDtypeStruct((N, H, W, Cpo), f32),
                   jax.ShapeDtypeStruct((N, NB, 8, Cpo), f32)),
        compiler_params=cparams,
    )(y1, y1, y1, a1, c1, w2, b2)

    a2, c2 = finalize_bn(st2, params["bn2_g"], params["bn2_b"])

    # ---- pass 3: BN2 + ReLU + 2x2 max-pool ----
    x_out_p, p_out_p = pl.pallas_call(
        _bn_relu_pool_kernel,
        grid=(N, NB),
        in_specs=[band_spec(Cpo), vec_spec, vec_spec],
        out_specs=(band_spec(Cpo),
                   pl.BlockSpec((1, TH // 2, W // 2, Cpo),
                                lambda n, i: (n, i, 0, 0))),
        out_shape=(jax.ShapeDtypeStruct((N, H, W, Cpo), f32),
                   jax.ShapeDtypeStruct((N, H // 2, W // 2, Cpo), f32)),
        compiler_params=cparams,
    )(y2, a2, c2)

    # TODO(synk): BatchNorm running_mean/running_var buffer updates are not emitted
    # (train-mode batch statistics are used for normalization, matching the forward math).
    x_out = jnp.transpose(x_out_p[..., :Cout], (0, 3, 1, 2))
    p_out = jnp.transpose(p_out_p[..., :Cout], (0, 3, 1, 2))
    return x_out, p_out


# ----------------------------------------------------------------------------
# Pure-JAX f32 reference (verification only).
# ----------------------------------------------------------------------------
def encoder_block_reference(x, p):
    def conv_bn(t, w, b, g, be):
        y = jax.lax.conv_general_dilated(
            t, w, (1, 1), "SAME", dimension_numbers=("NCHW", "OIHW", "NCHW"))
        y = y + b[None, :, None, None]
        mean = jnp.mean(y, axis=(0, 2, 3), keepdims=True)
        var = jnp.mean((y - mean) ** 2, axis=(0, 2, 3), keepdims=True)
        return (y - mean) * jax.lax.rsqrt(var + EPS) * g[None, :, None, None] \
            + be[None, :, None, None]

    y = conv_bn(x, p["c1_w"], p["c1_b"], p["bn1_g"], p["bn1_b"])
    y = conv_bn(y, p["c2_w"], p["c2_b"], p["bn2_g"], p["bn2_b"])
    xo = jnp.maximum(y, 0.0)
    N, C, H, W = xo.shape
    po = jnp.max(xo.reshape(N, C, H // 2, 2, W // 2, 2), axis=(3, 5))
    return xo, po


if __name__ == "__main__":
    key = jax.random.PRNGKey(0)
    in_channels, out_channels = 4, 8
    N, H, W = 2, 16, 16

    keys = jax.random.split(key, 9)

    def rnd(k, shape, scale=0.1):
        return jax.random.normal(k, shape, jnp.float32) * scale

    params = {
        "c1_w": rnd(keys[0], (out_channels, in_channels, 3, 3)),
        "c1_b": rnd(keys[1], (out_channels,)),
        "bn1_g": 1.0 + rnd(keys[2], (out_channels,)),
        "bn1_b": rnd(keys[3], (out_channels,)),
        "c2_w": rnd(keys[4], (out_channels, out_channels, 3, 3)),
        "c2_b": rnd(keys[5], (out_channels,)),
        "bn2_g": 1.0 + rnd(keys[6], (out_channels,)),
        "bn2_b": rnd(keys[7], (out_channels,)),
    }
    x = rnd(keys[8], (N, in_channels, H, W), 1.0)   # NCHW, like PyTorch

    fwd = jax.jit(encoder_block_forward)
    x_out, p_out = jax.block_until_ready(fwd(x, params))
    x_ref, p_ref = jax.block_until_ready(encoder_block_reference(x, params))

    assert x_out.shape == (N, out_channels, H, W)
    assert p_out.shape == (N, out_channels, H // 2, W // 2)
    # bf16 MXU operands (f32 accumulation / f32 BN) -> slightly relaxed tolerance.
    np.testing.assert_allclose(np.asarray(x_out), np.asarray(x_ref),
                               rtol=2e-2, atol=2e-2)
    np.testing.assert_allclose(np.asarray(p_out), np.asarray(p_ref),
                               rtol=2e-2, atol=2e-2)
    print("KERNEL_OK")
</pallas_src>

<mosaic_0001>
module attributes {stable_mosaic.version = 11 : i64} {
  func.func @_conv_stats_kernel(%arg0: i32, %arg1: i32, %arg2: memref<1x8x18x128xbf16, #tpu.memory_space<vmem>>, %arg3: memref<1x2x18x128xbf16, #tpu.memory_space<vmem>>, %arg4: memref<3x384x128xbf16, #tpu.memory_space<vmem>>, %arg5: memref<1x128xf32, #tpu.memory_space<vmem>>, %arg6: memref<1x8x16x128xf32, #tpu.memory_space<vmem>>, %arg7: memref<1x1x8x128xf32, #tpu.memory_space<vmem>>) attributes {dimension_semantics = [#tpu.dimension_semantics<parallel>, #tpu.dimension_semantics<parallel>], iteration_bounds = array<i64: 2, 2>, scalar_prefetch = 0 : i64, scratch_operands = 0 : i64, tpu.core_type = #tpu.core_type<tc>, window_params = [{transform_indices = @transform_0, window_bounds = array<i64: 1, 8, 18, 128>}, {transform_indices = @transform_1, window_bounds = array<i64: 1, 2, 18, 128>}, {pipeline_mode = #tpu.pipeline_mode<synchronous>, transform_indices = @transform_2, window_bounds = array<i64: 3, 384, 128>}, {pipeline_mode = #tpu.pipeline_mode<synchronous>, transform_indices = @transform_3, window_bounds = array<i64: 1, 128>}, {transform_indices = @transform_4, window_bounds = array<i64: 1, 8, 16, 128>}, {transform_indices = @transform_5, window_bounds = array<i64: 1, 1, 8, 128>}]} {
    %c0 = arith.constant 0 : index
    %c0_0 = arith.constant 0 : index
    %c0_1 = arith.constant 0 : index
    %c0_2 = arith.constant 0 : index
    %0 = vector.load %arg2[%c0, %c0_0, %c0_1, %c0_2] : memref<1x8x18x128xbf16, #tpu.memory_space<vmem>>, vector<1x8x18x128xbf16>
    %1 = vector.shape_cast %0 : vector<1x8x18x128xbf16> to vector<8x18x128xbf16>
    %c0_3 = arith.constant 0 : index
    %c0_4 = arith.constant 0 : index
    %c0_5 = arith.constant 0 : index
    %c0_6 = arith.constant 0 : index
    %2 = vector.load %arg3[%c0_3, %c0_4, %c0_5, %c0_6] : memref<1x2x18x128xbf16, #tpu.memory_space<vmem>>, vector<1x2x18x128xbf16>
    %3 = vector.shape_cast %2 : vector<1x2x18x128xbf16> to vector<2x18x128xbf16>
    %4 = tpu.concatenate %1, %3 in 0 : vector<8x18x128xbf16>, vector<2x18x128xbf16> -> vector<10x18x128xbf16>
    %5 = vector.extract_strided_slice %4 {offsets = [0, 0, 0], sizes = [10, 16, 128], strides = [1, 1, 1]} : vector<10x18x128xbf16> to vector<10x16x128xbf16>
    %6 = vector.extract_strided_slice %4 {offsets = [0, 1, 0], sizes = [10, 16, 128], strides = [1, 1, 1]} : vector<10x18x128xbf16> to vector<10x16x128xbf16>
    %7 = vector.extract_strided_slice %4 {offsets = [0, 2, 0], sizes = [10, 16, 128], strides = [1, 1, 1]} : vector<10x18x128xbf16> to vector<10x16x128xbf16>
    %8 = tpu.concatenate %5, %6, %7 in 2 : vector<10x16x128xbf16>, vector<10x16x128xbf16>, vector<10x16x128xbf16> -> vector<10x16x384xbf16>
    %c0_7 = arith.constant 0 : index
    %c0_8 = arith.constant 0 : index
    %9 = vector.load %arg5[%c0_7, %c0_8] : memref<1x128xf32, #tpu.memory_space<vmem>>, vector<1x128xf32>
    %10 = vector.shape_cast %9 : vector<1x128xf32> to vector<1x128xf32>
    %11 = vector.broadcast %10 : vector<1x128xf32> to vector<128x128xf32>
    %12 = vector.extract_strided_slice %8 {offsets = [0, 0, 0], sizes = [8, 16, 384], strides = [1, 1, 1]} : vector<10x16x384xbf16> to vector<8x16x384xbf16>
    %13 = vector.shape_cast %12 : vector<8x16x384xbf16> to vector<128x384xbf16>
    %c0_9 = arith.constant 0 : index
    %c0_10 = arith.constant 0 : index
    %c0_11 = arith.constant 0 : index
    %14 = vector.load %arg4[%c0_9, %c0_10, %c0_11] : memref<3x384x128xbf16, #tpu.memory_space<vmem>>, vector<1x384x128xbf16>
    %15 = vector.shape_cast %14 : vector<1x384x128xbf16> to vector<384x128xbf16>
    %cst = arith.constant dense<0.000000e+00> : vector<128x128xf32>
    %16 = tpu.matmul %13, %15, %cst {dimension_numbers = #tpu.dot_dimension_numbers<[1], [0], [0], [1], [0, 0, 1, 1], [], []>} : vector<128x384xbf16>, vector<384x128xbf16>, vector<128x128xf32> -> vector<128x128xf32>
    %17 = arith.addf %11, %16 : vector<128x128xf32>
    %18 = vector.extract_strided_slice %8 {offsets = [1, 0, 0], sizes = [8, 16, 384], strides = [1, 1, 1]} : vector<10x16x384xbf16> to vector<8x16x384xbf16>
    %19 = vector.shape_cast %18 : vector<8x16x384xbf16> to vector<128x384xbf16>
    %c1 = arith.constant 1 : index
    %c0_12 = arith.constant 0 : index
    %c0_13 = arith.constant 0 : index
    %20 = vector.load %arg4[%c1, %c0_12, %c0_13] : memref<3x384x128xbf16, #tpu.memory_space<vmem>>, vector<1x384x128xbf16>
    %21 = vector.shape_cast %20 : vector<1x384x128xbf16> to vector<384x128xbf16>
    %cst_14 = arith.constant dense<0.000000e+00> : vector<128x128xf32>
    %22 = tpu.matmul %19, %21, %cst_14 {dimension_numbers = #tpu.dot_dimension_numbers<[1], [0], [0], [1], [0, 0, 1, 1], [], []>} : vector<128x384xbf16>, vector<384x128xbf16>, vector<128x128xf32> -> vector<128x128xf32>
    %23 = arith.addf %17, %22 : vector<128x128xf32>
    %24 = vector.extract_strided_slice %8 {offsets = [2, 0, 0], sizes = [8, 16, 384], strides = [1, 1, 1]} : vector<10x16x384xbf16> to vector<8x16x384xbf16>
    %25 = vector.shape_cast %24 : vector<8x16x384xbf16> to vector<128x384xbf16>
    %c2 = arith.constant 2 : index
    %c0_15 = arith.constant 0 : index
    %c0_16 = arith.constant 0 : index
    %26 = vector.load %arg4[%c2, %c0_15, %c0_16] : memref<3x384x128xbf16, #tpu.memory_space<vmem>>, vector<1x384x128xbf16>
    %27 = vector.shape_cast %26 : vector<1x384x128xbf16> to vector<384x128xbf16>
    %cst_17 = arith.constant dense<0.000000e+00> : vector<128x128xf32>
    %28 = tpu.matmul %25, %27, %cst_17 {dimension_numbers = #tpu.dot_dimension_numbers<[1], [0], [0], [1], [0, 0, 1, 1], [], []>} : vector<128x384xbf16>, vector<384x128xbf16>, vector<128x128xf32> -> vector<128x128xf32>
    %29 = arith.addf %23, %28 : vector<128x128xf32>
    %30 = vector.shape_cast %29 : vector<128x128xf32> to vector<1x8x16x128xf32>
    %c0_18 = arith.constant 0 : index
    %c0_19 = arith.constant 0 : index
    %c0_20 = arith.constant 0 : index
    %c0_21 = arith.constant 0 : index
    %31 = vector.load %arg6[%c0_18, %c0_19, %c0_20, %c0_21] : memref<1x8x16x128xf32, #tpu.memory_space<vmem>>, vector<1x8x16x128xf32>
    tpu.vector_store %arg6[%c0_18, %c0_19, %c0_20, %c0_21], %30 {strides = array<i32>} : memref<1x8x16x128xf32, #tpu.memory_space<vmem>>, vector<1x8x16x128xf32>,
    %cst_22 = arith.constant dense<0.000000e+00> : vector<128xf32>
    %32 = vector.multi_reduction <add>, %29, %cst_22 [0] : vector<128x128xf32> to vector<128xf32>
    %33 = vector.shape_cast %32 : vector<128xf32> to vector<1x128xf32>
    %34 = arith.mulf %29, %29 : vector<128x128xf32>
    %cst_23 = arith.constant dense<0.000000e+00> : vector<128xf32>
    %35 = vector.multi_reduction <add>, %34, %cst_23 [0] : vector<128x128xf32> to vector<128xf32>
    %36 = vector.shape_cast %35 : vector<128xf32> to vector<1x128xf32>
    %cst_24 = arith.constant 0.000000e+00 : f32
    %37 = vector.broadcast %cst_24 : f32 to vector<6x128xf32>
    %38 = tpu.concatenate %33, %36, %37 in 0 : vector<1x128xf32>, vector<1x128xf32>, vector<6x128xf32> -> vector<8x128xf32>
    %39 = vector.shape_cast %38 : vector<8x128xf32> to vector<1x1x8x128xf32>
    %c0_25 = arith.constant 0 : index
    %c0_26 = arith.constant 0 : index
    %c0_27 = arith.constant 0 : index
    %c0_28 = arith.constant 0 : index
    %40 = vector.load %arg7[%c0_25, %c0_26, %c0_27, %c0_28] : memref<1x1x8x128xf32, #tpu.memory_space<vmem>>, vector<1x1x8x128xf32>
    tpu.vector_store %arg7[%c0_25, %c0_26, %c0_27, %c0_28], %39 {strides = array<i32>} : memref<1x1x8x128xf32, #tpu.memory_space<vmem>>, vector<1x1x8x128xf32>,
    return
  }
  func.func @transform_0(%arg0: i32, %arg1: i32) -> (i32, i32, i32, i32) {
    %c0_i32 = arith.constant 0 : i32
    %c0_i32_0 = arith.constant 0 : i32
    %c0_i32_1 = arith.constant 0 : i32
    return %arg0, %arg1, %c0_i32, %c0_i32_0 : i32, i32, i32, i32
  }
  func.func @transform_1(%arg0: i32, %arg1: i32) -> (i32, i32, i32, i32) {
    %c1_i32 = arith.constant 1 : i32
    %0 = arith.addi %arg1, %c1_i32 : i32
    %c4_i32 = arith.constant 4 : i32
    %1 = arith.muli %0, %c4_i32 : i32
    %c0_i32 = arith.constant 0 : i32
    %c0_i32_0 = arith.constant 0 : i32
    %c0_i32_1 = arith.constant 0 : i32
    return %arg0, %1, %c0_i32, %c0_i32_0 : i32, i32, i32, i32
  }
  func.func @transform_2(%arg0: i32, %arg1: i32) -> (i32, i32, i32) {
    %c0_i32 = arith.constant 0 : i32
    %c0_i32_0 = arith.constant 0 : i32
    %c0_i32_1 = arith.constant 0 : i32
    %c0_i32_2 = arith.constant 0 : i32
    return %c0_i32, %c0_i32_0, %c0_i32_1 : i32, i32, i32
  }
  func.func @transform_3(%arg0: i32, %arg1: i32) -> (i32, i32) {
    %c0_i32 = arith.constant 0 : i32
    %c0_i32_0 = arith.constant 0 : i32
    %c0_i32_1 = arith.constant 0 : i32
    return %c0_i32, %c0_i32_0 : i32, i32
  }
  func.func @transform_4(%arg0: i32, %arg1: i32) -> (i32, i32, i32, i32) {
    %c0_i32 = arith.constant 0 : i32
    %c0_i32_0 = arith.constant 0 : i32
    %c0_i32_1 = arith.constant 0 : i32
    return %arg0, %arg1, %c0_i32, %c0_i32_0 : i32, i32, i32, i32
  }
  func.func @transform_5(%arg0: i32, %arg1: i32) -> (i32, i32, i32, i32) {
    %c0_i32 = arith.constant 0 : i32
    %c0_i32_0 = arith.constant 0 : i32
    %c0_i32_1 = arith.constant 0 : i32
    return %arg0, %arg1, %c0_i32, %c0_i32_0 : i32, i32, i32, i32
  }
}

module attributes {stable_mosaic.version = 11 : i64} {
  func.func @_bn_conv_stats_kernel(%arg0: i32, %arg1: i32, %arg2: memref<1x8x16x128xf32, #tpu.memory_space<vmem>>, %arg3: memref<1x1x16x128xf32, #tpu.memory_space<vmem>>, %arg4: memref<1x1x16x128xf32, #tpu.memory_space<vmem>>, %arg5: memref<1x128xf32, #tpu.memory_space<vmem>>, %arg6: memref<1x128xf32, #tpu.memory_space<vmem>>, %arg7: memref<3x384x128xbf16, #tpu.memory_space<vmem>>, %arg8: memref<1x128xf32, #tpu.memory_space<vmem>>, %arg9: memref<1x8x16x128xf32, #tpu.memory_space<vmem>>, %arg10: memref<1x1x8x128xf32, #tpu.memory_space<vmem>>) attributes {dimension_semantics = [#tpu.dimension_semantics<parallel>, #tpu.dimension_semantics<parallel>], iteration_bounds = array<i64: 2, 2>, scalar_prefetch = 0 : i64, scratch_operands = 0 : i64, tpu.core_type = #tpu.core_type<tc>, window_params = [{transform_indices = @transform_0, window_bounds = array<i64: 1, 8, 16, 128>}, {transform_indices = @transform_1, window_bounds = array<i64: 1, 1, 16, 128>}, {transform_indices = @transform_2, window_bounds = array<i64: 1, 1, 16, 128>}, {pipeline_mode = #tpu.pipeline_mode<synchronous>, transform_indices = @transform_3, window_bounds = array<i64: 1, 128>}, {pipeline_mode = #tpu.pipeline_mode<synchronous>, transform_indices = @transform_4, window_bounds = array<i64: 1, 128>}, {pipeline_mode = #tpu.pipeline_mode<synchronous>, transform_indices = @transform_5, window_bounds = array<i64: 3, 384, 128>}, {pipeline_mode = #tpu.pipeline_mode<synchronous>, transform_indices = @transform_6, window_bounds = array<i64: 1, 128>}, {transform_indices = @transform_7, window_bounds = array<i64: 1, 8, 16, 128>}, {transform_indices = @transform_8, window_bounds = array<i64: 1, 1, 8, 128>}]} {
    %c0 = arith.constant 0 : index
    %c0_0 = arith.constant 0 : index
    %0 = vector.load %arg5[%c0, %c0_0] : memref<1x128xf32, #tpu.memory_space<vmem>>, vector<1x128xf32>
    %1 = vector.shape_cast %0 : vector<1x128xf32> to vector<1x1x128xf32>
    %c0_1 = arith.constant 0 : index
    %c0_2 = arith.constant 0 : index
    %2 = vector.load %arg6[%c0_1, %c0_2] : memref<1x128xf32, #tpu.memory_space<vmem>>, vector<1x128xf32>
    %3 = vector.shape_cast %2 : vector<1x128xf32> to vector<1x1x128xf32>
    %c0_3 = arith.constant 0 : index
    %c0_4 = arith.constant 0 : index
    %c0_5 = arith.constant 0 : index
    %c0_6 = arith.constant 0 : index
    %4 = vector.load %arg2[%c0_3, %c0_4, %c0_5, %c0_6] : memref<1x8x16x128xf32, #tpu.memory_space<vmem>>, vector<1x8x16x128xf32>
    %5 = vector.shape_cast %4 : vector<1x8x16x128xf32> to vector<8x16x128xf32>
    %6 = vector.broadcast %1 : vector<1x1x128xf32> to vector<8x16x128xf32>
    %7 = arith.mulf %5, %6 : vector<8x16x128xf32>
    %8 = vector.broadcast %3 : vector<1x1x128xf32> to vector<8x16x128xf32>
    %9 = arith.addf %7, %8 : vector<8x16x128xf32>
    %c0_7 = arith.constant 0 : index
    %c0_8 = arith.constant 0 : index
    %c0_9 = arith.constant 0 : index
    %c0_10 = arith.constant 0 : index
    %10 = vector.load %arg3[%c0_7, %c0_8, %c0_9, %c0_10] : memref<1x1x16x128xf32, #tpu.memory_space<vmem>>, vector<1x1x16x128xf32>
    %11 = vector.shape_cast %10 : vector<1x1x16x128xf32> to vector<1x16x128xf32>
    %12 = vector.broadcast %1 : vector<1x1x128xf32> to vector<1x16x128xf32>
    %13 = arith.mulf %11, %12 : vector<1x16x128xf32>
    %14 = vector.broadcast %3 : vector<1x1x128xf32> to vector<1x16x128xf32>
    %15 = arith.addf %13, %14 : vector<1x16x128xf32>
    %c0_i32 = arith.constant 0 : i32
    %16 = arith.cmpi sgt, %arg1, %c0_i32 : i32
    %17 = arith.extui %16 : i1 to i32
    %18 = arith.sitofp %17 : i32 to f32
    %19 = vector.broadcast %18 : f32 to vector<1x16x128xf32>
    %20 = arith.mulf %15, %19 : vector<1x16x128xf32>
    %c0_11 = arith.constant 0 : index
    %c0_12 = arith.constant 0 : index
    %c0_13 = arith.constant 0 : index
    %c0_14 = arith.constant 0 : index
    %21 = vector.load %arg4[%c0_11, %c0_12, %c0_13, %c0_14] : memref<1x1x16x128xf32, #tpu.memory_space<vmem>>, vector<1x1x16x128xf32>
    %22 = vector.shape_cast %21 : vector<1x1x16x128xf32> to vector<1x16x128xf32>
    %23 = vector.broadcast %1 : vector<1x1x128xf32> to vector<1x16x128xf32>
    %24 = arith.mulf %22, %23 : vector<1x16x128xf32>
    %25 = vector.broadcast %3 : vector<1x1x128xf32> to vector<1x16x128xf32>
    %26 = arith.addf %24, %25 : vector<1x16x128xf32>
    %c1_i32 = arith.constant 1 : i32
    %27 = arith.cmpi slt, %arg1, %c1_i32 : i32
    %28 = arith.extui %27 : i1 to i32
    %29 = arith.sitofp %28 : i32 to f32
    %30 = vector.broadcast %29 : f32 to vector<1x16x128xf32>
    %31 = arith.mulf %26, %30 : vector<1x16x128xf32>
    %32 = tpu.concatenate %20, %9, %31 in 0 : vector<1x16x128xf32>, vector<8x16x128xf32>, vector<1x16x128xf32> -> vector<10x16x128xf32>
    %cst = arith.constant 0.000000e+00 : f32
    %33 = vector.broadcast %cst : f32 to vector<10x1x128xf32>
    %34 = tpu.concatenate %33, %32, %33 in 1 : vector<10x1x128xf32>, vector<10x16x128xf32>, vector<10x1x128xf32> -> vector<10x18x128xf32>
    %35 = arith.truncf %34 : vector<10x18x128xf32> to vector<10x18x128xbf16>
    %36 = vector.extract_strided_slice %35 {offsets = [0, 0, 0], sizes = [10, 16, 128], strides = [1, 1, 1]} : vector<10x18x128xbf16> to vector<10x16x128xbf16>
    %37 = vector.extract_strided_slice %35 {offsets = [0, 1, 0], sizes = [10, 16, 128], strides = [1, 1, 1]} : vector<10x18x128xbf16> to vector<10x16x128xbf16>
    %38 = vector.extract_strided_slice %35 {offsets = [0, 2, 0], sizes = [10, 16, 128], strides = [1, 1, 1]} : vector<10x18x128xbf16> to vector<10x16x128xbf16>
    %39 = tpu.concatenate %36, %37, %38 in 2 : vector<10x16x128xbf16>, vector<10x16x128xbf16>, vector<10x16x128xbf16> -> vector<10x16x384xbf16>
    %c0_15 = arith.constant 0 : index
    %c0_16 = arith.constant 0 : index
    %40 = vector.load %arg8[%c0_15, %c0_16] : memref<1x128xf32, #tpu.memory_space<vmem>>, vector<1x128xf32>
    %41 = vector.shape_cast %40 : vector<1x128xf32> to vector<1x128xf32>
    %42 = vector.broadcast %41 : vector<1x128xf32> to vector<128x128xf32>
    %43 = vector.extract_strided_slice %39 {offsets = [0, 0, 0], sizes = [8, 16, 384], strides = [1, 1, 1]} : vector<10x16x384xbf16> to vector<8x16x384xbf16>
    %44 = vector.shape_cast %43 : vector<8x16x384xbf16> to vector<128x384xbf16>
    %c0_17 = arith.constant 0 : index
    %c0_18 = arith.constant 0 : index
    %c0_19 = arith.constant 0 : index
    %45 = vector.load %arg7[%c0_17, %c0_18, %c0_19] : memref<3x384x128xbf16, #tpu.memory_space<vmem>>, vector<1x384x128xbf16>
    %46 = vector.shape_cast %45 : vector<1x384x128xbf16> to vector<384x128xbf16>
    %cst_20 = arith.constant dense<0.000000e+00> : vector<128x128xf32>
    %47 = tpu.matmul %44, %46, %cst_20 {dimension_numbers = #tpu.dot_dimension_numbers<[1], [0], [0], [1], [0, 0, 1, 1], [], []>} : vector<128x384xbf16>, vector<384x128xbf16>, vector<128x128xf32> -> vector<128x128xf32>
    %48 = arith.addf %42, %47 : vector<128x128xf32>
    %49 = vector.extract_strided_slice %39 {offsets = [1, 0, 0], sizes = [8, 16, 384], strides = [1, 1, 1]} : vector<10x16x384xbf16> to vector<8x16x384xbf16>
    %50 = vector.shape_cast %49 : vector<8x16x384xbf16> to vector<128x384xbf16>
    %c1 = arith.constant 1 : index
    %c0_21 = arith.constant 0 : index
    %c0_22 = arith.constant 0 : index
    %51 = vector.load %arg7[%c1, %c0_21, %c0_22] : memref<3x384x128xbf16, #tpu.memory_space<vmem>>, vector<1x384x128xbf16>
    %52 = vector.shape_cast %51 : vector<1x384x128xbf16> to vector<384x128xbf16>
    %cst_23 = arith.constant dense<0.000000e+00> : vector<128x128xf32>
    %53 = tpu.matmul %50, %52, %cst_23 {dimension_numbers = #tpu.dot_dimension_numbers<[1], [0], [0], [1], [0, 0, 1, 1], [], []>} : vector<128x384xbf16>, vector<384x128xbf16>, vector<128x128xf32> -> vector<128x128xf32>
    %54 = arith.addf %48, %53 : vector<128x128xf32>
    %55 = vector.extract_strided_slice %39 {offsets = [2, 0, 0], sizes = [8, 16, 384], strides = [1, 1, 1]} : vector<10x16x384xbf16> to vector<8x16x384xbf16>
    %56 = vector.shape_cast %55 : vector<8x16x384xbf16> to vector<128x384xbf16>
    %c2 = arith.constant 2 : index
    %c0_24 = arith.constant 0 : index
    %c0_25 = arith.constant 0 : index
    %57 = vector.load %arg7[%c2, %c0_24, %c0_25] : memref<3x384x128xbf16, #tpu.memory_space<vmem>>, vector<1x384x128xbf16>
    %58 = vector.shape_cast %57 : vector<1x384x128xbf16> to vector<384x128xbf16>
    %cst_26 = arith.constant dense<0.000000e+00> : vector<128x128xf32>
    %59 = tpu.matmul %56, %58, %cst_26 {dimension_numbers = #tpu.dot_dimension_numbers<[1], [0], [0], [1], [0, 0, 1, 1], [], []>} : vector<128x384xbf16>, vector<384x128xbf16>, vector<128x128xf32> -> vector<128x128xf32>
    %60 = arith.addf %54, %59 : vector<128x128xf32>
    %61 = vector.shape_cast %60 : vector<128x128xf32> to vector<1x8x16x128xf32>
    %c0_27 = arith.constant 0 : index
    %c0_28 = arith.constant 0 : index
    %c0_29 = arith.constant 0 : index
    %c0_30 = arith.constant 0 : index
    %62 = vector.load %arg9[%c0_27, %c0_28, %c0_29, %c0_30] : memref<1x8x16x128xf32, #tpu.memory_space<vmem>>, vector<1x8x16x128xf32>
    tpu.vector_store %arg9[%c0_27, %c0_28, %c0_29, %c0_30], %61 {strides = array<i32>} : memref<1x8x16x128xf32, #tpu.memory_space<vmem>>, vector<1x8x16x128xf32>,
    %cst_31 = arith.constant dense<0.000000e+00> : vector<128xf32>
    %63 = vector.multi_reduction <add>, %60, %cst_31 [0] : vector<128x128xf32> to vector<128xf32>
    %64 = vector.shape_cast %63 : vector<128xf32> to vector<1x128xf32>
    %65 = arith.mulf %60, %60 : vector<128x128xf32>
    %cst_32 = arith.constant dense<0.000000e+00> : vector<128xf32>
    %66 = vector.multi_reduction <add>, %65, %cst_32 [0] : vector<128x128xf32> to vector<128xf32>
    %67 = vector.shape_cast %66 : vector<128xf32> to vector<1x128xf32>
    %cst_33 = arith.constant 0.000000e+00 : f32
    %68 = vector.broadcast %cst_33 : f32 to vector<6x128xf32>
    %69 = tpu.concatenate %64, %67, %68 in 0 : vector<1x128xf32>, vector<1x128xf32>, vector<6x128xf32> -> vector<8x128xf32>
    %70 = vector.shape_cast %69 : vector<8x128xf32> to vector<1x1x8x128xf32>
    %c0_34 = arith.constant 0 : index
    %c0_35 = arith.constant 0 : index
    %c0_36 = arith.constant 0 : index
    %c0_37 = arith.constant 0 : index
    %71 = vector.load %arg10[%c0_34, %c0_35, %c0_36, %c0_37] : memref<1x1x8x128xf32, #tpu.memory_space<vmem>>, vector<1x1x8x128xf32>
    tpu.vector_store %arg10[%c0_34, %c0_35, %c0_36, %c0_37], %70 {strides = array<i32>} : memref<1x1x8x128xf32, #tpu.memory_space<vmem>>, vector<1x1x8x128xf32>,
    return
  }
  func.func @transform_0(%arg0: i32, %arg1: i32) -> (i32, i32, i32, i32) {
    %c0_i32 = arith.constant 0 : i32
    %c0_i32_0 = arith.constant 0 : i32
    %c0_i32_1 = arith.constant 0 : i32
    return %arg0, %arg1, %c0_i32, %c0_i32_0 : i32, i32, i32, i32
  }
  func.func @transform_1(%arg0: i32, %arg1: i32) -> (i32, i32, i32, i32) {
    %c8_i32 = arith.constant 8 : i32
    %0 = arith.muli %arg1, %c8_i32 : i32
    %c1_i32 = arith.constant 1 : i32
    %1 = arith.subi %0, %c1_i32 : i32
    %c0_i32 = arith.constant 0 : i32
    %2 = arith.maxsi %1, %c0_i32 : i32
    %c0_i32_0 = arith.constant 0 : i32
    %c0_i32_1 = arith.constant 0 : i32
    %c0_i32_2 = arith.constant 0 : i32
    return %arg0, %2, %c0_i32_0, %c0_i32_1 : i32, i32, i32, i32
  }
  func.func @transform_2(%arg0: i32, %arg1: i32) -> (i32, i32, i32, i32) {
    %c8_i32 = arith.constant 8 : i32
    %0 = arith.muli %arg1, %c8_i32 : i32
    %c8_i32_0 = arith.constant 8 : i32
    %1 = arith.addi %0, %c8_i32_0 : i32
    %c15_i32 = arith.constant 15 : i32
    %2 = arith.minsi %1, %c15_i32 : i32
    %c0_i32 = arith.constant 0 : i32
    %c0_i32_1 = arith.constant 0 : i32
    %c0_i32_2 = arith.constant 0 : i32
    return %arg0, %2, %c0_i32, %c0_i32_1 : i32, i32, i32, i32
  }
  func.func @transform_3(%arg0: i32, %arg1: i32) -> (i32, i32) {
    %c0_i32 = arith.constant 0 : i32
    %c0_i32_0 = arith.constant 0 : i32
    %c0_i32_1 = arith.constant 0 : i32
    return %c0_i32, %c0_i32_0 : i32, i32
  }
  func.func @transform_4(%arg0: i32, %arg1: i32) -> (i32, i32) {
    %c0_i32 = arith.constant 0 : i32
    %c0_i32_0 = arith.constant 0 : i32
    %c0_i32_1 = arith.constant 0 : i32
    return %c0_i32, %c0_i32_0 : i32, i32
  }
  func.func @transform_5(%arg0: i32, %arg1: i32) -> (i32, i32, i32) {
    %c0_i32 = arith.constant 0 : i32
    %c0_i32_0 = arith.constant 0 : i32
    %c0_i32_1 = arith.constant 0 : i32
    %c0_i32_2 = arith.constant 0 : i32
    return %c0_i32, %c0_i32_0, %c0_i32_1 : i32, i32, i32
  }
  func.func @transform_6(%arg0: i32, %arg1: i32) -> (i32, i32) {
    %c0_i32 = arith.constant 0 : i32
    %c0_i32_0 = arith.constant 0 : i32
    %c0_i32_1 = arith.constant 0 : i32
    return %c0_i32, %c0_i32_0 : i32, i32
  }
  func.func @transform_7(%arg0: i32, %arg1: i32) -> (i32, i32, i32, i32) {
    %c0_i32 = arith.constant 0 : i32
    %c0_i32_0 = arith.constant 0 : i32
    %c0_i32_1 = arith.constant 0 : i32
    return %arg0, %arg1, %c0_i32, %c0_i32_0 : i32, i32, i32, i32
  }
  func.func @transform_8(%arg0: i32, %arg1: i32) -> (i32, i32, i32, i32) {
    %c0_i32 = arith.constant 0 : i32
    %c0_i32_0 = arith.constant 0 : i32
    %c0_i32_1 = arith.constant 0 : i32
    return %arg0, %arg1, %c0_i32, %c0_i32_0 : i32, i32, i32, i32
  }
}

module attributes {stable_mosaic.version = 11 : i64} {
  func.func @_bn_relu_pool_kernel(%arg0: i32, %arg1: i32, %arg2: memref<1x8x16x128xf32, #tpu.memory_space<vmem>>, %arg3: memref<1x128xf32, #tpu.memory_space<vmem>>, %arg4: memref<1x128xf32, #tpu.memory_space<vmem>>, %arg5: memref<1x8x16x128xf32, #tpu.memory_space<vmem>>, %arg6: memref<1x4x8x128xf32, #tpu.memory_space<vmem>>) attributes {dimension_semantics = [#tpu.dimension_semantics<parallel>, #tpu.dimension_semantics<parallel>], iteration_bounds = array<i64: 2, 2>, scalar_prefetch = 0 : i64, scratch_operands = 0 : i64, tpu.core_type = #tpu.core_type<tc>, window_params = [{transform_indices = @transform_0, window_bounds = array<i64: 1, 8, 16, 128>}, {pipeline_mode = #tpu.pipeline_mode<synchronous>, transform_indices = @transform_1, window_bounds = array<i64: 1, 128>}, {pipeline_mode = #tpu.pipeline_mode<synchronous>, transform_indices = @transform_2, window_bounds = array<i64: 1, 128>}, {transform_indices = @transform_3, window_bounds = array<i64: 1, 8, 16, 128>}, {transform_indices = @transform_4, window_bounds = array<i64: 1, 4, 8, 128>}]} {
    %c0 = arith.constant 0 : index
    %c0_0 = arith.constant 0 : index
    %0 = vector.load %arg3[%c0, %c0_0] : memref<1x128xf32, #tpu.memory_space<vmem>>, vector<1x128xf32>
    %1 = vector.shape_cast %0 : vector<1x128xf32> to vector<1x1x128xf32>
    %c0_1 = arith.constant 0 : index
    %c0_2 = arith.constant 0 : index
    %2 = vector.load %arg4[%c0_1, %c0_2] : memref<1x128xf32, #tpu.memory_space<vmem>>, vector<1x128xf32>
    %3 = vector.shape_cast %2 : vector<1x128xf32> to vector<1x1x128xf32>
    %c0_3 = arith.constant 0 : index
    %c0_4 = arith.constant 0 : index
    %c0_5 = arith.constant 0 : index
    %c0_6 = arith.constant 0 : index
    %4 = vector.load %arg2[%c0_3, %c0_4, %c0_5, %c0_6] : memref<1x8x16x128xf32, #tpu.memory_space<vmem>>, vector<1x8x16x128xf32>
    %5 = vector.shape_cast %4 : vector<1x8x16x128xf32> to vector<8x16x128xf32>
    %6 = vector.broadcast %1 : vector<1x1x128xf32> to vector<8x16x128xf32>
    %7 = arith.mulf %5, %6 : vector<8x16x128xf32>
    %8 = vector.broadcast %3 : vector<1x1x128xf32> to vector<8x16x128xf32>
    %9 = arith.addf %7, %8 : vector<8x16x128xf32>
    %cst = arith.constant 0.000000e+00 : f32
    %10 = vector.broadcast %cst : f32 to vector<8x16x128xf32>
    %11 = arith.maximumf %9, %10 : vector<8x16x128xf32>
    %12 = vector.shape_cast %11 : vector<8x16x128xf32> to vector<1x8x16x128xf32>
    %c0_7 = arith.constant 0 : index
    %c0_8 = arith.constant 0 : index
    %c0_9 = arith.constant 0 : index
    %c0_10 = arith.constant 0 : index
    %13 = vector.load %arg5[%c0_7, %c0_8, %c0_9, %c0_10] : memref<1x8x16x128xf32, #tpu.memory_space<vmem>>, vector<1x8x16x128xf32>
    tpu.vector_store %arg5[%c0_7, %c0_8, %c0_9, %c0_10], %12 {strides = array<i32>} : memref<1x8x16x128xf32, #tpu.memory_space<vmem>>, vector<1x8x16x128xf32>,
    %14 = vector.shape_cast %11 : vector<8x16x128xf32> to vector<4x2x16x128xf32>
    %cst_11 = arith.constant dense<0xFF800000> : vector<4x16x128xf32>
    %15 = vector.multi_reduction <maximumf>, %14, %cst_11 [1] : vector<4x2x16x128xf32> to vector<4x16x128xf32>
    %16 = vector.extract_strided_slice %15 {offsets = [0, 0, 0], sizes = [4, 2, 128], strides = [1, 1, 1]} : vector<4x16x128xf32> to vector<4x2x128xf32>
    %cst_12 = arith.constant dense<0xFF800000> : vector<4x128xf32>
    %17 = vector.multi_reduction <maximumf>, %16, %cst_12 [1] : vector<4x2x128xf32> to vector<4x128xf32>
    %18 = vector.shape_cast %17 : vector<4x128xf32> to vector<4x1x128xf32>
    %19 = vector.extract_strided_slice %15 {offsets = [0, 2, 0], sizes = [4, 2, 128], strides = [1, 1, 1]} : vector<4x16x128xf32> to vector<4x2x128xf32>
    %cst_13 = arith.constant dense<0xFF800000> : vector<4x128xf32>
    %20 = vector.multi_reduction <maximumf>, %19, %cst_13 [1] : vector<4x2x128xf32> to vector<4x128xf32>
    %21 = vector.shape_cast %20 : vector<4x128xf32> to vector<4x1x128xf32>
    %22 = vector.extract_strided_slice %15 {offsets = [0, 4, 0], sizes = [4, 2, 128], strides = [1, 1, 1]} : vector<4x16x128xf32> to vector<4x2x128xf32>
    %cst_14 = arith.constant dense<0xFF800000> : vector<4x128xf32>
    %23 = vector.multi_reduction <maximumf>, %22, %cst_14 [1] : vector<4x2x128xf32> to vector<4x128xf32>
    %24 = vector.shape_cast %23 : vector<4x128xf32> to vector<4x1x128xf32>
    %25 = vector.extract_strided_slice %15 {offsets = [0, 6, 0], sizes = [4, 2, 128], strides = [1, 1, 1]} : vector<4x16x128xf32> to vector<4x2x128xf32>
    %cst_15 = arith.constant dense<0xFF800000> : vector<4x128xf32>
    %26 = vector.multi_reduction <maximumf>, %25, %cst_15 [1] : vector<4x2x128xf32> to vector<4x128xf32>
    %27 = vector.shape_cast %26 : vector<4x128xf32> to vector<4x1x128xf32>
    %28 = vector.extract_strided_slice %15 {offsets = [0, 8, 0], sizes = [4, 2, 128], strides = [1, 1, 1]} : vector<4x16x128xf32> to vector<4x2x128xf32>
    %cst_16 = arith.constant dense<0xFF800000> : vector<4x128xf32>
    %29 = vector.multi_reduction <maximumf>, %28, %cst_16 [1] : vector<4x2x128xf32> to vector<4x128xf32>
    %30 = vector.shape_cast %29 : vector<4x128xf32> to vector<4x1x128xf32>
    %31 = vector.extract_strided_slice %15 {offsets = [0, 10, 0], sizes = [4, 2, 128], strides = [1, 1, 1]} : vector<4x16x128xf32> to vector<4x2x128xf32>
    %cst_17 = arith.constant dense<0xFF800000> : vector<4x128xf32>
    %32 = vector.multi_reduction <maximumf>, %31, %cst_17 [1] : vector<4x2x128xf32> to vector<4x128xf32>
    %33 = vector.shape_cast %32 : vector<4x128xf32> to vector<4x1x128xf32>
    %34 = vector.extract_strided_slice %15 {offsets = [0, 12, 0], sizes = [4, 2, 128], strides = [1, 1, 1]} : vector<4x16x128xf32> to vector<4x2x128xf32>
    %cst_18 = arith.constant dense<0xFF800000> : vector<4x128xf32>
    %35 = vector.multi_reduction <maximumf>, %34, %cst_18 [1] : vector<4x2x128xf32> to vector<4x128xf32>
    %36 = vector.shape_cast %35 : vector<4x128xf32> to vector<4x1x128xf32>
    %37 = vector.extract_strided_slice %15 {offsets = [0, 14, 0], sizes = [4, 2, 128], strides = [1, 1, 1]} : vector<4x16x128xf32> to vector<4x2x128xf32>
    %cst_19 = arith.constant dense<0xFF800000> : vector<4x128xf32>
    %38 = vector.multi_reduction <maximumf>, %37, %cst_19 [1] : vector<4x2x128xf32> to vector<4x128xf32>
    %39 = vector.shape_cast %38 : vector<4x128xf32> to vector<4x1x128xf32>
    %40 = tpu.concatenate %18, %21, %24, %27, %30, %33, %36, %39 in 1 : vector<4x1x128xf32>, vector<4x1x128xf32>, vector<4x1x128xf32>, vector<4x1x128xf32>, vector<4x1x128xf32>, vector<4x1x128xf32>, vector<4x1x128xf32>, vector<4x1x128xf32> -> vector<4x8x128xf32>
    %41 = vector.shape_cast %40 : vector<4x8x128xf32> to vector<1x4x8x128xf32>
    %c0_20 = arith.constant 0 : index
    %c0_21 = arith.constant 0 : index
    %c0_22 = arith.constant 0 : index
    %c0_23 = arith.constant 0 : index
    %42 = vector.load %arg6[%c0_20, %c0_21, %c0_22, %c0_23] : memref<1x4x8x128xf32, #tpu.memory_space<vmem>>, vector<1x4x8x128xf32>
    tpu.vector_store %arg6[%c0_20, %c0_21, %c0_22, %c0_23], %41 {strides = array<i32>} : memref<1x4x8x128xf32, #tpu.memory_space<vmem>>, vector<1x4x8x128xf32>,
    return
  }
  func.func @transform_0(%arg0: i32, %arg1: i32) -> (i32, i32, i32, i32) {
    %c0_i32 = arith.constant 0 : i32
    %c0_i32_0 = arith.constant 0 : i32
    %c0_i32_1 = arith.constant 0 : i32
    return %arg0, %arg1, %c0_i32, %c0_i32_0 : i32, i32, i32, i32
  }
  func.func @transform_1(%arg0: i32, %arg1: i32) -> (i32, i32) {
    %c0_i32 = arith.constant 0 : i32
    %c0_i32_0 = arith.constant 0 : i32
    %c0_i32_1 = arith.constant 0 : i32
    return %c0_i32, %c0_i32_0 : i32, i32
  }
  func.func @transform_2(%arg0: i32, %arg1: i32) -> (i32, i32) {
    %c0_i32 = arith.constant 0 : i32
    %c0_i32_0 = arith.constant 0 : i32
    %c0_i32_1 = arith.constant 0 : i32
    return %c0_i32, %c0_i32_0 : i32, i32
  }
  func.func @transform_3(%arg0: i32, %arg1: i32) -> (i32, i32, i32, i32) {
    %c0_i32 = arith.constant 0 : i32
    %c0_i32_0 = arith.constant 0 : i32
    %c0_i32_1 = arith.constant 0 : i32
    return %arg0, %arg1, %c0_i32, %c0_i32_0 : i32, i32, i32, i32
  }
  func.func @transform_4(%arg0: i32, %arg1: i32) -> (i32, i32, i32, i32) {
    %c0_i32 = arith.constant 0 : i32
    %c0_i32_0 = arith.constant 0 : i32
    %c0_i32_1 = arith.constant 0 : i32
    return %arg0, %arg1, %c0_i32, %c0_i32_0 : i32, i32, i32, i32
  }
}

</mosaic_0001>

<bundles_post_ra>
// kernel: encoder_block_forward.5
= control target key start
LH: loop header
LB: loop body
LE: loop exit
PB: predicated region body
PF: predicated region fallthrough
CT: control target
= control target key end

     0   :  { %s908_s15 = smov 0   ;;  %s910_s16 = smov 0   ;;  %s1294_s0 = inlined_call_operand.vmem [shape: f32[2,16,16,128], index: 0, kind: input, shape index: {}]   ;;  %s1295_s1 = inlined_call_operand.vmem [shape: f32[1,128], index: 1, kind: input, shape index: {}]   ;;  %s1296_s2 = inlined_call_operand.vmem [shape: f32[1,128], index: 2, kind: input, shape index: {}]   ;;  %s1297_s3 = inlined_call_operand.vmem [shape: f32[2,16,16,128], index: 3, kind: output, shape index: {0}]   ;;  %s1298_s4 = inlined_call_operand.vmem [shape: f32[2,8,8,128], index: 4, kind: output, shape index: {1}]  }
   0x1   :  { %s912_s17 = smov 0   ;;  %s914_s18 = smov 0  }
   0x2   :  { %s916_s19 = smov 0  }
   0x3 LB: > { %s24_s20 = sadd.s32 1, %s873_s17  ;;  %s27_s21 = sadd.s32 1, %s877_s18  ;;  %s881_s19 = sphi %s916_s19, %s15_s19   ;;  %s877_s18 = sphi %s914_s18, %s1303_s18   ;;  %s873_s17 = sphi %s912_s17, %s1302_s17   ;;  %s869_s16 = sphi %s910_s16, %s1301_s16   ;;  %s865_s15 = sphi %s908_s15, %s1300_s15  }
   0x4   : > { %p25_p0 = scmp.ge.s32.totalorder %s24_s20, 2  ;;  %p787_p1 = scmp.ge.s32.totalorder %s881_s19, 1 }
   0x5   : > { %p189_p2 = scmp.lt.s32.totalorder %s881_s19, 5 }
   0x6   : > { %s1305_s20 = smov (%p25_p0, %s24_s20), 0  ;;  %s1307_s21 = smov (!%p25_p0, %s27_s21), %s877_s18 }
   0x7   : > { %p190_p3 = pnand %p787_p1, %p189_p2  ;;  %p29_p4 = scmp.ge.s32.totalorder %s1307_s21, 2 }
   0x8   : > { %s788_s22 = sshll.u32 (!%p190_p3), %s865_s15, 3  ;;  %p235_p5 = scmp.lt.s32.totalorder (!%p190_p3), %s869_s16, 1  ;;  %v947_v0 = vld [vmem:[%s1295_s1] ss:$0 sm:$0xff] (!%p190_p3)  ;;  %vm368_vm0 = vcmask (!%p190_p3), 1041408   ;;  %vm397_vm1 = vcmask (!%p190_p3), 1043458  }
   0x9   : > { %s1309_s21 = smov (%p29_p4, %s1307_s21), 0  ;;  %193 = sbr.rel (%p190_p3) target bundleno = 107 (0x6b), region = 32 }
   0xa   : > { %p237_p6 = scmp.lt.s32.totalorder (!%p190_p3), %s788_s22, 15  ;;  %v957_v1 = vld [vmem:[%s1296_s2] ss:$0 sm:$0xff] (!%p190_p3)  ;;  %vm426_vm2 = vcmask (!%p190_p3), 1045508   ;;  %vm455_vm3 = vcmask (!%p190_p3), 1047558   ;;  %vm596_vm4 = vcmask (!%p190_p3), 1040384  }
   0xb   : > { %vm605_vm5 = vcmask (!%p190_p3), 1042432   ;;  %vm610_vm6 = vcmask (!%p190_p3), 1043456   ;;  %s796_s11 = sshll.u32 (!%p190_p3), %s865_s15, 2  ;;  %vm615_vm7 = vcmask (!%p190_p3), 1044480   ;;  %vm620_vm8 = vcmask (!%p190_p3), 1045504  }
   0xc   : > { %p1163_p7 = scmp.lt.s32.totalorder (!%p190_p3), %s796_s11, 7  ;;  %vm625_vm9 = vcmask (!%p190_p3), 1046528  }
  0x10   : > { %s1311_s16 = smov (!%p235_p5, %s869_s16), 1  ;;  %s1313_s22 = smov (!%p237_p6, %s788_s22), 15 }
  0x11   : > { %s790_s23 = sshll.u32 %s1311_s16, 5  ;;  %s789_s24 = sshll.u32 %s1313_s22, 1 }
  0x12   : > { %s241_s25 = sadd.s32 %s790_s23, %s789_s24  ;;  %s1315_s11 = smov (!%p1163_p7, %s796_s11), 7 }
  0x13   : > { %s791_s26 = sshll.u32 %s241_s25, 3  ;;  %s797_s13 = sshll.u32 %s1311_s16, 3 }
  0x14   : > { %s952_s5 = scalar_lea.vmem %s1294_s0, %s791_s26  ;;  %s980_s10 = scalar_lea.vmem %s1297_s3, %s791_s26 }
  0x15   : > { %v268_v2 = vld [vmem:[%s952_s5] sm:$0xff]  ;;  %v269_v3 = vld [vmem:[%s952_s5 + $0x8] sm:$0xff]  ;;  %v270_v4 = vld [vmem:[%s952_s5 + $0x10] sm:$0xff]  ;;  %s262_s14 = sadd.s32 %s797_s13, %s1315_s11 }
  0x16   : > { %v290_v5 = vmul.f32 %v947_v0, %v268_v2  ;;  %v291_v6 = vmul.f32 %v947_v0, %v269_v3  ;;  %v292_v7 = vmul.f32 %v947_v0, %v270_v4  ;;  %v271_v8 = vld [vmem:[%s952_s5 + $0x18] sm:$0xff]  ;;  %v272_v9 = vld [vmem:[%s952_s5 + $0x20] sm:$0xff]  ;;  %v273_v10 = vld [vmem:[%s952_s5 + $0x28] sm:$0xff]  ;;  %s798_s15 = sshll.u32 %s262_s14, 3 }
  0x17   : > { %v293_v11 = vmul.f32 %v947_v0, %v271_v8  ;;  %v294_v12 = vmul.f32 %v947_v0, %v272_v9  ;;  %v295_v13 = vmul.f32 %v947_v0, %v273_v10  ;;  %v274_v14 = vld [vmem:[%s952_s5 + $0x30] sm:$0xff]  ;;  %v275_v15 = vld [vmem:[%s952_s5 + $0x38] sm:$0xff]  ;;  %v276_v24 = vld [vmem:[%s952_s5 + $0x40] sm:$0xff]  ;;  %s1224_s23 = scalar_lea.vmem %s1298_s4, %s798_s15 }
  0x18   : > { %v312_v16 = vadd.f32 %v957_v1, %v290_v5  ;;  %v313_v17 = vadd.f32 %v957_v1, %v291_v6  ;;  %v314_v18 = vadd.f32 %v957_v1, %v292_v7  ;;  %v296_v19 = vmul.f32 %v947_v0, %v274_v14  ;;  %v277_v25 = vld [vmem:[%s952_s5 + $0x48] sm:$0xff]  ;;  %v278_v30 = vld [vmem:[%s952_s5 + $0x50] sm:$0xff]  ;;  %v279_v31 = vld [vmem:[%s952_s5 + $0x58] sm:$0xff] }
  0x19   : > { %v315_v20 = vadd.f32 %v957_v1, %v293_v11  ;;  %v316_v21 = vadd.f32 %v957_v1, %v294_v12  ;;  %v985_v22 = vadd.f32 %v957_v1, %v295_v13  ;;  %v297_v23 = vmul.f32 %v947_v0, %v275_v15 }
  0x1a   : > { %v328_v26 = vmax.f32 %v312_v16, 0.0  ;;  %v329_v27 = vmax.f32 %v313_v17, 0.0  ;;  %v330_v28 = vmax.f32 %v314_v18, 0.0  ;;  %v318_v29 = vadd.f32 %v957_v1, %v296_v19 }
  0x1b   : > { %v331_v32 = vmax.f32 %v315_v20, 0.0  ;;  %v332_v33 = vmax.f32 %v316_v21, 0.0  ;;  %v333_v34 = vmax.f32 %v985_v22, 0.0  ;;  %v319_v35 = vadd.f32 %v957_v1, %v297_v23 }
  0x1c   : > { %344 = vst [vmem:[%s980_s10] sm:$0xff] %v328_v26  ;;  %345 = vst [vmem:[%s980_s10 + $0x8] sm:$0xff] %v329_v27  ;;  %v360_v36 = vmax.f32 %v328_v26, %v330_v28  ;;  %v334_v37 = vmax.f32 %v318_v29, 0.0  ;;  %v999_v38 = vmul.f32 %v947_v0, %v276_v24  ;;  %v1002_v39 = vmul.f32 %v947_v0, %v277_v25 }
  0x1d   : > { %346 = vst [vmem:[%s980_s10 + $0x10] sm:$0xff] %v330_v28  ;;  %347 = vst [vmem:[%s980_s10 + $0x18] sm:$0xff] %v331_v32  ;;  %v1005_v40 = vmax.f32 %v329_v27, %v331_v32  ;;  %v335_v41 = vmax.f32 %v319_v35, 0.0  ;;  %v1010_v42 = vmul.f32 %v947_v0, %v278_v30  ;;  %v1013_v43 = vmul.f32 %v947_v0, %v279_v31 }
  0x1e   : > { %348 = vst [vmem:[%s980_s10 + $0x20] sm:$0xff] %v332_v33  ;;  %349 = vst [vmem:[%s980_s10 + $0x28] sm:$0xff] %v333_v34  ;;  %v369_v44 = vsel %vm368_vm0, %v360_v36, -inf  ;;  %v398_v45 = vsel %vm397_vm1, %v360_v36, -inf  ;;  %v427_v46 = vsel %vm426_vm2, %v360_v36, -inf  ;;  %v456_v47 = vsel %vm455_vm3, %v360_v36, -inf }
  0x1f   : > { %350 = vst [vmem:[%s980_s10 + $0x30] sm:$0xff] %v334_v37  ;;  %v370_v48 = vrot.slane %v369_v44, 4  ;;  %v399_v49 = vrot.slane %v398_v45, 4  ;;  %v428_v50 = vrot.slane %v427_v46, 4  ;;  %v457_v51 = vrot.slane %v456_v47, 4  ;;  %351 = vst [vmem:[%s980_s10 + $0x38] sm:$0xff] %v335_v41 }
  0x20   : > { %v484_v52 = vsel %vm368_vm0, %v1005_v40, -inf  ;;  %v512_v53 = vsel %vm397_vm1, %v1005_v40, -inf  ;;  %v1027_v54 = vsel %vm426_vm2, %v1005_v40, -inf  ;;  %v362_v55 = vmax.f32 %v332_v33, %v334_v37 }
  0x21   : > { %v371_v56 = vmax.f32 %v369_v44, %v370_v48  ;;  %v400_v57 = vmax.f32 %v398_v45, %v399_v49  ;;  %v429_v58 = vmax.f32 %v427_v46, %v428_v50  ;;  %v458_v59 = vmax.f32 %v456_v47, %v457_v51  ;;  %v280_v51 = vld [vmem:[%s952_s5 + $0x60] sm:$0xff] }
  0x22   : > { %v485_v60 = vrot.slane %v484_v52, 4  ;;  %v513_v61 = vrot.slane %v512_v53, 4  ;;  %v541_v62 = vrot.slane %v1027_v54, 4  ;;  %v376_v63 = vsel %vm368_vm0, %v362_v55, -inf }
  0x23   : > { %v372_v2 = vrot.slane %v371_v56, 2  ;;  %v401_v3 = vrot.slane %v400_v57, 2  ;;  %v430_v4 = vrot.slane %v429_v58, 2  ;;  %v459_v5 = vrot.slane %v458_v59, 2 }
  0x24   : > { %v1031_v6 = vmax.f32 %v484_v52, %v485_v60  ;;  %v1033_v7 = vmax.f32 %v512_v53, %v513_v61  ;;  %v377_v8 = vrot.slane %v376_v63, 4  ;;  %v405_v9 = vsel %vm397_vm1, %v362_v55, -inf }
  0x25   : > { %v373_v10 = vmax.f32 %v371_v56, %v372_v2  ;;  %v402_v11 = vmax.f32 %v400_v57, %v401_v3  ;;  %v431_v12 = vmax.f32 %v429_v58, %v430_v4  ;;  %v1036_v13 = vmax.f32 %v458_v59, %v459_v5  ;;  %v281_v57 = vld [vmem:[%s952_s5 + $0x68] sm:$0xff]  ;;  %v282_v58 = vld [vmem:[%s952_s5 + $0x70] sm:$0xff]  ;;  %v283_v59 = vld [vmem:[%s952_s5 + $0x78] sm:$0xff] }
  0x26   : > { %v487_v14 = vrot.slane %v1031_v6, 2  ;;  %v378_v15 = vmax.f32 %v376_v63, %v377_v8  ;;  %v406_v16 = vrot.slane %v405_v9, 4  ;;  %v434_v17 = vsel %vm426_vm2, %v362_v55, -inf }
  0x27   : > { %v374_v18 = vrot.slane %v373_v10, 1  ;;  %v403_v19 = vrot.slane %v402_v11, 1  ;;  %v432_v20 = vrot.slane %v431_v12, 1  ;;  %v435_v21 = vrot.slane %v434_v17, 4 }
  0x28   : > { %v379_v22 = vrot.slane %v378_v15, 2  ;;  %v407_v23 = vmax.f32 %v405_v9, %v406_v16  ;;  %v463_v24 = vsel %vm455_vm3, %v362_v55, -inf  ;;  %v1041_v25 = vmax.f32 %v333_v34, %v335_v41 }
  0x29   : > { %v1043_v26 = vmax.f32 %v373_v10, %v374_v18  ;;  %v1045_v27 = vmax.f32 %v402_v11, %v403_v19  ;;  %v436_v28 = vmax.f32 %v434_v17, %v435_v21  ;;  %v464_v29 = vrot.slane %v463_v24, 4 }
  0x2a   : > { %v380_v30 = vmax.f32 %v378_v15, %v379_v22  ;;  %v408_v31 = vrot.slane %v407_v23, 2  ;;  %v491_v32 = vsel %vm368_vm0, %v1041_v25, -inf  ;;  %v519_v33 = vsel %vm397_vm1, %v1041_v25, -inf }
  0x2b   : > { %v437_v35 = vrot.slane %v436_v28, 2  ;;  %v465_v36 = vmax.f32 %v463_v24, %v464_v29  ;;  %v492_v34 = vrot.slane %v491_v32, 4  ;;  %v520_v37 = vrot.slane %v519_v33, 4 }
  0x2c   : > { %v381_v41 = vrot.slane %v380_v30, 1  ;;  %v409_v44 = vmax.f32 %v407_v23, %v408_v31  ;;  %v1053_v45 = vsel %vm426_vm2, %v1041_v25, -inf  ;;  %v320_v46 = vadd.f32 %v957_v1, %v999_v38 }
  0x2d   : > { %v1057_v47 = vmax.f32 %v436_v28, %v437_v35  ;;  %v466_v48 = vrot.slane %v465_v36, 2  ;;  %v1059_v49 = vmax.f32 %v491_v32, %v492_v34  ;;  %v1061_v50 = vmax.f32 %v519_v33, %v520_v37 }
  0x2e   : > { %v1064_v52 = vmax.f32 %v380_v30, %v381_v41  ;;  %v410_v53 = vrot.slane %v409_v44, 1  ;;  %v548_v55 = vrot.slane %v1053_v45, 4  ;;  %v336_v56 = vmax.f32 %v320_v46, 0.0 }
  0x2f   : > { %v439_v38 = vrot.slane %v1057_v47, 1  ;;  %v1071_v60 = vmax.f32 %v465_v36, %v466_v48  ;;  %v494_v61 = vrot.slane %v1059_v49, 2  ;;  %v321_v63 = vadd.f32 %v957_v1, %v1002_v39 }
  0x30   : > { %v1076_v2 = vmax.f32 %v409_v44, %v410_v53  ;;  %352 = vst [vmem:[%s980_s10 + $0x40] sm:$0xff] %v336_v56  ;;  %v322_v3 = vadd.f32 %v957_v1, %v1010_v42  ;;  %v323_v4 = vadd.f32 %v957_v1, %v1013_v43  ;;  %v302_v5 = vmul.f32 %v947_v0, %v280_v51 }
  0x31   : > { %v337_v8 = vmax.f32 %v321_v63, 0.0  ;;  %v303_v9 = vmul.f32 %v947_v0, %v281_v57  ;;  %v304_v10 = vmul.f32 %v947_v0, %v282_v58  ;;  %v305_v39 = vmul.f32 %v947_v0, %v283_v59 }
  0x32   : > { %v338_v11 = vmax.f32 %v322_v3, 0.0  ;;  %v339_v15 = vmax.f32 %v323_v4, 0.0  ;;  %v324_v16 = vadd.f32 %v957_v1, %v302_v5  ;;  %v1088_v17 = vmax.f32 %v431_v12, %v432_v20 }
  0x33   : > { %353 = vst [vmem:[%s980_s10 + $0x48] sm:$0xff] %v337_v8  ;;  %v1092_v42 = vadd.f32 %v957_v1, %v303_v9  ;;  %v326_v43 = vadd.f32 %v957_v1, %v304_v10  ;;  %v327_v18 = vadd.f32 %v957_v1, %v305_v39  ;;  %v461_v19 = vrot.slane %v1036_v13, 1 }
  0x34   : > { %354 = vst [vmem:[%s980_s10 + $0x50] sm:$0xff] %v338_v11  ;;  %v364_v21 = vmax.f32 %v336_v56, %v338_v11  ;;  %355 = vst [vmem:[%s980_s10 + $0x58] sm:$0xff] %v339_v15  ;;  %v1099_v0 = vmax.f32 %v337_v8, %v339_v15  ;;  %v340_v22 = vmax.f32 %v324_v16, 0.0  ;;  %v1104_v12 = vmax.f32 %v1031_v6, %v487_v14 }
  0x35   : > { %v341_v20 = vmax.f32 %v1092_v42, 0.0  ;;  %v342_v1 = vmax.f32 %v326_v43, 0.0  ;;  %v343_v23 = vmax.f32 %v327_v18, 0.0  ;;  %v1108_v24 = vmax.f32 %v1036_v13, %v461_v19 }
  0x36   : > { %v383_v28 = vsel %vm368_vm0, %v364_v21, -inf  ;;  %v412_v29 = vsel %vm397_vm1, %v364_v21, -inf  ;;  %v441_v30 = vsel %vm426_vm2, %v364_v21, -inf  ;;  %v470_v31 = vsel %vm455_vm3, %v364_v21, -inf  ;;  %356 = vst [vmem:[%s980_s10 + $0x60] sm:$0xff] %v340_v22 }
  0x37   : > { %v384_v32 = vrot.slane %v383_v28, 4  ;;  %v413_v6 = vrot.slane %v412_v29, 4  ;;  %v442_v14 = vrot.slane %v441_v30, 4  ;;  %v471_v33 = vrot.slane %v470_v31, 4  ;;  %357 = vst [vmem:[%s980_s10 + $0x68] sm:$0xff] %v341_v20  ;;  %358 = vst [vmem:[%s980_s10 + $0x70] sm:$0xff] %v342_v1 }
  0x38   : > { %359 = vst [vmem:[%s980_s10 + $0x78] sm:$0xff] %v343_v23  ;;  %v498_v13 = vsel %vm368_vm0, %v1099_v0, -inf  ;;  %v526_v35 = vsel %vm397_vm1, %v1099_v0, -inf  ;;  %v1124_v36 = vsel %vm426_vm2, %v1099_v0, -inf  ;;  %v366_v34 = vmax.f32 %v340_v22, %v342_v1 }
  0x39   : > { %v385_v37 = vmax.f32 %v383_v28, %v384_v32  ;;  %v414_v41 = vmax.f32 %v412_v29, %v413_v6  ;;  %v443_v44 = vmax.f32 %v441_v30, %v442_v14  ;;  %v472_v46 = vmax.f32 %v470_v31, %v471_v33 }
  0x3a   : > { %v499_v48 = vrot.slane %v498_v13, 4  ;;  %v527_v51 = vrot.slane %v526_v35, 4  ;;  %v555_v53 = vrot.slane %v1124_v36, 4  ;;  %v390_v56 = vsel %vm368_vm0, %v366_v34, -inf }
  0x3b   : > { %v386_v57 = vrot.slane %v385_v37, 2  ;;  %v415_v58 = vrot.slane %v414_v41, 2  ;;  %v444_v59 = vrot.slane %v443_v44, 2  ;;  %v473_v63 = vrot.slane %v472_v46, 2 }
  0x3c   : > { %v1128_v3 = vmax.f32 %v498_v13, %v499_v48  ;;  %v1130_v4 = vmax.f32 %v526_v35, %v527_v51  ;;  %v391_v5 = vrot.slane %v390_v56, 4  ;;  %v419_v8 = vsel %vm397_vm1, %v366_v34, -inf }
  0x3d   : > { %v387_v9 = vmax.f32 %v385_v37, %v386_v57  ;;  %v416_v10 = vmax.f32 %v414_v41, %v415_v58  ;;  %v1133_v39 = vmax.f32 %v443_v44, %v444_v59  ;;  %v1135_v11 = vmax.f32 %v472_v46, %v473_v63 }
  0x3e   : > { %v501_v15 = vrot.slane %v1128_v3, 2  ;;  %v392_v16 = vmax.f32 %v390_v56, %v391_v5  ;;  %v420_v42 = vrot.slane %v419_v8, 4  ;;  %v448_v43 = vsel %vm426_vm2, %v366_v34, -inf }
  0x3f   : > { %v388_v18 = vrot.slane %v387_v9, 1  ;;  %v417_v19 = vrot.slane %v416_v10, 1  ;;  %v446_v21 = vrot.slane %v1133_v39, 1  ;;  %v449_v22 = vrot.slane %v448_v43, 4 }
  0x40   : > { %v393_v1 = vrot.slane %v392_v16, 2  ;;  %v421_v28 = vmax.f32 %v419_v8, %v420_v42  ;;  %v477_v29 = vsel %vm455_vm3, %v366_v34, -inf  ;;  %v1141_v30 = vmax.f32 %v341_v20, %v343_v23 }
  0x41   : > { %v1143_v31 = vmax.f32 %v387_v9, %v388_v18  ;;  %v1145_v32 = vmax.f32 %v416_v10, %v417_v19  ;;  %v450_v6 = vmax.f32 %v448_v43, %v449_v22  ;;  %v478_v14 = vrot.slane %v477_v29, 4 }
  0x42   : > { %v394_v33 = vmax.f32 %v392_v16, %v393_v1  ;;  %v422_v13 = vrot.slane %v421_v28, 2  ;;  %v505_v35 = vsel %vm368_vm0, %v1141_v30, -inf  ;;  %v533_v37 = vsel %vm397_vm1, %v1141_v30, -inf }
  0x43   : > { %v451_v41 = vrot.slane %v450_v6, 2  ;;  %v479_v34 = vmax.f32 %v477_v29, %v478_v14  ;;  %v506_v20 = vrot.slane %v505_v35, 4  ;;  %v534_v23 = vrot.slane %v533_v37, 4 }
  0x44   : > { %v395_v44 = vrot.slane %v394_v33, 1  ;;  %v423_v46 = vmax.f32 %v421_v28, %v422_v13  ;;  %v1154_v48 = vsel %vm426_vm2, %v1141_v30, -inf  ;;  %v489_v51 = vrot.slane %v1104_v12, 1 }
  0x45   : > { %v1157_v56 = vmax.f32 %v450_v6, %v451_v41  ;;  %v480_v57 = vrot.slane %v479_v34, 2  ;;  %v1159_v58 = vmax.f32 %v505_v35, %v506_v20  ;;  %v1161_v59 = vmax.f32 %v533_v37, %v534_v23 }
  0x46   : > { %v1167_v63 = vmax.f32 %v394_v33, %v395_v44  ;;  %v424_v5 = vrot.slane %v423_v46, 1  ;;  %v562_v8 = vrot.slane %v1154_v48, 4  ;;  %v490_v9 = vmax.f32 %v1104_v12, %v489_v51 }
  0x47   : > { %v453_v10 = vrot.slane %v1157_v56, 1  ;;  %v1172_v16 = vmax.f32 %v479_v34, %v480_v57  ;;  %v508_v42 = vrot.slane %v1159_v58, 2  ;;  %v515_v43 = vrot.slane %v1033_v7, 2 }
  0x48   : > { %v1176_v18 = vmax.f32 %v423_v46, %v424_v5  ;;  %v542_v19 = vmax.f32 %v1027_v54, %v541_v62  ;;  %v568_v22 = vsel %vm455_vm3, %v1005_v40, -inf  ;;  %v597_v12 = vsel %vm596_vm4, %v1043_v26, %v1045_v27 }
  0x49   : > { %v516_v1 = vmax.f32 %v1033_v7, %v515_v43  ;;  %v569_v28 = vrot.slane %v568_v22, 4  ;;  %v601_v29 = vsel %vm368_vm0, %v597_v12, %v1088_v17  ;;  %v440_v6 = vmax.f32 %v1057_v47, %v439_v38 }
  0x4a   : > { %v543_v54 = vrot.slane %v542_v19, 2  ;;  %v606_v40 = vsel %vm605_vm5, %v601_v29, %v1108_v24  ;;  %v468_v62 = vrot.slane %v1071_v60, 1  ;;  %v495_v7 = vmax.f32 %v1059_v49, %v494_v61 }
  0x4b   : > { %v517_v26 = vrot.slane %v516_v1, 1  ;;  %v570_v27 = vmax.f32 %v568_v22, %v569_v28  ;;  %v611_v17 = vsel %vm610_vm6, %v606_v40, %v490_v9  ;;  %v522_v14 = vrot.slane %v1061_v50, 2 }
  0x4c   : > { %v544_v33 = vmax.f32 %v542_v19, %v543_v54  ;;  %v469_v47 = vmax.f32 %v1071_v60, %v468_v62  ;;  %v496_v38 = vrot.slane %v495_v7, 1  ;;  %v549_v24 = vmax.f32 %v1053_v45, %v548_v55 }
  0x4d   : > { %v518_v13 = vmax.f32 %v516_v1, %v517_v26  ;;  %v571_v35 = vrot.slane %v570_v27, 2  ;;  %v523_v37 = vmax.f32 %v1061_v50, %v522_v14  ;;  %v575_v49 = vsel %vm455_vm3, %v1041_v25, -inf }
  0x4e   : > { %v545_v61 = vrot.slane %v544_v33, 1  ;;  %v497_v41 = vmax.f32 %v495_v7, %v496_v38  ;;  %v550_v34 = vrot.slane %v549_v24, 2  ;;  %v576_v20 = vrot.slane %v575_v49, 4 }
  0x4f   : > { %v572_v23 = vmax.f32 %v570_v27, %v571_v35  ;;  %v616_v60 = vsel %vm615_vm7, %v611_v17, %v518_v13  ;;  %v524_v44 = vrot.slane %v523_v37, 1  ;;  %v598_v45 = vsel %vm596_vm4, %v1064_v52, %v1076_v2 }
  0x50   : > { %v546_v55 = vmax.f32 %v544_v33, %v545_v61  ;;  %v551_v46 = vmax.f32 %v549_v24, %v550_v34  ;;  %v577_v51 = vmax.f32 %v575_v49, %v576_v20  ;;  %v602_v50 = vsel %vm368_vm0, %v598_v45, %v440_v6 }
  0x51   : > { %v573_v57 = vrot.slane %v572_v23, 1  ;;  %v525_v25 = vmax.f32 %v523_v37, %v524_v44  ;;  %v607_v5 = vsel %vm605_vm5, %v602_v50, %v469_v47  ;;  %v447_v9 = vmax.f32 %v1133_v39, %v446_v21 }
  0x52   : > { %v621_v43 = vsel %vm620_vm8, %v616_v60, %v546_v55  ;;  %v552_v19 = vrot.slane %v551_v46, 1  ;;  %v578_v22 = vrot.slane %v577_v51, 2  ;;  %v612_v52 = vsel %vm610_vm6, %v607_v5, %v497_v41 }
  0x53   : > { %v574_v2 = vmax.f32 %v572_v23, %v573_v57  ;;  %v617_v12 = vsel %vm615_vm7, %v612_v52, %v525_v25  ;;  %v475_v1 = vrot.slane %v1135_v11, 1  ;;  %v502_v39 = vmax.f32 %v1128_v3, %v501_v15 }
  0x54   : > { %v553_v21 = vmax.f32 %v551_v46, %v552_v19  ;;  %v579_v28 = vmax.f32 %v577_v51, %v578_v22  ;;  %v529_v29 = vrot.slane %v1130_v4, 2  ;;  %v556_v6 = vmax.f32 %v1124_v36, %v555_v53 }
  0x55   : > { %v626_v54 = vsel %vm625_vm9, %v621_v43, %v574_v2  ;;  %v476_v40 = vmax.f32 %v1135_v11, %v475_v1  ;;  %v503_v62 = vrot.slane %v502_v39, 1  ;;  %v582_v7 = vsel %vm455_vm3, %v1099_v0, -inf }
  0x56   : > { %630 = vst [vmem:[%s1224_s23] sm:$0xff] %v626_v54  ;;  %v580_v26 = vrot.slane %v579_v28, 1  ;;  %v622_v3 = vsel %vm620_vm8, %v617_v12, %v553_v21  ;;  %v530_v15 = vmax.f32 %v1130_v4, %v529_v29  ;;  %v557_v27 = vrot.slane %v556_v6, 2 }
  0x57   : > { %v504_v17 = vmax.f32 %v502_v39, %v503_v62  ;;  %v583_v14 = vrot.slane %v582_v7, 4  ;;  %v599_v36 = vsel %vm596_vm4, %v1143_v31, %v1145_v32  ;;  %v454_v53 = vmax.f32 %v1157_v56, %v453_v10 }
  0x58   : > { %v581_v11 = vmax.f32 %v579_v28, %v580_v26  ;;  %v531_v0 = vrot.slane %v530_v15, 1  ;;  %v558_v33 = vmax.f32 %v556_v6, %v557_v27  ;;  %v603_v47 = vsel %vm368_vm0, %v599_v36, %v447_v9 }
  0x59   : > { %v584_v38 = vmax.f32 %v582_v7, %v583_v14  ;;  %v608_v4 = vsel %vm605_vm5, %v603_v47, %v476_v40  ;;  %v482_v24 = vrot.slane %v1172_v16, 1  ;;  %v509_v13 = vmax.f32 %v1159_v58, %v508_v42 }
  0x5a   : > { %v627_v31 = vsel %vm625_vm9, %v622_v3, %v581_v11  ;;  %v532_v32 = vmax.f32 %v530_v15, %v531_v0  ;;  %v559_v35 = vrot.slane %v558_v33, 1  ;;  %v613_v56 = vsel %vm610_vm6, %v608_v4, %v504_v17 }
  0x5b   : > { %631 = vst [vmem:[%s1224_s23 + $0x8] sm:$0xff] %v627_v31  ;;  %v585_v10 = vrot.slane %v584_v38, 2  ;;  %v483_v37 = vmax.f32 %v1172_v16, %v482_v24  ;;  %v510_v49 = vrot.slane %v509_v13, 1  ;;  %v536_v61 = vrot.slane %v1161_v59, 2 }
  0x5c   : > { %v560_v41 = vmax.f32 %v558_v33, %v559_v35  ;;  %v618_v34 = vsel %vm615_vm7, %v613_v56, %v532_v32  ;;  %v563_v58 = vmax.f32 %v1154_v48, %v562_v8  ;;  %v589_v42 = vsel %vm455_vm3, %v1141_v30, -inf }
  0x5d   : > { %v586_v20 = vmax.f32 %v584_v38, %v585_v10  ;;  %v511_v23 = vmax.f32 %v509_v13, %v510_v49  ;;  %v537_v60 = vmax.f32 %v1161_v59, %v536_v61  ;;  %v590_v44 = vrot.slane %v589_v42, 4 }
  0x5e   : > { %v564_v45 = vrot.slane %v563_v58, 2  ;;  %v600_v16 = vsel %vm596_vm4, %v1167_v63, %v1176_v18  ;;  %v623_v48 = vsel %vm620_vm8, %v618_v34, %v560_v41 }
  0x5f   : > { %v587_v55 = vrot.slane %v586_v20, 1  ;;  %v538_v46 = vrot.slane %v537_v60, 1  ;;  %v591_v51 = vmax.f32 %v589_v42, %v590_v44  ;;  %v604_v50 = vsel %vm368_vm0, %v600_v16, %v454_v53 }
  0x60   : > { %v565_v8 = vmax.f32 %v563_v58, %v564_v45  ;;  %v609_v30 = vsel %vm605_vm5, %v604_v50, %v483_v37 }
  0x61   : > { %v588_v57 = vmax.f32 %v586_v20, %v587_v55  ;;  %v539_v59 = vmax.f32 %v537_v60, %v538_v46  ;;  %v592_v25 = vrot.slane %v591_v51, 2  ;;  %v614_v5 = vsel %vm610_vm6, %v609_v30, %v511_v23 }
  0x62   : > { %v566_v9 = vrot.slane %v565_v8, 1 }
  0x63   : > { %v628_v63 = vsel %vm625_vm9, %v623_v48, %v588_v57  ;;  %v593_v18 = vmax.f32 %v591_v51, %v592_v25  ;;  %v619_v43 = vsel %vm615_vm7, %v614_v5, %v539_v59 }
  0x64   : > { %632 = vst [vmem:[%s1224_s23 + $0x10] sm:$0xff] %v628_v63  ;;  %v567_v19 = vmax.f32 %v565_v8, %v566_v9 }
  0x65   : > { %v594_v22 = vrot.slane %v593_v18, 1 }
  0x66   : > { %v624_v52 = vsel %vm620_vm8, %v619_v43, %v567_v19 }
  0x67   : > { %v595_v2 = vmax.f32 %v593_v18, %v594_v22 }
  0x69   : > { %v629_v12 = vsel %vm625_vm9, %v624_v52, %v595_v2 }
  0x6a   : > { %633 = vst [vmem:[%s1224_s23 + $0x18] sm:$0xff] %v629_v12 }
  0x6b PF: > { %s15_s19 = sadd.s32 1, %s881_s19   ;;  %s1300_s15 = smov %s873_s17 }
  0x6c   : > { %p12_p8 = scmp.ge.s32.totalorder %s15_s19, 6   ;;  %s1301_s16 = smov %s877_s18 }
  0x6d   : > { %s1302_s17 = smov %s1305_s20  ;;  %s1303_s18 = smov %s1309_s21 }
  0x6e   :  { %14 = sbr.rel (!%p12_p8) target bundleno = 3 (0x3), region = 74 }

// kernel: encoder_block_forward.3
= control target key start
LH: loop header
LB: loop body
LE: loop exit
PB: predicated region body
PF: predicated region fallthrough
CT: control target
= control target key end

     0   :  { %s2993_s18 = smov 0   ;;  %s2995_s19 = smov 0   ;;  %s3631_s0 = inlined_call_operand.vmem [shape: bf16[2,18,18,128], index: 0, kind: input, shape index: {}, may-alias: {0,1}]   ;;  %s3632_s1 = inlined_call_operand.vmem [shape: bf16[2,18,18,128], index: 1, kind: input, shape index: {}, may-alias: {0,1}]   ;;  %s3633_s2 = inlined_call_operand.vmem [shape: bf16[3,384,128], index: 2, kind: input, shape index: {}]   ;;  %s3634_s3 = inlined_call_operand.vmem [shape: f32[1,128], index: 3, kind: input, shape index: {}]   ;;  %s3635_s4 = inlined_call_operand.vmem [shape: f32[2,16,16,128], index: 4, kind: output, shape index: {0}]   ;;  %s3636_s5 = inlined_call_operand.vmem [shape: f32[2,2,8,128], index: 5, kind: output, shape index: {1}]  }
   0x1   :  { %s2997_s20 = smov 0   ;;  %s2999_s21 = smov 0  }
   0x2   :  { %s3001_s22 = smov 0  }
   0x3 LB: > { %s25_s23 = sadd.s32 1, %s2953_s20  ;;  %s28_s24 = sadd.s32 1, %s2957_s21  ;;  %s2961_s22 = sphi %s3001_s22, %s16_s22   ;;  %s2957_s21 = sphi %s2999_s21, %s3640_s21   ;;  %s2953_s20 = sphi %s2997_s20, %s3639_s20   ;;  %s2949_s19 = sphi %s2995_s19, %s3638_s19   ;;  %s2945_s18 = sphi %s2993_s18, %s3637_s18  }
   0x4   : > { %p26_p0 = scmp.ge.s32.totalorder %s25_s23, 2  ;;  %p2128_p1 = scmp.ge.s32.totalorder %s2961_s22, 1 }
   0x5   : > { %p250_p2 = scmp.lt.s32.totalorder %s2961_s22, 5 }
   0x6   : > { %s3642_s23 = smov (%p26_p0, %s25_s23), 0  ;;  %s3644_s24 = smov (!%p26_p0, %s28_s24), %s2957_s21 }
   0x7   : > { %p251_p3 = pnand %p2128_p1, %p250_p2  ;;  %p30_p4 = scmp.ge.s32.totalorder %s3644_s24, 2 }
   0x8   : > { %v2831_v0 = vld [vmem:[%s3633_s2 + $0x40] sm:$0xff] (!%p251_p3)   ;;  %s3031_s27 = sshll.u32 (!%p251_p3), %s2945_s18, 3  ;;  %p319_p5 = scmp.lt.s32.totalorder (!%p251_p3), %s2949_s19, 1  ;;  %v2834_v3 = vld [vmem:[%s3633_s2 + $0x48] sm:$0xff] (!%p251_p3)   ;;  %v2837_v6 = vld [vmem:[%s3633_s2 + $0x50] sm:$0xff] (!%p251_p3)   ;;  %vm620_vm0 = vcmask (!%p251_p3), 1046528  }
   0x9   : > { %s3646_s24 = smov (%p30_p4, %s3644_s24), 0  ;;  %254 = sbr.rel (%p251_p3) target bundleno = 436 (0x1b4), region = 36 }
   0xa   : > { %v2832_v1 = vld [vmem:[%s3633_s2 + $0x80] sm:$0xff] (!%p251_p3)   ;;  %2340 = vmatprep.subr.bf16.mxu0 (!%p251_p3), %v2831_v0  ;;  %p321_p6 = scmp.lt.s32.totalorder (!%p251_p3), %s3031_s27, 17  ;;  %v2835_v4 = vld [vmem:[%s3633_s2 + $0x88] sm:$0xff] (!%p251_p3)   ;;  %v2838_v7 = vld [vmem:[%s3633_s2 + $0x90] sm:$0xff] (!%p251_p3)   ;;  %s2339_s28 = sadd.s32 (!%p251_p3), 8, %s3031_s27  ;;  %vm1950_vm2 = vcmask (!%p251_p3), 1040384  }
   0xb   : > { %v2833_v2 = vld [vmem:[%s3633_s2] sm:$0xff] (!%p251_p3)   ;;  %2580 = vmatprep.subr.bf16.mxu1 (!%p251_p3), %v2832_v1  ;;  %v2836_v5 = vld [vmem:[%s3633_s2 + $0x8] sm:$0xff] (!%p251_p3)   ;;  %v2839_v8 = vld [vmem:[%s3633_s2 + $0x10] sm:$0xff] (!%p251_p3)   ;;  %p339_p7 = scmp.lt.s32.totalorder (!%p251_p3), %s2339_s28, 17  ;;  %vm489_vm1 = vsmask.f32 (!%p251_p3), 7424 }
   0xc   : > { %2341 = vmatpush3.bf16.msra.mxu0 (!%p251_p3), %v2833_v2  ;;  %2581 = vmatpush3.bf16.msra.mxu1 (!%p251_p3), %v2832_v1  ;;  %v2840_v9 = vld [vmem:[%s3633_s2 + $0x58] sm:$0xff] (!%p251_p3)   ;;  %v2843_v12 = vld [vmem:[%s3633_s2 + $0x60] sm:$0xff] (!%p251_p3)   ;;  %v2846_v15 = vld [vmem:[%s3633_s2 + $0x68] sm:$0xff] (!%p251_p3)   ;;  %p352_p8 = scmp.lt.s32.totalorder (!%p251_p3), %s3031_s27, 15  ;;  %p362_p9 = scmp.lt.s32.totalorder (!%p251_p3), %s2945_s18, 1  ;;  %vm1952_vm3 = vcmask (!%p251_p3), 1041408  }
   0xd   : > { %2342 = vmatprep.subr.bf16.mxu0 (!%p251_p3), %v2834_v3  ;;  %2582 = vmatprep.subr.bf16.mxu1 (!%p251_p3), %v2835_v4  ;;  %v2841_v10 = vld [vmem:[%s3633_s2 + $0x98] sm:$0xff] (!%p251_p3)   ;;  %v2844_v13 = vld [vmem:[%s3633_s2 + $0xa0] sm:$0xff] (!%p251_p3)   ;;  %v2847_v16 = vld [vmem:[%s3633_s2 + $0xa8] sm:$0xff] (!%p251_p3)  }
   0xe   : > { %v2842_v11 = vld [vmem:[%s3633_s2 + $0x18] sm:$0xff] (!%p251_p3)   ;;  %v2845_v14 = vld [vmem:[%s3633_s2 + $0x20] sm:$0xff] (!%p251_p3)   ;;  %v2848_v17 = vld [vmem:[%s3633_s2 + $0x28] sm:$0xff] (!%p251_p3)  }
   0xf   : > { %v2849_v18 = vld [vmem:[%s3633_s2 + $0x70] sm:$0xff] (!%p251_p3)   ;;  %v2852_v21 = vld [vmem:[%s3633_s2 + $0x78] sm:$0xff] (!%p251_p3)   ;;  %v2859_v31 = vld [vmem:[%s3633_s2 + $0x100] sm:$0xff] (!%p251_p3)  }
  0x10   : > { %s3648_s19 = smov (!%p319_p5, %s2949_s19), 1  ;;  %2343 = vmatpush3.bf16.msra.mxu0 %v2836_v5  ;;  %2583 = vmatpush3.bf16.msra.mxu1 %v2835_v4  ;;  %v2850_v19 = vld [vmem:[%s3633_s2 + $0xb0] sm:$0xff]   ;;  %v2853_v22 = vld [vmem:[%s3633_s2 + $0xb8] sm:$0xff]   ;;  %s3650_s28 = smov (!%p339_p7, %s2339_s28), 17  ;;  %v2860_v37 = vld [vmem:[%s3633_s2 + $0x1c0] sm:$0xff]  }
  0x11   : > { %s322_s17 = scalar_select %p321_p6, %s3031_s27, 17  ;;  %2344 = vmatprep.subr.bf16.mxu0 %v2837_v6  ;;  %2584 = vmatprep.subr.bf16.mxu1 %v2838_v7  ;;  %v2851_v20 = vld [vmem:[%s3633_s2 + $0x30] sm:$0xff]   ;;  %v2854_v25 = vld [vmem:[%s3633_s2 + $0x38] sm:$0xff]   ;;  %v2861_v40 = vld [vmem:[%s3633_s2 + $0xc0] sm:$0xff]  }
  0x12   : > { %s2789_s7 = smul.u32 54, %s3648_s19  ;;  %v2862_v43 = vld [vmem:[%s3633_s2 + $0x180] sm:$0xff]   ;;  %v2863_v46 = vld [vmem:[%s3633_s2 + $0x108] sm:$0xff]   ;;  %v2869_v61 = vld [vmem:[%s3633_s2 + $0x110] sm:$0xff]   ;;  %s3652_s27 = smov (!%p352_p8, %s3031_s27), 15 }
  0x13   : > { %s2788_s10 = smul.u32 3, %s322_s17  ;;  %v2864_v48 = vld [vmem:[%s3633_s2 + $0xc8] sm:$0xff]   ;;  %v2871_v1 = vld [vmem:[%s3633_s2 + $0xd0] sm:$0xff]   ;;  %v2873_v6 = vld [vmem:[%s3633_s2 + $0x118] sm:$0xff]   ;;  %s2135_s8 = sshll.u32 %s3652_s27, 1 }
  0x14   : > { %2345 = vmatpush3.bf16.msra.mxu0 %v2839_v8  ;;  %2585 = vmatpush3.bf16.msra.mxu1 %v2838_v7  ;;  %v2870_v0 = vld [vmem:[%s3633_s2 + $0x1c8] sm:$0xff]   ;;  %v2874_v8 = vld [vmem:[%s3633_s2 + $0xd8] sm:$0xff]   ;;  %s2790_s12 = smul.u32 3, %s3650_s28  ;;  %s3654_s18 = smov (!%p362_p9, %s2945_s18), 1 }
  0x15   : > { %2346 = vmatprep.subr.bf16.mxu0 %v2840_v9  ;;  %2586 = vmatprep.subr.bf16.mxu1 %v2841_v10  ;;  %s325_s25 = sadd.s32 %s2789_s7, %s2788_s10  ;;  %v2872_v4 = vld [vmem:[%s3633_s2 + $0x188] sm:$0xff]   ;;  %s2138_s27 = sshll.u32 %s3648_s19, 1 }
  0x16   : > { %s2130_s6 = sshll.u32 %s325_s25, 2  ;;  %s343_s30 = sadd.s32 %s2790_s12, %s2789_s7 }
  0x17   : > { %s3106_s17 = scalar_lea.vmem %s3631_s0, %s2130_s6  ;;  %s2133_s10 = sshll.u32 %s343_s30, 2 }
  0x18   : > { %2347 = vmatpush3.bf16.msra.mxu0 %v2842_v11  ;;  %2587 = vmatpush3.bf16.msra.mxu1 %v2841_v10  ;;  %v2855_v23 = vld [vmem:[%s3106_s17] sm:$0xff]   ;;  %v2856_v24 = vld [vmem:[%s3106_s17 + $0x8] ss:$0 sps:$4 sm:$0x11]   ;;  %v3122_v30 = vld [vmem:[%s3106_s17 + $0xc] sm:$0xff]   ;;  %s3366_s14 = scalar_lea.vmem %s3632_s1, %s2133_s10  ;;  %s365_s12 = sadd.s32 %s2138_s27, %s3654_s18 }
  0x19   : > { %2348 = vmatprep.subr.bf16.mxu0 %v2843_v12  ;;  %2588 = vmatprep.subr.bf16.mxu1 %v2844_v13  ;;  %v491_v26 = vshrl.u32 %v2855_v23, 16  ;;  %v493_v27 = vshll.u32 %v2855_v23, 16  ;;  %v498_v28 = vshll.u32 %v2856_v24, 16  ;;  %v621_v29 = vrot.slane %v2855_v23, 1  ;;  %v3153_v51 = vld [vmem:[%s3106_s17 + $0x18] sm:$0xff]   ;;  %v3158_v56 = vld [vmem:[%s3106_s17 + $0x24] sm:$0xff]  }
  0x1a   : > { %v622_v32 = vrot.slane %v2856_v24, 1  ;;  %v2858_v33 = vld [vmem:[%s3106_s17 + $0x14] ss:$0 sps:$4 sm:$0x11]   ;;  %v624_v36 = vrot.slane %v3122_v30, 1  ;;  %v503_v44 = vshrl.u32 %v3122_v30, 16 }
  0x1b   : > { %v495_v34 = vrot.slane %v493_v27, 1  ;;  %v500_v35 = vrot.slane %v498_v28, 1  ;;  %v625_v39 = vrot.slane %v2858_v33, 1  ;;  %v505_v47 = vshll.u32 %v3122_v30, 16  ;;  %v3196_v11 = vld [vmem:[%s3106_s17 + $0x30] sm:$0xff]   ;;  %v2881_v24 = vld [vmem:[%s3633_s2 + $0xe0] sm:$0xff]  }
  0x1c   : > { %2349 = vmatpush3.bf16.msra.mxu0 %v2845_v14  ;;  %2589 = vmatpush3.bf16.msra.mxu1 %v2844_v13  ;;  %v623_v38 = vsel %vm620_vm0, %v621_v29, %v622_v32  ;;  %v510_v49 = vshll.u32 %v2858_v33, 16  ;;  %v2866_v53 = vld [vmem:[%s3106_s17 + $0x20] ss:$0 sps:$4 sm:$0x11]   ;;  %v627_v55 = vrot.slane %v3153_v51, 1  ;;  %v630_v60 = vrot.slane %v3158_v56, 1 }
  0x1d   : > { %2350 = vmatprep.subr.bf16.mxu0 %v2846_v15  ;;  %2590 = vmatprep.subr.bf16.mxu1 %v2847_v16  ;;  %v496_v41 = vor.u32 %v495_v34, %v491_v26  ;;  %v3137_v42 = vsel %vm620_vm0, %v624_v36, %v625_v39  ;;  %v507_v50 = vrot.slane %v505_v47, 1  ;;  %v628_v57 = vrot.slane %v2866_v53, 1  ;;  %v2868_v58 = vld [vmem:[%s3106_s17 + $0x2c] ss:$0 sps:$4 sm:$0x11]   ;;  %v3202_v14 = vld [vmem:[%s3106_s17 + $0x3c] sm:$0xff]  }
  0x1e   : > { %2596 = vmatprep.mubr.bf16.mxu1 %v623_v38  ;;  %v512_v52 = vrot.slane %v510_v49, 1  ;;  %v631_v63 = vrot.slane %v2868_v58, 1  ;;  %v515_v2 = vshrl.u32 %v3153_v51, 16  ;;  %v517_v5 = vshll.u32 %v3153_v51, 16  ;;  %v2882_v26 = vld [vmem:[%s3633_s2 + $0x190] sm:$0xff]   ;;  %v2883_v28 = vld [vmem:[%s3633_s2 + $0x128] sm:$0xff]  }
  0x1f   : > { %v501_v45 = vsel %vm489_vm1, %v496_v41, %v500_v35  ;;  %v508_v54 = vor.u32 %v507_v50, %v503_v44  ;;  %v3170_v62 = vsel %vm620_vm0, %v627_v55, %v628_v57  ;;  %v522_v7 = vshll.u32 %v2866_v53, 16  ;;  %v3199_v13 = vld [vmem:[%s3106_s17 + $0x38] ss:$0 sps:$4 sm:$0x11]   ;;  %v3245_v34 = vld [vmem:[%s3106_s17 + $0x48] sm:$0xff]   ;;  %v2891_v49 = vld [vmem:[%s3633_s2 + $0xf0] sm:$0xff]  }
  0x20   : > { %2351 = vmatpush3.bf16.msra.mxu0 %v2848_v17  ;;  %2591 = vmatpush3.bf16.msra.mxu1 %v2847_v16  ;;  %v3181_v3 = vsel %vm620_vm0, %v630_v60, %v631_v63  ;;  %v519_v9 = vrot.slane %v517_v5, 1  ;;  %v633_v15 = vrot.slane %v3196_v11, 1  ;;  %v2879_v16 = vld [vmem:[%s3633_s2 + $0x120] sm:$0xff]   ;;  %v527_v27 = vshrl.u32 %v3158_v56, 16  ;;  %v3250_v39 = vld [vmem:[%s3106_s17 + $0x54] sm:$0xff]   ;;  %s2139_s13 = sshll.u32 %s365_s12, 3 }
  0x21   : > { %2352 = vmatprep.subr.bf16.mxu0 %v2849_v18  ;;  %2592 = vmatprep.subr.bf16.mxu1 %v2850_v19  ;;  %v3162_v59 = vsel %vm489_vm1, %v508_v54, %v512_v52  ;;  %v524_v10 = vrot.slane %v522_v7, 1  ;;  %v634_v18 = vrot.slane %v3199_v13, 1  ;;  %v529_v29 = vshll.u32 %v3158_v56, 16  ;;  %v2886_v36 = vld [vmem:[%s3106_s17 + $0x50] ss:$0 sps:$4 sm:$0x11]   ;;  %s367_s28 = scalar_lea.vmem %s3636_s5, %s2139_s13 }
  0x22   : > { %892 = vmatprep.mubr.bf16.mxu0 %v501_v45  ;;  %v520_v12 = vor.u32 %v519_v9, %v515_v2  ;;  %v534_v32 = vshll.u32 %v2868_v58, 16  ;;  %v639_v38 = vrot.slane %v3245_v34, 1  ;;  %v3253_v41 = vld [vmem:[%s3106_s17 + $0x5c] ss:$0 sps:$4 sm:$0x11]   ;;  %v642_v44 = vrot.slane %v3250_v39, 1 }
  0x23   : > { %v531_v33 = vrot.slane %v529_v29, 1  ;;  %v2889_v45 = vld [vmem:[%s3633_s2 + $0x130] sm:$0xff]   ;;  %v643_v47 = vrot.slane %v3253_v41, 1  ;;  %v539_v50 = vshrl.u32 %v3196_v11, 16  ;;  %v2892_v53 = vld [vmem:[%s3633_s2 + $0x198] sm:$0xff]   ;;  %v541_v54 = vshll.u32 %v3196_v11, 16 }
  0x24   : > { %2353 = vmatpush3.bf16.msra.mxu0 %v2851_v20  ;;  %2593 = vmatpush3.bf16.msra.mxu1 %v2850_v19  ;;  %v3209_v17 = vsel %vm489_vm1, %v520_v12, %v524_v10  ;;  %v3213_v19 = vld [vmem:[%s3106_s17 + $0x44] ss:$0 sps:$4 sm:$0x11]   ;;  %v636_v20 = vrot.slane %v3202_v14, 1  ;;  %v536_v35 = vrot.slane %v534_v32, 1  ;;  %v2893_v55 = vld [vmem:[%s3633_s2 + $0x138] sm:$0xff]  }
  0x25   : > { %2354 = vmatprep.subr.bf16.mxu0 %v2852_v21  ;;  %2594 = vmatprep.subr.bf16.mxu1 %v2853_v22  ;;  %v2880_v21 = vld [vmem:[%s3633_s2 + $0x1d0] sm:$0xff]   ;;  %v3277_v52 = vsel %vm620_vm0, %v642_v44, %v643_v47  ;;  %v546_v57 = vshll.u32 %v3199_v13, 16  ;;  %v2894_v58 = vld [vmem:[%s3633_s2 + $0xf8] sm:$0xff]   ;;  %v543_v60 = vrot.slane %v541_v54, 1  ;;  %v2895_v63 = vld [vmem:[%s3633_s2 + $0x1e0] sm:$0xff]   ;;  %v551_v2 = vshrl.u32 %v3202_v14, 16 }
  0x26   : > { %v558_v5 = vshll.u32 %v3213_v19, 16  ;;  %v2898_v10 = vld [vmem:[%s3633_s2 + $0x1a8] sm:$0xff]   ;;  %v565_v12 = vshll.u32 %v3245_v34, 16  ;;  %v570_v13 = vshll.u32 %v2886_v36, 16  ;;  %v582_v29 = vshll.u32 %v3253_v41, 16  ;;  %v2909_v44 = vld [vmem:[%s3633_s2 + $0x160] sm:$0xff]  }
  0x27   : > { %v2914_v47 = vld [vmem:[%s3633_s2 + $0x170] sm:$0xff]   ;;  %s2136_s17 = sshll.u32 %s3648_s19, 5 }
  0x28   : > { %2355 = vmatpush3.bf16.msra.mxu0 %v2854_v25  ;;  %2595 = vmatpush3.bf16.msra.mxu1 %v2853_v22  ;;  %v3221_v22 = vsel %vm620_vm0, %v633_v15, %v634_v18  ;;  %v560_v9 = vrot.slane %v558_v5, 1  ;;  %v2899_v15 = vld [vmem:[%s3633_s2 + $0x140] sm:$0xff]   ;;  %v567_v18 = vrot.slane %v565_v12, 1  ;;  %s356_s6 = sadd.s32 %s2136_s17, %s2135_s8 }
  0x29   : > { %2420 = vmatprep.subr.bf16.mxu1 %v2859_v31  ;;  %2500 = vmatprep.subr.bf16.mxu0 %v2860_v37  ;;  %v2884_v31 = vld [vmem:[%s3633_s2 + $0xe8] sm:$0xff]   ;;  %v532_v37 = vor.u32 %v531_v33, %v527_v27  ;;  %v575_v27 = vshrl.u32 %v3250_v39, 16  ;;  %s2137_s9 = sshll.u32 %s356_s6, 3 }
  0x2a   : > { %s3575_s11 = scalar_lea.vmem %s3635_s4, %s2137_s9 }
  0x2b   : > { %893 = vmatmul.mubr.bf16.vlgmr.msra.gmra.mrb[0].mxu0 %v2855_v23  ;;  %2597 = vmatmul.mubr.bf16.vlgmr.msra.gmra.mrb[0].mxu1 %v3137_v42  ;;  %v637_v23 = vrot.slane %v3213_v19, 1  ;;  %v2900_v19 = vld [vmem:[%s3633_s2 + $0x1f0] sm:$0xff]  }
  0x2c   : > { %2421 = vmatpush3.bf16.msra.mxu1 %v2861_v40  ;;  %2501 = vmatpush3.bf16.msra.mxu0 %v2862_v43  ;;  %v640_v40 = vrot.slane %v2886_v36, 1  ;;  %v3256_v43 = vsel %vm489_vm1, %v532_v37, %v536_v35  ;;  %v2905_v35 = vld [vmem:[%s3633_s2 + $0x150] sm:$0xff]   ;;  %v3353_v36 = vld [vmem:[%s3633_s2 + $0x200] sm:$0xff]   ;;  %v2907_v37 = vld [vmem:[%s3633_s2 + $0x158] sm:$0xff]  }
  0x2d   : > { %2422 = vmatprep.subr.bf16.mxu1 %v2863_v46  ;;  %900 = vmatprep.mubr.bf16.mxu0 %v3162_v59  ;;  %v3230_v25 = vsel %vm620_vm0, %v636_v20, %v637_v23  ;;  %v572_v20 = vrot.slane %v570_v13, 1 }
  0x2e   : > { %2600 = vmatprep.mubr.bf16.mxu1 %v3170_v62  ;;  %2502 = vmatprep.subr.bf16.mxu0 %v2870_v0  ;;  %v3264_v46 = vsel %vm620_vm0, %v639_v38, %v640_v40  ;;  %v544_v0 = vor.u32 %v543_v60, %v539_v50  ;;  %v584_v40 = vrot.slane %v582_v29, 1  ;;  %v3395_v50 = vld [vmem:[%s3366_s14] sm:$0xff]  }
  0x2f   : > { %v589_v54 = vshll.u32 %v3395_v50, 16 }
  0x30   : > { %2423 = vmatpush3.bf16.msra.mxu1 %v2864_v48  ;;  %2503 = vmatpush3.bf16.msra.mxu0 %v2872_v4  ;;  %v2890_v48 = vld [vmem:[%s3633_s2 + $0x1d8] sm:$0xff]   ;;  %v553_v4 = vshll.u32 %v3202_v14, 16 }
  0x31   : > { %2424 = vmatprep.subr.bf16.mxu1 %v2869_v61  ;;  %2504 = vmatprep.subr.bf16.mxu0 %v2880_v21  ;;  %v548_v61 = vrot.slane %v546_v57, 1 }
  0x33   : > { %901 = vmatmul.mubr.bf16.gmra.mrb[4].mxu0 %v3122_v30  ;;  %2601 = vmatmul.mubr.bf16.gmra.mrb[4].mxu1 %v3181_v3  ;;  %v3306_v7 = vsel %vm489_vm1, %v544_v0, %v548_v61  ;;  %v2917_v61 = vld [vmem:[%s3633_s2 + $0x220] sm:$0xff]   ;;  %v2919_v0 = vld [vmem:[%s3633_s2 + $0x230] sm:$0xff]  }
  0x34   : > { %2425 = vmatpush3.bf16.msra.mxu1 %v2871_v1  ;;  %908 = vmatprep.mubr.bf16.mxu0 %v3209_v17  ;;  %v2896_v1 = vld [vmem:[%s3633_s2 + $0x1a0] sm:$0xff]  }
  0x35   : > { %2426 = vmatprep.subr.bf16.mxu1 %v2873_v6  ;;  %2604 = vmatprep.mubr.bf16.mxu1 %v3221_v22  ;;  %v563_v6 = vshrl.u32 %v3245_v34, 16 }
  0x36   : > { %2505 = vmatpush3.bf16.msra.mxu0 %v2882_v26  ;;  %v577_v26 = vshll.u32 %v3250_v39, 16 }
  0x37   : > { %2506 = vmatprep.subr.bf16.mxu0 %v2890_v48  ;;  %v568_v23 = vor.u32 %v567_v18, %v563_v6  ;;  %v2916_v48 = vld [vmem:[%s3633_s2 + $0x178] sm:$0xff]  }
  0x38   : > { %2427 = vmatpush3.bf16.msra.mxu1 %v2874_v8  ;;  %v555_v8 = vrot.slane %v553_v4, 1  ;;  %v579_v33 = vrot.slane %v577_v26, 1 }
  0x39   : > { %2428 = vmatprep.subr.bf16.mxu1 %v2879_v16  ;;  %v3345_v32 = vsel %vm489_vm1, %v568_v23, %v572_v20 }
  0x3a   : > { %2507 = vmatpush3.bf16.msra.mxu0 %v2892_v53  ;;  %v556_v16 = vor.u32 %v555_v8, %v551_v2  ;;  %v580_v38 = vor.u32 %v579_v33, %v575_v27  ;;  %v3406_v53 = vld [vmem:[%s3366_s14 + $0x8] ss:$0 sps:$4 sm:$0x11]  }
  0x3b   : > { %909 = vmatmul.mubr.bf16.gmra.mrb[8].mxu0 %v3153_v51  ;;  %2605 = vmatmul.mubr.bf16.gmra.mrb[8].mxu1 %v3230_v25  ;;  %v594_v57 = vshll.u32 %v3406_v53, 16 }
  0x3c   : > { %2429 = vmatpush3.bf16.msra.mxu1 %v2881_v24  ;;  %916 = vmatprep.mubr.bf16.mxu0 %v3256_v43  ;;  %v3323_v21 = vsel %vm489_vm1, %v556_v16, %v560_v9  ;;  %v2901_v24 = vld [vmem:[%s3633_s2 + $0x1b0] sm:$0xff]   ;;  %v3369_v41 = vsel %vm489_vm1, %v580_v38, %v584_v40 }
  0x3d   : > { %2430 = vmatprep.subr.bf16.mxu1 %v2883_v28  ;;  %2608 = vmatprep.mubr.bf16.mxu1 %v3264_v46  ;;  %v2903_v28 = vld [vmem:[%s3633_s2 + $0x1f8] sm:$0xff]   ;;  %v596_v60 = vrot.slane %v594_v57, 1 }
  0x3e   : > { %2508 = vmatprep.subr.bf16.mxu0 %v2895_v63 }
  0x3f   : > { %2509 = vmatpush3.bf16.msra.mxu0 %v2896_v1  ;;  %v2922_v1 = vld [vmem:[%s3633_s2 + $0x238] sm:$0xff]  }
  0x40   : > { %2431 = vmatpush3.bf16.msra.mxu1 %v2884_v31  ;;  %v2904_v31 = vld [vmem:[%s3633_s2 + $0x1b8] sm:$0xff]  }
  0x41   : > { %2432 = vmatprep.subr.bf16.mxu1 %v2889_v45  ;;  %v2911_v45 = vld [vmem:[%s3633_s2 + $0x168] sm:$0xff]  }
  0x43   : > { %917 = vmatmul.mubr.bf16.gmra.mrb[12].mxu0 %v3158_v56  ;;  %2609 = vmatmul.mubr.bf16.gmra.mrb[12].mxu1 %v3277_v52 }
  0x44   : > { %2433 = vmatpush3.bf16.msra.mxu1 %v2891_v49  ;;  %1295 = vmatprep.mubr.bf16.mxu1 %v3162_v59  ;;  %v2897_v59 = vld [vmem:[%s3633_s2 + $0x1e8] sm:$0xff]  }
  0x45   : > { %2434 = vmatprep.subr.bf16.mxu1 %v2893_v55  ;;  %924 = vmatprep.mubr.bf16.mxu0 %v3306_v7  ;;  %v2908_v49 = vld [vmem:[%s3633_s2 + $0x208] sm:$0xff]   ;;  %v591_v55 = vrot.slane %v589_v54, 1 }
  0x46   : > { %2510 = vmatprep.subr.bf16.mxu0 %v2897_v59 }
  0x47   : > { %2511 = vmatpush3.bf16.msra.mxu0 %v2898_v10 }
  0x48   : > { %2435 = vmatpush3.bf16.msra.mxu1 %v2894_v58  ;;  %2512 = vmatprep.subr.bf16.mxu0 %v2900_v19 }
  0x49   : > { %2612 = vmatprep.subr.bf16.mxu1 %v2899_v15 }
  0x4b   : > { %925 = vmatmul.mubr.bf16.gmra.mrb[16].mxu0 %v3196_v11  ;;  %1296 = vmatmul.mubr.bf16.vlgmr.msra.gmra.mrb[16].mxu1 %v3122_v30  ;;  %v2902_v30 = vld [vmem:[%s3633_s2 + $0x148] sm:$0xff]  }
  0x4c   : > { %1303 = vmatprep.mubr.bf16.mxu1 %v3209_v17  ;;  %932 = vmatprep.mubr.bf16.mxu0 %v3323_v21 }
  0x4d   : > { %2613 = vmatpush3.bf16.msra.mxu1 %v2899_v15  ;;  %2513 = vmatpush3.bf16.msra.mxu0 %v2901_v24 }
  0x4e   : > { %2614 = vmatprep.subr.bf16.mxu1 %v2902_v30  ;;  %2514 = vmatprep.subr.bf16.mxu0 %v2903_v28 }
  0x51   : > { %2615 = vmatpush3.bf16.msra.mxu1 %v2902_v30  ;;  %2515 = vmatpush3.bf16.msra.mxu0 %v2904_v31 }
  0x52   : > { %2616 = vmatprep.subr.bf16.mxu1 %v2905_v35  ;;  %2644 = vmatprep.subr.bf16.mxu0 %v3353_v36 }
  0x53   : > { %933 = vmatmul.mubr.bf16.gmra.mrb[20].mxu0 %v3202_v14  ;;  %1304 = vmatmul.mubr.bf16.gmra.mrb[20].mxu1 %v3153_v51 }
  0x54   : > { %940 = vmatprep.mubr.bf16.mxu0 %v3345_v32  ;;  %1311 = vmatprep.mubr.bf16.mxu1 %v3256_v43 }
  0x55   : > { %2617 = vmatpush3.bf16.msra.mxu1 %v2905_v35 }
  0x56   : > { %2618 = vmatprep.subr.bf16.mxu1 %v2907_v37 }
  0x59   : > { %2619 = vmatpush3.bf16.msra.mxu1 %v2907_v37 }
  0x5a   : > { %2620 = vmatprep.subr.bf16.mxu1 %v2909_v44 }
  0x5b   : > { %941 = vmatmul.mubr.bf16.gmra.mrb[24].mxu0 %v3245_v34  ;;  %1312 = vmatmul.mubr.bf16.gmra.mrb[24].mxu1 %v3158_v56 }
  0x5c   : > { %948 = vmatprep.mubr.bf16.mxu0 %v3369_v41  ;;  %1319 = vmatprep.mubr.bf16.mxu1 %v3306_v7 }
  0x5d   : > { %2621 = vmatpush3.bf16.msra.mxu1 %v2909_v44 }
  0x5e   : > { %2622 = vmatprep.subr.bf16.mxu1 %v2911_v45 }
  0x61   : > { %2623 = vmatpush3.bf16.msra.mxu1 %v2911_v45 }
  0x62   : > { %2624 = vmatprep.subr.bf16.mxu1 %v2914_v47 }
  0x63   : > { %949 = vmatmul.mubr.bf16.gmra.mrb[28].mxu0 %v3250_v39  ;;  %1320 = vmatmul.mubr.bf16.gmra.mrb[28].mxu1 %v3196_v11 }
  0x64   : > { %1698 = vmatprep.mubr.bf16.mxu0 %v3209_v17  ;;  %1327 = vmatprep.mubr.bf16.mxu1 %v3323_v21  ;;  %v2910_v17 = vld [vmem:[%s3633_s2 + $0x210] sm:$0xff]  }
  0x65   : > { %2625 = vmatpush3.bf16.msra.mxu1 %v2914_v47 }
  0x66   : > { %2626 = vmatprep.subr.bf16.mxu1 %v2916_v48 }
  0x69   : > { %2627 = vmatpush3.bf16.msra.mxu1 %v2916_v48 }
  0x6a   : > { %2676 = vmatprep.subr.bf16.mxu1 %v3353_v36 }
  0x6b   : > { %1699 = vmatmul.mubr.bf16.vlgmr.msra.gmra.mrb[32].mxu0 %v3153_v51  ;;  %1328 = vmatmul.mubr.bf16.gmra.mrb[32].mxu1 %v3202_v14  ;;  %v587_v51 = vshrl.u32 %v3395_v50, 16 }
  0x6c   : > { %2645 = vmatpush3.bf16.msra.mxu0 %v3353_v36  ;;  %1335 = vmatprep.mubr.bf16.mxu1 %v3345_v32 }
  0x6d   : > { %1706 = vmatprep.mubr.bf16.mxu0 %v3256_v43  ;;  %2646 = vmatprep.subr.bf16.mxu0 %v2908_v49  ;;  %v2915_v43 = vld [vmem:[%s3633_s2 + $0x218] sm:$0xff]   ;;  %v592_v58 = vor.u32 %v591_v55, %v587_v51 }
  0x6f   : > { %v597_v63 = vsel %vm489_vm1, %v592_v58, %v596_v60 }
  0x70   : > { %2647 = vmatpush3.bf16.msra.mxu0 %v2908_v49 }
  0x71   : > { %2648 = vmatprep.subr.bf16.mxu0 %v2910_v17 }
  0x73   : > { %1707 = vmatmul.mubr.bf16.gmra.mrb[36].mxu0 %v3158_v56  ;;  %1336 = vmatmul.mubr.bf16.gmra.mrb[36].mxu1 %v3245_v34  ;;  %v2918_v56 = vld [vmem:[%s3633_s2 + $0x228] sm:$0xff]  }
  0x74   : > { %1714 = vmatprep.mubr.bf16.mxu0 %v3306_v7  ;;  %1343 = vmatprep.mubr.bf16.mxu1 %v3369_v41  ;;  %v646_v7 = vrot.slane %v3406_v53, 1 }
  0x75   : > { %2649 = vmatpush3.bf16.msra.mxu0 %v2910_v17 }
  0x76   : > { %2650 = vmatprep.subr.bf16.mxu0 %v2915_v43 }
  0x79   : > { %2651 = vmatpush3.bf16.msra.mxu0 %v2915_v43 }
  0x7a   : > { %2652 = vmatprep.subr.bf16.mxu0 %v2917_v61 }
  0x7b   : > { %1715 = vmatmul.mubr.bf16.gmra.mrb[40].mxu0 %v3196_v11  ;;  %1344 = vmatmul.mubr.bf16.gmra.mrb[40].mxu1 %v3250_v39  ;;  %v2920_v11 = vld [vmem:[%s3366_s14 + $0xc] sm:$0xff]  }
  0x7c   : > { %1722 = vmatprep.mubr.bf16.mxu0 %v3323_v21  ;;  %1351 = vmatprep.mubr.bf16.mxu1 %v597_v63  ;;  %v601_v2 = vshll.u32 %v2920_v11, 16  ;;  %v599_v4 = vshrl.u32 %v2920_v11, 16  ;;  %v648_v9 = vrot.slane %v2920_v11, 1 }
  0x7d   : > { %2653 = vmatpush3.bf16.msra.mxu0 %v2917_v61 }
  0x7e   : > { %2654 = vmatprep.subr.bf16.mxu0 %v2918_v56 }
  0x81   : > { %2655 = vmatpush3.bf16.msra.mxu0 %v2918_v56 }
  0x82   : > { %2656 = vmatprep.subr.bf16.mxu0 %v2919_v0 }
  0x83   : > { %1723 = vmatmul.mubr.bf16.gmra.mrb[44].mxu0 %v3202_v14  ;;  %1352 = vmatmul.mubr.bf16.gmra.mrb[44].mxu1 %v3395_v50  ;;  %v2921_v14 = vld [vmem:[%s3366_s14 + $0x14] ss:$0 sps:$4 sm:$0x11]  }
  0x84   : > { %1730 = vmatprep.mubr.bf16.mxu0 %v3345_v32  ;;  %2628 = vmatprep.mubr.bf16.mxu1 %v3137_v42  ;;  %v603_v42 = vrot.slane %v601_v2, 1  ;;  %v606_v5 = vshll.u32 %v2921_v14, 16  ;;  %v649_v10 = vrot.slane %v2921_v14, 1 }
  0x85   : > { %2657 = vmatpush3.bf16.msra.mxu0 %v2919_v0 }
  0x86   : > { %2658 = vmatprep.subr.bf16.mxu0 %v2922_v1  ;;  %v608_v59 = vrot.slane %v606_v5, 1  ;;  %v650_v12 = vsel %vm620_vm0, %v648_v9, %v649_v10 }
  0x89   : > { %2659 = vmatpush3.bf16.msra.mxu0 %v2922_v1 }
  0x8b   : > { %1731 = vmatmul.mubr.bf16.gmra.mrb[48].mxu0 %v3245_v34  ;;  %2629 = vmatmul.mubr.bf16.vlgmr.msra.gmra.mrb[0].mxu1 %v3170_v62  ;;  %v604_v34 = vor.u32 %v603_v42, %v599_v4 }
  0x8c   : > { %1738 = vmatprep.mubr.bf16.mxu0 %v3369_v41  ;;  %2684 = vmatpush3.bf16.msra.mxu1 %v3353_v36  ;;  %v3466_v36 = vld [vmem:[%s3634_s3] ss:$0 sm:$0xff] }
  0x8d   : > { %2632 = vmatprep.mubr.bf16.mxu1 %v3181_v3  ;;  %2677 = vmatprep.subr.bf16.mxu1 %v2908_v49  ;;  %v609_v6 = vsel %vm489_vm1, %v604_v34, %v608_v59 }
  0x90   : > { %2685 = vmatpush3.bf16.msra.mxu1 %v2908_v49 }
  0x91   : > { %2678 = vmatprep.subr.bf16.mxu1 %v2910_v17 }
  0x93   : > { %1739 = vmatmul.mubr.bf16.gmra.mrb[52].mxu0 %v3250_v39  ;;  %2633 = vmatmul.mubr.bf16.gmra.mrb[4].mxu1 %v3221_v22  ;;  %v645_v39 = vrot.slane %v3395_v50, 1 }
  0x94   : > { %1746 = vmatprep.mubr.bf16.mxu0 %v597_v63  ;;  %2686 = vmatpush3.bf16.msra.mxu1 %v2910_v17 }
  0x95   : > { %2636 = vmatprep.mubr.bf16.mxu1 %v3230_v25  ;;  %2679 = vmatprep.subr.bf16.mxu1 %v2915_v43  ;;  %v647_v8 = vsel %vm620_vm0, %v645_v39, %v646_v7 }
  0x98   : > { %2687 = vmatpush3.bf16.msra.mxu1 %v2915_v43 }
  0x99   : > { %2680 = vmatprep.subr.bf16.mxu1 %v2917_v61 }
  0x9b   : > { %1747 = vmatmul.mubr.bf16.gmra.mrb[56].mxu0 %v3395_v50  ;;  %2637 = vmatmul.mubr.bf16.gmra.mrb[8].mxu1 %v3264_v46 }
  0x9c   : > { %1754 = vmatprep.mubr.bf16.mxu0 %v609_v6  ;;  %2688 = vmatpush3.bf16.msra.mxu1 %v2917_v61 }
  0x9d   : > { %2640 = vmatprep.mubr.bf16.mxu1 %v3277_v52  ;;  %2681 = vmatprep.subr.bf16.mxu1 %v2918_v56 }
  0xa0   : > { %2689 = vmatpush3.bf16.msra.mxu1 %v2918_v56 }
  0xa1   : > { %2682 = vmatprep.subr.bf16.mxu1 %v2919_v0 }
  0xa3   : > { %1755 = vmatmul.mubr.bf16.gmra.mrb[60].mxu0 %v2920_v11  ;;  %2641 = vmatmul.mubr.bf16.gmra.mrb[12].mxu1 %v647_v8 }
  0xa4   : > { %2660 = vmatprep.mubr.bf16.mxu0 %v3170_v62  ;;  %2690 = vmatpush3.bf16.msra.mxu1 %v2919_v0 }
  0xa5   : > { %2668 = vmatprep.mubr.bf16.mxu1 %v3264_v46  ;;  %2683 = vmatprep.subr.bf16.mxu1 %v2922_v1 }
  0xa8   : > { %2691 = vmatpush3.bf16.msra.mxu1 %v2922_v1 }
  0xab   : > { %2661 = vmatmul.mubr.bf16.vlgmr.msra.gmra.mrb[64].mxu0 %v3181_v3  ;;  %2669 = vmatmul.mubr.bf16.vlgmr.msra.gmra.mrb[8].mxu1 %v3277_v52 }
  0xac   : > { %2664 = vmatprep.mubr.bf16.mxu0 %v3221_v22  ;;  %2672 = vmatprep.mubr.bf16.mxu1 %v647_v8 }
  0xb3   : > { %2665 = vmatmul.mubr.bf16.gmra.mrb[68].mxu0 %v3230_v25  ;;  %2673 = vmatmul.mubr.bf16.gmra.mrb[12].mxu1 %v650_v12 }
  0xfe   : > { %v2356_v62 = vpop.f32.mrb[0].mxu0 }
  0xff   : > { %v2357_v13 = vpop.f32.mrb[1].mxu0 }
 0x100   : > { %v2358_v15 = vadd.f32 %v2357_v13, %v2356_v62  ;;  %v2359_v46 = vpop.f32.mrb[2].mxu0 }
 0x101   : > { %v2360_v16 = vpop.f32.mrb[3].mxu0 }
 0x102   : > { %v2361_v18 = vadd.f32 %v2360_v16, %v2359_v46  ;;  %v2697_v47 = vadd.f32 %v2358_v15, %v3466_v36 }
 0x104   : > { %v2707_v54 = vadd.f32 %v2361_v18, %v3466_v36 }
 0x106   : > { %v2362_v19 = vpop.f32.mrb[4].mxu0 }
 0x107   : > { %v2363_v3 = vpop.f32.mrb[5].mxu0 }
 0x108   : > { %v2364_v20 = vadd.f32 %v2363_v3, %v2362_v19  ;;  %v2365_v52 = vpop.f32.mrb[6].mxu0 }
 0x109   : > { %v2366_v21 = vpop.f32.mrb[7].mxu0 }
 0x10a   : > { %v2367_v22 = vadd.f32 %v2366_v21, %v2365_v52  ;;  %v2692_v0 = vadd.f32 %v2364_v20, %v3466_v36 }
 0x10c   : > { %v2702_v42 = vadd.f32 %v2367_v22, %v3466_v36 }
 0x10e   : > { %v2368_v23 = vpop.f32.mrb[8].mxu0 }
 0x10f   : > { %v2369_v24 = vpop.f32.mrb[9].mxu0 }
 0x110   : > { %v2370_v26 = vadd.f32 %v2369_v24, %v2368_v23  ;;  %v2371_v30 = vpop.f32.mrb[10].mxu0 }
 0x111   : > { %v2372_v27 = vpop.f32.mrb[11].mxu0 }
 0x112   : > { %v2373_v28 = vadd.f32 %v2372_v27, %v2371_v30  ;;  %v2717_v12 = vadd.f32 %v2370_v26, %v3466_v36 }
 0x114   : > { %v2727_v18 = vadd.f32 %v2373_v28, %v3466_v36 }
 0x116   : > { %v2374_v25 = vpop.f32.mrb[12].mxu0 }
 0x117   : > { %v2375_v29 = vpop.f32.mrb[13].mxu0 }
 0x118   : > { %v2376_v31 = vadd.f32 %v2375_v29, %v2374_v25  ;;  %v2377_v32 = vpop.f32.mrb[14].mxu0 }
 0x119   : > { %v2378_v33 = vpop.f32.mrb[15].mxu0 }
 0x11a   : > { %v2379_v35 = vadd.f32 %v2378_v33, %v2377_v32  ;;  %v2712_v30 = vadd.f32 %v2376_v31, %v3466_v36 }
 0x11c   : > { %v2722_v33 = vadd.f32 %v2379_v35, %v3466_v36 }
 0x11e   : > { %v2380_v37 = vpop.f32.mrb[16].mxu0  ;;  %v2436_v38 = vpop.f32.mrb[16].mxu1 }
 0x11f   : > { %v2381_v40 = vpop.f32.mrb[17].mxu0  ;;  %v2437_v44 = vpop.f32.mrb[17].mxu1 }
 0x120   : > { %v3468_v41 = vadd.f32 %v2381_v40, %v2380_v37  ;;  %v2383_v45 = vpop.f32.mrb[18].mxu0  ;;  %v2438_v48 = vadd.f32 %v2437_v44, %v2436_v38  ;;  %v2439_v49 = vpop.f32.mrb[18].mxu1 }
 0x121   : > { %v2384_v50 = vpop.f32.mrb[19].mxu0  ;;  %v2440_v53 = vpop.f32.mrb[19].mxu1 }
 0x122   : > { %v3471_v17 = vadd.f32 %v2384_v50, %v2383_v45  ;;  %v2441_v51 = vadd.f32 %v2440_v53, %v2439_v49  ;;  %v3474_v55 = vadd.f32 %v2697_v47, %v2438_v48  ;;  %v2736_v50 = vadd.f32 %v3468_v41, %v3466_v36 }
 0x124   : > { %v3476_v57 = vadd.f32 %v2707_v54, %v2441_v51 }
 0x126   : > { %v2386_v43 = vpop.f32.mrb[20].mxu0  ;;  %v2442_v58 = vpop.f32.mrb[20].mxu1 }
 0x127   : > { %v2387_v60 = vpop.f32.mrb[21].mxu0  ;;  %v2443_v63 = vpop.f32.mrb[21].mxu1 }
 0x128   : > { %v3478_v61 = vadd.f32 %v2387_v60, %v2386_v43  ;;  %v2389_v56 = vpop.f32.mrb[22].mxu0  ;;  %v2444_v1 = vadd.f32 %v2443_v63, %v2442_v58  ;;  %v2445_v11 = vpop.f32.mrb[22].mxu1  ;;  %v2744_v58 = vadd.f32 %v3471_v17, %v3466_v36 }
 0x129   : > { %v2390_v14 = vpop.f32.mrb[23].mxu0  ;;  %v2446_v4 = vpop.f32.mrb[23].mxu1 }
 0x12a   : > { %v3481_v2 = vadd.f32 %v2390_v14, %v2389_v56  ;;  %v2447_v5 = vadd.f32 %v2446_v4, %v2445_v11  ;;  %v3484_v34 = vadd.f32 %v2692_v0, %v2444_v1 }
 0x12c   : > { %v3486_v59 = vadd.f32 %v2702_v42, %v2447_v5  ;;  %v2732_v42 = vadd.f32 %v3478_v61, %v3466_v36  ;;  %v2740_v17 = vadd.f32 %v3481_v2, %v3466_v36 }
 0x12e   : > { %v2392_v6 = vpop.f32.mrb[24].mxu0  ;;  %v2448_v39 = vpop.f32.mrb[24].mxu1 }
 0x12f   : > { %v2393_v7 = vpop.f32.mrb[25].mxu0  ;;  %v2449_v9 = vpop.f32.mrb[25].mxu1 }
 0x130   : > { %v3488_v8 = vadd.f32 %v2393_v7, %v2392_v6  ;;  %v2395_v10 = vpop.f32.mrb[26].mxu0  ;;  %v2450_v62 = vadd.f32 %v2449_v9, %v2448_v39  ;;  %v2451_v13 = vpop.f32.mrb[26].mxu1 }
 0x131   : > { %v2396_v15 = vpop.f32.mrb[27].mxu0  ;;  %v2452_v16 = vpop.f32.mrb[27].mxu1 }
 0x132   : > { %v3491_v46 = vadd.f32 %v2396_v15, %v2395_v10  ;;  %v2453_v19 = vadd.f32 %v2452_v16, %v2451_v13  ;;  %v3494_v3 = vadd.f32 %v2717_v12, %v2450_v62 }
 0x134   : > { %v3496_v20 = vadd.f32 %v2727_v18, %v2453_v19 }
 0x136   : > { %v2398_v52 = vpop.f32.mrb[28].mxu0  ;;  %v2454_v21 = vpop.f32.mrb[28].mxu1 }
 0x137   : > { %v2399_v22 = vpop.f32.mrb[29].mxu0  ;;  %v2455_v24 = vpop.f32.mrb[29].mxu1 }
 0x138   : > { %v3498_v23 = vadd.f32 %v2399_v22, %v2398_v52  ;;  %v2401_v26 = vpop.f32.mrb[30].mxu0  ;;  %v2456_v27 = vadd.f32 %v2455_v24, %v2454_v21  ;;  %v2457_v25 = vpop.f32.mrb[30].mxu1  ;;  %v2752_v52 = vadd.f32 %v3488_v8, %v3466_v36 }
 0x139   : > { %v2402_v29 = vpop.f32.mrb[31].mxu0  ;;  %v2458_v28 = vpop.f32.mrb[31].mxu1 }
 0x13a   : > { %v3501_v32 = vadd.f32 %v2402_v29, %v2401_v26  ;;  %v2459_v37 = vadd.f32 %v2458_v28, %v2457_v25  ;;  %v3504_v38 = vadd.f32 %v2712_v30, %v2456_v27  ;;  %v2760_v30 = vadd.f32 %v3491_v46, %v3466_v36 }
 0x13b   : > { %v2748_v8 = vadd.f32 %v3498_v23, %v3466_v36 }
 0x13c   : > { %v3506_v40 = vadd.f32 %v2722_v33, %v2459_v37  ;;  %v2756_v46 = vadd.f32 %v3501_v32, %v3466_v36 }
 0x13e   : > { %v2516_v44 = vpop.f32.mrb[32].mxu0  ;;  %v2460_v45 = vpop.f32.mrb[32].mxu1 }
 0x13f   : > { %v2517_v47 = vpop.f32.mrb[33].mxu0  ;;  %v2461_v48 = vpop.f32.mrb[33].mxu1 }
 0x140   : > { %v3508_v49 = vadd.f32 %v2517_v47, %v2516_v44  ;;  %v2519_v31 = vpop.f32.mrb[34].mxu0  ;;  %v2462_v53 = vadd.f32 %v2461_v48, %v2460_v45  ;;  %v2463_v54 = vpop.f32.mrb[34].mxu1 }
 0x141   : > { %v2520_v51 = vpop.f32.mrb[35].mxu0  ;;  %v2464_v43 = vpop.f32.mrb[35].mxu1 }
 0x142   : > { %v3512_v35 = vadd.f32 %v2520_v51, %v2519_v31  ;;  %v3516_v60 = vadd.f32 %v2736_v50, %v2462_v53  ;;  %v2465_v63 = vadd.f32 %v2464_v43, %v2463_v54 }
 0x144   : > { %v3518_v56 = vadd.f32 %v2744_v58, %v2465_v63 }
 0x146   : > { %v2522_v0 = vpop.f32.mrb[36].mxu0  ;;  %v2466_v1 = vpop.f32.mrb[36].mxu1 }
 0x147   : > { %v2523_v11 = vpop.f32.mrb[37].mxu0  ;;  %v2467_v14 = vpop.f32.mrb[37].mxu1 }
 0x148   : > { %v2524_v4 = vadd.f32 %v2523_v11, %v2522_v0  ;;  %v2525_v41 = vpop.f32.mrb[38].mxu0  ;;  %v2468_v5 = vadd.f32 %v2467_v14, %v2466_v1  ;;  %v2469_v6 = vpop.f32.mrb[38].mxu1 }
 0x149   : > { %v2526_v39 = vpop.f32.mrb[39].mxu0  ;;  %v2470_v7 = vpop.f32.mrb[39].mxu1 }
 0x14a   : > { %v2527_v9 = vadd.f32 %v2526_v39, %v2525_v41  ;;  %v3524_v10 = vadd.f32 %v2732_v42, %v2468_v5  ;;  %v2471_v12 = vadd.f32 %v2470_v7, %v2469_v6 }
 0x14c   : > { %v3526_v62 = vadd.f32 %v2740_v17, %v2471_v12 }
 0x14e   : > { %v2528_v13 = vpop.f32.mrb[40].mxu0  ;;  %v2472_v15 = vpop.f32.mrb[40].mxu1 }
 0x14f   : > { %v2529_v16 = vpop.f32.mrb[41].mxu0  ;;  %v2473_v18 = vpop.f32.mrb[41].mxu1 }
 0x150   : > { %v3528_v19 = vadd.f32 %v2529_v16, %v2528_v13  ;;  %v2531_v61 = vpop.f32.mrb[42].mxu0  ;;  %v2474_v21 = vadd.f32 %v2473_v18, %v2472_v15  ;;  %v2475_v22 = vpop.f32.mrb[42].mxu1 }
 0x151   : > { %v2532_v24 = vpop.f32.mrb[43].mxu0  ;;  %v2476_v26 = vpop.f32.mrb[43].mxu1 }
 0x152   : > { %v2533_v2 = vadd.f32 %v2532_v24, %v2531_v61  ;;  %v3534_v27 = vadd.f32 %v2752_v52, %v2474_v21  ;;  %v2477_v25 = vadd.f32 %v2476_v26, %v2475_v22 }
 0x154   : > { %v3536_v29 = vadd.f32 %v2760_v30, %v2477_v25 }
 0x156   : > { %v2534_v28 = vpop.f32.mrb[44].mxu0  ;;  %v2478_v33 = vpop.f32.mrb[44].mxu1 }
 0x157   : > { %v2535_v37 = vpop.f32.mrb[45].mxu0  ;;  %v2479_v44 = vpop.f32.mrb[45].mxu1 }
 0x158   : > { %v2536_v45 = vadd.f32 %v2535_v37, %v2534_v28  ;;  %v2537_v47 = vpop.f32.mrb[46].mxu0  ;;  %v2480_v48 = vadd.f32 %v2479_v44, %v2478_v33  ;;  %v2481_v31 = vpop.f32.mrb[46].mxu1 }
 0x159   : > { %v2538_v50 = vpop.f32.mrb[47].mxu0  ;;  %v2482_v53 = vpop.f32.mrb[47].mxu1 }
 0x15a   : > { %v2539_v54 = vadd.f32 %v2538_v50, %v2537_v47  ;;  %v2749_v51 = vadd.f32 %v2748_v8, %v2480_v48  ;;  %v2483_v43 = vadd.f32 %v2482_v53, %v2481_v31 }
 0x15c   : > { %v2757_v58 = vadd.f32 %v2756_v46, %v2483_v43 }
 0x15e   : > { %v2540_v63 = vpop.f32.mrb[48].mxu0  ;;  %v2630_v0 = vpop.f32.mrb[0].mxu1 }
 0x15f   : > { %v2541_v1 = vpop.f32.mrb[49].mxu0  ;;  %v2694_v11 = vadd.f32 %v3484_v34, %v2630_v0  ;;  %v1394_v14 = vpop.f32.mrb[1].mxu1 }
 0x160   : > { %v2542_v41 = vadd.f32 %v2541_v1, %v2540_v63  ;;  %v2543_v42 = vpop.f32.mrb[50].mxu0  ;;  %v2699_v23 = vadd.f32 %v3474_v55, %v1394_v14  ;;  %v2631_v5 = vpop.f32.mrb[2].mxu1 }
 0x161   : > { %v2544_v6 = vpop.f32.mrb[51].mxu0  ;;  %v2704_v39 = vadd.f32 %v3486_v59, %v2631_v5  ;;  %v1397_v7 = vpop.f32.mrb[3].mxu1  ;;  %v2695_v36 = vadd.f32 %v2694_v11, %v2524_v4 }
 0x162   : > { %v2545_v17 = vadd.f32 %v2544_v6, %v2543_v42  ;;  %v2738_v32 = vadd.f32 %v3516_v60, %v2542_v41  ;;  %v2709_v12 = vadd.f32 %v3476_v57, %v1397_v7  ;;  %v2700_v13 = vadd.f32 %v2699_v23, %v3508_v49 }
 0x163   : > { %v2705_v15 = vadd.f32 %v2704_v39, %v2527_v9 }
 0x164   : > { %v3549_v34 = vadd.f32 %v3518_v56, %v2545_v17  ;;  %v2710_v16 = vadd.f32 %v2709_v12, %v3512_v35 }
 0x166   : > { %v2546_v55 = vpop.f32.mrb[52].mxu0  ;;  %v2634_v18 = vpop.f32.mrb[4].mxu1 }
 0x167   : > { %v2547_v61 = vpop.f32.mrb[53].mxu0  ;;  %v2714_v59 = vadd.f32 %v3504_v38, %v2634_v18  ;;  %v1410_v52 = vpop.f32.mrb[5].mxu1 }
 0x168   : > { %v2548_v4 = vadd.f32 %v2547_v61, %v2546_v55  ;;  %v2549_v21 = vpop.f32.mrb[54].mxu0  ;;  %v2719_v60 = vadd.f32 %v3494_v3, %v1410_v52  ;;  %v2635_v57 = vpop.f32.mrb[6].mxu1 }
 0x169   : > { %v2550_v22 = vpop.f32.mrb[55].mxu0  ;;  %v2724_v49 = vadd.f32 %v3506_v40, %v2635_v57  ;;  %v1413_v56 = vpop.f32.mrb[7].mxu1  ;;  %v2715_v24 = vadd.f32 %v2714_v59, %v2536_v45 }
 0x16a   : > { %v2551_v9 = vadd.f32 %v2550_v22, %v2549_v21  ;;  %v2734_v35 = vadd.f32 %v3524_v10, %v2548_v4  ;;  %v2729_v26 = vadd.f32 %v3496_v20, %v1413_v56  ;;  %v3558_v38 = vadd.f32 %v2719_v60, %v3528_v19 }
 0x16b   : > { %v3561_v25 = vadd.f32 %v2724_v49, %v2539_v54 }
 0x16c   : > { %v2742_v30 = vadd.f32 %v3526_v62, %v2551_v9  ;;  %v3564_v3 = vadd.f32 %v2729_v26, %v2533_v2 }
 0x16e   : > { %v2552_v40 = vpop.f32.mrb[56].mxu0 }
 0x16f   : > { %v2553_v28 = vpop.f32.mrb[57].mxu0 }
 0x170   : > { %v2554_v33 = vadd.f32 %v2553_v28, %v2552_v40  ;;  %v2555_v37 = vpop.f32.mrb[58].mxu0 }
 0x171   : > { %v2556_v44 = vpop.f32.mrb[59].mxu0 }
 0x172   : > { %v2557_v10 = vadd.f32 %v2556_v44, %v2555_v37  ;;  %v2754_v20 = vadd.f32 %v3534_v27, %v2554_v33 }
 0x174   : > { %v3569_v45 = vadd.f32 %v3536_v29, %v2557_v10 }
 0x176   : > { %v2558_v62 = vpop.f32.mrb[60].mxu0 }
 0x177   : > { %v2559_v19 = vpop.f32.mrb[61].mxu0 }
 0x178   : > { %v2560_v47 = vadd.f32 %v2559_v19, %v2558_v62  ;;  %v2561_v8 = vpop.f32.mrb[62].mxu0 }
 0x179   : > { %v2562_v2 = vpop.f32.mrb[63].mxu0 }
 0x17a   : > { %v2563_v48 = vadd.f32 %v2562_v2, %v2561_v8  ;;  %v2750_v31 = vadd.f32 %v2749_v51, %v2560_v47 }
 0x17c   : > { %v2758_v50 = vadd.f32 %v2757_v58, %v2563_v48 }
 0x17e   : > { %v2662_v27 = vpop.f32.mrb[64].mxu0  ;;  %v2670_v53 = vpop.f32.mrb[8].mxu1 }
 0x17f   : > { %v2696_v29 = vadd.f32 %v2695_v36, %v2662_v27  ;;  %v1797_v54 = vpop.f32.mrb[65].mxu0  ;;  %v3577_v46 = vadd.f32 %v2734_v35, %v2670_v53  ;;  %v1829_v51 = vpop.f32.mrb[9].mxu1 }
 0x180   : > { %v2701_v43 = vadd.f32 %v2700_v13, %v1797_v54  ;;  %v2663_v58 = vpop.f32.mrb[66].mxu0  ;;  %v2739_v63 = vadd.f32 %v2738_v32, %v1829_v51  ;;  %v2671_v1 = vpop.f32.mrb[10].mxu1 }
 0x181   : > { %1878 = vst [vmem:[%s3575_s11 + $0x10] sm:$0xff] %v2696_v29  ;;  %v2706_v0 = vadd.f32 %v2705_v15, %v2663_v58  ;;  %v1800_v11 = vpop.f32.mrb[67].mxu0  ;;  %1886 = vst [vmem:[%s3575_s11 + $0x50] sm:$0xff] %v3577_v46  ;;  %v3583_v14 = vadd.f32 %v2742_v30, %v2671_v1  ;;  %v1832_v42 = vpop.f32.mrb[11].mxu1  ;;  %v1915_v7 = vmul.f32 %v2696_v29, %v2696_v29 }
 0x182   : > { %1876 = vst [vmem:[%s3575_s11] sm:$0xff] %v2701_v43  ;;  %v2711_v41 = vadd.f32 %v2710_v16, %v1800_v11  ;;  %1884 = vst [vmem:[%s3575_s11 + $0x40] sm:$0xff] %v2739_v63  ;;  %v2747_v23 = vadd.f32 %v3549_v34, %v1832_v42  ;;  %v1913_v5 = vmul.f32 %v2701_v43, %v2701_v43 }
 0x183   : > { %1879 = vst [vmem:[%s3575_s11 + $0x18] sm:$0xff] %v2706_v0  ;;  %1887 = vst [vmem:[%s3575_s11 + $0x58] sm:$0xff] %v3583_v14  ;;  %v1916_v12 = vmul.f32 %v2706_v0, %v2706_v0 }
 0x184   : > { %1877 = vst [vmem:[%s3575_s11 + $0x8] sm:$0xff] %v2711_v41  ;;  %v1892_v6 = vadd.f32 %v2711_v41, %v2701_v43  ;;  %v1914_v39 = vmul.f32 %v2711_v41, %v2711_v41  ;;  %1885 = vst [vmem:[%s3575_s11 + $0x48] sm:$0xff] %v2747_v23  ;;  %v1922_v47 = vmul.f32 %v2747_v23, %v2747_v23 }
 0x186   : > { %v1893_v17 = vadd.f32 %v2696_v29, %v1892_v6  ;;  %v1929_v36 = vadd.f32 %v1914_v39, %v1913_v5  ;;  %v2666_v32 = vpop.f32.mrb[68].mxu0  ;;  %v2674_v15 = vpop.f32.mrb[12].mxu1 }
 0x187   : > { %v2716_v13 = vadd.f32 %v2715_v24, %v2666_v32  ;;  %v1813_v16 = vpop.f32.mrb[69].mxu0  ;;  %v2751_v34 = vadd.f32 %v2750_v31, %v2674_v15  ;;  %v1845_v59 = vpop.f32.mrb[13].mxu1  ;;  %v1924_v31 = vmul.f32 %v3583_v14, %v3583_v14 }
 0x188   : > { %v1930_v55 = vadd.f32 %v1929_v36, %v1915_v7  ;;  %v2721_v18 = vadd.f32 %v3558_v38, %v1813_v16  ;;  %v1894_v61 = vadd.f32 %v2706_v0, %v1893_v17  ;;  %v2667_v52 = vpop.f32.mrb[70].mxu0  ;;  %v2755_v4 = vadd.f32 %v2754_v20, %v1845_v59  ;;  %v2675_v60 = vpop.f32.mrb[14].mxu1 }
 0x189   : > { %1882 = vst [vmem:[%s3575_s11 + $0x30] sm:$0xff] %v2716_v13  ;;  %v2726_v21 = vadd.f32 %v3561_v25, %v2667_v52  ;;  %v1816_v57 = vpop.f32.mrb[71].mxu0  ;;  %1890 = vst [vmem:[%s3575_s11 + $0x70] sm:$0xff] %v2751_v34  ;;  %v1848_v9 = vpop.f32.mrb[15].mxu1  ;;  %v2759_v35 = vadd.f32 %v2758_v50, %v2675_v60  ;;  %v1919_v40 = vmul.f32 %v2716_v13, %v2716_v13 }
 0x18a   : > { %1880 = vst [vmem:[%s3575_s11 + $0x20] sm:$0xff] %v2721_v18  ;;  %v1895_v22 = vadd.f32 %v2721_v18, %v1894_v61  ;;  %v1917_v49 = vmul.f32 %v2721_v18, %v2721_v18  ;;  %v1931_v56 = vadd.f32 %v1930_v55, %v1916_v12  ;;  %1888 = vst [vmem:[%s3575_s11 + $0x60] sm:$0xff] %v2755_v4 }
 0x18b   : > { %1883 = vst [vmem:[%s3575_s11 + $0x38] sm:$0xff] %v2726_v21  ;;  %v2731_v24 = vadd.f32 %v3564_v3, %v1816_v57  ;;  %v2763_v38 = vadd.f32 %v3569_v45, %v1848_v9  ;;  %1891 = vst [vmem:[%s3575_s11 + $0x78] sm:$0xff] %v2759_v35  ;;  %v1920_v37 = vmul.f32 %v2726_v21, %v2726_v21 }
 0x18c   : > { %v1932_v26 = vadd.f32 %v1931_v56, %v1917_v49  ;;  %v1921_v20 = vmul.f32 %v2739_v63, %v2739_v63  ;;  %v1923_v45 = vmul.f32 %v3577_v46, %v3577_v46  ;;  %v1925_v29 = vmul.f32 %v2755_v4, %v2755_v4 }
 0x18d   : > { %1881 = vst [vmem:[%s3575_s11 + $0x28] sm:$0xff] %v2731_v24  ;;  %v1896_v30 = vadd.f32 %v2731_v24, %v1895_v22  ;;  %v1918_v25 = vmul.f32 %v2731_v24, %v2731_v24  ;;  %1889 = vst [vmem:[%s3575_s11 + $0x68] sm:$0xff] %v2763_v38  ;;  %v1926_v51 = vmul.f32 %v2763_v38, %v2763_v38 }
 0x18f   : > { %v1897_v28 = vadd.f32 %v2716_v13, %v1896_v30  ;;  %v1933_v33 = vadd.f32 %v1932_v26, %v1918_v25 }
 0x191   : > { %v1898_v44 = vadd.f32 %v2726_v21, %v1897_v28  ;;  %v1934_v10 = vadd.f32 %v1933_v33, %v1919_v40 }
 0x193   : > { %v1899_v62 = vadd.f32 %v2739_v63, %v1898_v44  ;;  %v1935_v19 = vadd.f32 %v1934_v10, %v1920_v37  ;;  %v1927_v63 = vmul.f32 %v2751_v34, %v2751_v34 }
 0x195   : > { %v1936_v8 = vadd.f32 %v1935_v19, %v1921_v20  ;;  %v1900_v3 = vadd.f32 %v2747_v23, %v1899_v62 }
 0x197   : > { %v1901_v2 = vadd.f32 %v3577_v46, %v1900_v3  ;;  %v1937_v48 = vadd.f32 %v1936_v8, %v1922_v47  ;;  %v1928_v46 = vmul.f32 %v2759_v35, %v2759_v35 }
 0x199   : > { %v1902_v50 = vadd.f32 %v3583_v14, %v1901_v2  ;;  %v1938_v27 = vadd.f32 %v1937_v48, %v1923_v45 }
 0x19b   : > { %v1903_v53 = vadd.f32 %v2755_v4, %v1902_v50  ;;  %v1939_v54 = vadd.f32 %v1938_v27, %v1924_v31 }
 0x19d   : > { %v1904_v43 = vadd.f32 %v2763_v38, %v1903_v53  ;;  %v1940_v58 = vadd.f32 %v1939_v54, %v1925_v29 }
 0x19f   : > { %v1905_v0 = vadd.f32 %v2751_v34, %v1904_v43  ;;  %v1941_v1 = vadd.f32 %v1940_v58, %v1926_v51 }
 0x1a1   : > { %v1906_v11 = vadd.f32 %v2759_v35, %v1905_v0  ;;  %v1942_v41 = vadd.f32 %v1941_v1, %v1927_v63 }
 0x1a3   : > { %v1907_v42 = vrot.slane %v1906_v11, 4  ;;  %v1943_v23 = vadd.f32 %v1942_v41, %v1928_v46 }
 0x1a5   : > { %v1908_v5 = vadd.f32 %v1907_v42, %v1906_v11  ;;  %v1944_v14 = vrot.slane %v1943_v23, 4 }
 0x1a7   : > { %v1909_v6 = vrot.slane %v1908_v5, 2  ;;  %v1945_v39 = vadd.f32 %v1944_v14, %v1943_v23 }
 0x1a9   : > { %v1910_v7 = vadd.f32 %v1909_v6, %v1908_v5  ;;  %v1946_v17 = vrot.slane %v1945_v39, 2 }
 0x1ab   : > { %v1911_v36 = vrot.slane %v1910_v7, 1  ;;  %v1947_v32 = vadd.f32 %v1946_v17, %v1945_v39 }
 0x1ad   : > { %v1948_v12 = vrot.slane %v1947_v32, 1  ;;  %v1912_v13 = vadd.f32 %v1911_v36, %v1910_v7 }
 0x1af   : > { %v1949_v15 = vadd.f32 %v1948_v12, %v1947_v32 }
 0x1b1   : > { %v1951_v16 = vsel %vm1950_vm2, %v1912_v13, %v1949_v15 }
 0x1b2   : > { %v1953_v55 = vsel %vm1952_vm3, %v1951_v16, 0.0 }
 0x1b3   : > { %1954 = vst [vmem:[%s367_s28] sm:$0xff] %v1953_v55 }
 0x1b4 PF: > { %s16_s22 = sadd.s32 1, %s2961_s22   ;;  %s3637_s18 = smov %s2953_s20 }
 0x1b5   : > { %p13_p10 = scmp.ge.s32.totalorder %s16_s22, 6   ;;  %s3638_s19 = smov %s2957_s21 }
 0x1b6   : > { %s3639_s20 = smov %s3642_s23  ;;  %s3640_s21 = smov %s3646_s24 }
 0x1b7   :  { %15 = sbr.rel (!%p13_p10) target bundleno = 3 (0x3), region = 83 }

// kernel: encoder_block_forward.4
= control target key start
LH: loop header
LB: loop body
LE: loop exit
PB: predicated region body
PF: predicated region fallthrough
CT: control target
= control target key end

     0   :  { %s3332_s27 = smov 0   ;;  %s3334_s28 = smov 0   ;;  %s4202_s0 = inlined_call_operand.vmem [shape: f32[2,16,16,128], index: 0, kind: input, shape index: {}, may-alias: {0,1,2}]   ;;  %s4203_s1 = inlined_call_operand.vmem [shape: f32[2,16,16,128], index: 1, kind: input, shape index: {}, may-alias: {0,1,2}]   ;;  %s4204_s2 = inlined_call_operand.vmem [shape: f32[2,16,16,128], index: 2, kind: input, shape index: {}, may-alias: {0,1,2}]   ;;  %s4205_s3 = inlined_call_operand.vmem [shape: f32[1,128], index: 3, kind: input, shape index: {}]   ;;  %s4206_s4 = inlined_call_operand.vmem [shape: f32[1,128], index: 4, kind: input, shape index: {}]   ;;  %s4207_s5 = inlined_call_operand.vmem [shape: bf16[3,384,128], index: 5, kind: input, shape index: {}]   ;;  %s4208_s6 = inlined_call_operand.vmem [shape: f32[1,128], index: 6, kind: input, shape index: {}]   ;;  %s4209_s7 = inlined_call_operand.vmem [shape: f32[2,16,16,128], index: 7, kind: output, shape index: {0}]   ;;  %s4210_s8 = inlined_call_operand.vmem [shape: f32[2,2,8,128], index: 8, kind: output, shape index: {1}]  }
   0x1   :  { %s3336_s29 = smov 0   ;;  %s3338_s30 = smov 0  }
   0x2   :  { %s3340_s9 = smov 0  }
   0x3 LB: > { %s28_s10 = sadd.s32 1, %s3276_s29  ;;  %s31_s11 = sadd.s32 1, %s3280_s30  ;;  %s3284_s9 = sphi %s3340_s9, %s19_s9   ;;  %s3280_s30 = sphi %s3338_s30, %s4221_s30   ;;  %s3276_s29 = sphi %s3336_s29, %s4220_s29   ;;  %s3272_s28 = sphi %s3334_s28, %s4219_s28   ;;  %s3268_s27 = sphi %s3332_s27, %s4218_s27  }
   0x4   : > { %p29_p0 = scmp.ge.s32.totalorder %s28_s10, 2  ;;  %p2386_p1 = scmp.ge.s32.totalorder %s3284_s9, 1 }
   0x5   : > { %p353_p2 = scmp.lt.s32.totalorder %s3284_s9, 5 }
   0x6   : > { %s4223_s10 = smov (%p29_p0, %s28_s10), 0  ;;  %s4225_s11 = smov (!%p29_p0, %s31_s11), %s3280_s30 }
   0x7   : > { %p354_p3 = pnand %p2386_p1, %p353_p2  ;;  %p33_p4 = scmp.ge.s32.totalorder %s4225_s11, 2 }
   0x8   : > { %v3174_v0 = vld [vmem:[%s4207_s5 + $0x40] sm:$0xff] (!%p354_p3)   ;;  %s3370_s14 = sshll.u32 (!%p354_p3), %s3268_s27, 3  ;;  %p432_p5 = scmp.lt.s32.totalorder (!%p354_p3), %s3272_s28, 1  ;;  %v3177_v3 = vld [vmem:[%s4207_s5 + $0x48] sm:$0xff] (!%p354_p3)   ;;  %v3180_v6 = vld [vmem:[%s4207_s5 + $0x50] sm:$0xff] (!%p354_p3)   ;;  %vm602_vm0 = vcmask (!%p354_p3), 1040384  }
   0x9   : > { %s4227_s11 = smov (%p33_p4, %s4225_s11), 0  ;;  %357 = sbr.rel (%p354_p3) target bundleno = 437 (0x1b5), region = 48 }
   0xa   : > { %4211 = sst [smem:[#allocation2_spill]] %s4227_s11  ;;  %v3175_v1 = vld [vmem:[%s4207_s5 + $0x80] sm:$0xff] (!%p354_p3)   ;;  %2685 = vmatprep.subr.bf16.mxu0 (!%p354_p3), %v3174_v0  ;;  %p434_p6 = scmp.lt.s32.totalorder (!%p354_p3), %s3370_s14, 15  ;;  %v3178_v4 = vld [vmem:[%s4207_s5 + $0x88] sm:$0xff] (!%p354_p3)   ;;  %v3181_v7 = vld [vmem:[%s4207_s5 + $0x90] sm:$0xff] (!%p354_p3)   ;;  %vm854_vm1 = vcmask (!%p354_p3), 1046528  }
   0xb   : > { %v3176_v2 = vld [vmem:[%s4207_s5] sm:$0xff] (!%p354_p3)   ;;  %2925 = vmatprep.subr.bf16.mxu1 (!%p354_p3), %v3175_v1  ;;  %v3179_v5 = vld [vmem:[%s4207_s5 + $0x8] sm:$0xff] (!%p354_p3)   ;;  %s2392_s16 = sadd.s32 (!%p354_p3), 4294967295, %s3370_s14  ;;  %v3182_v8 = vld [vmem:[%s4207_s5 + $0x10] sm:$0xff] (!%p354_p3)   ;;  %p564_p10 = scmp.gt.s32.totalorder (!%p354_p3), %s3268_s27, 0  ;;  %vm3286_vm4 = vmmov (!%p354_p3), 1  }
   0xc   : > { %2686 = vmatpush3.bf16.msra.mxu0 (!%p354_p3), %v3176_v2  ;;  %2926 = vmatpush3.bf16.msra.mxu1 (!%p354_p3), %v3175_v1  ;;  %v3183_v9 = vld [vmem:[%s4207_s5 + $0x58] sm:$0xff] (!%p354_p3)   ;;  %p444_p7 = scmp.gt.s32.totalorder (!%p354_p3), %s2392_s16, 0  ;;  %p2393_p8 = scmp.lt.s32.totalorder (!%p354_p3), %s2392_s16, 15  ;;  %v3186_v12 = vld [vmem:[%s4207_s5 + $0x60] sm:$0xff] (!%p354_p3)   ;;  %v3189_v15 = vld [vmem:[%s4207_s5 + $0x68] sm:$0xff] (!%p354_p3)   ;;  %vm2185_vm6 = vcmask (!%p354_p3), 1041408  }
   0xd   : > { %2687 = vmatprep.subr.bf16.mxu0 (!%p354_p3), %v3177_v3  ;;  %2927 = vmatprep.subr.bf16.mxu1 (!%p354_p3), %v3178_v4  ;;  %v3184_v10 = vld [vmem:[%s4207_s5 + $0x98] sm:$0xff] (!%p354_p3)   ;;  %v3187_v13 = vld [vmem:[%s4207_s5 + $0xa0] sm:$0xff] (!%p354_p3)   ;;  %v3190_v16 = vld [vmem:[%s4207_s5 + $0xa8] sm:$0xff] (!%p354_p3)   ;;  %vm703_vm2 = vsmask.f32 (!%p354_p3), 7424  ;;  %p489_p11 = scmp.lt.s32.totalorder (!%p354_p3), %s3268_s27, 1 }
   0xe   : > { %v3185_v11 = vld [vmem:[%s4207_s5 + $0x18] sm:$0xff] (!%p354_p3)   ;;  %v3188_v14 = vld [vmem:[%s4207_s5 + $0x20] sm:$0xff] (!%p354_p3)   ;;  %v3191_v17 = vld [vmem:[%s4207_s5 + $0x28] sm:$0xff] (!%p354_p3)  }
   0xf   : > { %v3192_v18 = vld [vmem:[%s4207_s5 + $0x70] sm:$0xff] (!%p354_p3)   ;;  %v3195_v21 = vld [vmem:[%s4207_s5 + $0x78] sm:$0xff] (!%p354_p3)   ;;  %v3476_v22 = vld [vmem:[%s4205_s3] ss:$0 sm:$0xff] (!%p354_p3) }
  0x10   : > { %s3387_s23 = scalar_select %p434_p6, %s3370_s14, 15  ;;  %2688 = vmatpush3.bf16.msra.mxu0 %v3179_v5  ;;  %2928 = vmatpush3.bf16.msra.mxu1 %v3178_v4  ;;  %v3193_v19 = vld [vmem:[%s4207_s5 + $0xb0] sm:$0xff]   ;;  %v3481_v23 = vld [vmem:[%s4206_s4] ss:$0 sm:$0xff]  ;;  %v3196_v25 = vld [vmem:[%s4207_s5 + $0xb8] sm:$0xff]  }
  0x11   : > { %s4229_s28 = smov (!%p432_p5, %s3272_s28), 1  ;;  %2689 = vmatprep.subr.bf16.mxu0 %v3180_v6  ;;  %2929 = vmatprep.subr.bf16.mxu1 %v3181_v7  ;;  %s4231_s16 = smov (!%p444_p7, %s2392_s16), 0  ;;  %v3194_v20 = vld [vmem:[%s4207_s5 + $0x30] sm:$0xff]   ;;  %v3197_v32 = vld [vmem:[%s4207_s5 + $0x38] sm:$0xff]   ;;  %v3198_v37 = vld [vmem:[%s4207_s5 + $0x100] sm:$0xff]  }
  0x12   : > { %s2388_s19 = sshll.u32 %s3387_s23, 1  ;;  %s3421_s13 = sshll.u32 %s4229_s28, 5  ;;  %v3199_v40 = vld [vmem:[%s4207_s5 + $0x1c0] sm:$0xff]   ;;  %vm3528_vm3 = vmneg %vm602_vm0 }
  0x13   : > { %s4233_s16 = smov (!%p2393_p8, %s4231_s16), 15  ;;  %s3427_s18 = sadd.s32 %s3421_s13, %s2388_s19  ;;  %v3200_v4 = vld [vmem:[%s4207_s5 + $0xc0] sm:$0xff]   ;;  %vm3541_vm5 = vmpackc.low %vm3286_vm4, %vm3528_vm3 }
  0x14   : > { %2690 = vmatpush3.bf16.msra.mxu0 %v3182_v8  ;;  %2930 = vmatpush3.bf16.msra.mxu1 %v3181_v7  ;;  %s2398_s22 = sshll.u32 %s4233_s16, 1  ;;  %s2390_s12 = sshll.u32 %s3427_s18, 3 }
  0x15   : > { %2691 = vmatprep.subr.bf16.mxu0 %v3183_v9  ;;  %2931 = vmatprep.subr.bf16.mxu1 %v3184_v10  ;;  %s452_s26 = sadd.s32 %s2398_s22, %s3421_s13  ;;  %s460_s16 = sadd.s32 8, %s3370_s14 }
  0x16   : > { %s2400_s15 = sshll.u32 %s452_s26, 3  ;;  %s3452_s11 = scalar_lea.vmem %s4202_s0, %s2390_s12 }
  0x17   : > { %p3454_p9 = scmp.lt.s32.totalorder %s460_s16, 15  ;;  %s454_s20 = scalar_lea.vmem %s4203_s1, %s2400_s15  ;;  %v498_v28 = vld [vmem:[%s3452_s11] sm:$0xff]  ;;  %v499_v30 = vld [vmem:[%s3452_s11 + $0x8] sm:$0xff]  ;;  %v500_v50 = vld [vmem:[%s3452_s11 + $0x10] sm:$0xff] }
  0x18   : > { %2692 = vmatpush3.bf16.msra.mxu0 %v3185_v11  ;;  %2932 = vmatpush3.bf16.msra.mxu1 %v3184_v10  ;;  %v558_v24 = vld [vmem:[%s454_s20] sm:$0xff]  ;;  %v559_v26 = vld [vmem:[%s454_s20 + $0x8] sm:$0xff]  ;;  %s565_s24 = scalar_select %p564_p10, 1, 0  ;;  %v520_v31 = vmul.f32 %v3476_v22, %v498_v28  ;;  %v521_v34 = vmul.f32 %v3476_v22, %v499_v30  ;;  %v501_v62 = vld [vmem:[%s3452_s11 + $0x18] sm:$0xff]  ;;  %v522_v63 = vmul.f32 %v3476_v22, %v500_v50 }
  0x19   : > { %2693 = vmatprep.subr.bf16.mxu0 %v3186_v12  ;;  %2933 = vmatprep.subr.bf16.mxu1 %v3187_v13  ;;  %s4235_s16 = smov (!%p3454_p9, %s460_s16), 15  ;;  %v560_v27 = vmul.f32 %v3476_v22, %v558_v24  ;;  %v561_v29 = vmul.f32 %v3476_v22, %v559_v26  ;;  %v502_v9 = vld [vmem:[%s3452_s11 + $0x20] sm:$0xff]  ;;  %v503_v10 = vld [vmem:[%s3452_s11 + $0x28] sm:$0xff]  ;;  %s2412_s19 = sshll.u32 %s4229_s28, 1 }
  0x1a   : > { %s4237_s16 = smov (!%p3454_p9, %s4235_s16), 15  ;;  %s566_s20 = scvt.s32.f32 %s565_s24  ;;  %v542_v36 = vadd.f32 %v3481_v23, %v520_v31  ;;  %v543_v39 = vadd.f32 %v3481_v23, %v521_v34  ;;  %v3203_v26 = vld [vmem:[%s4207_s5 + $0xc8] sm:$0xff]   ;;  %v524_v31 = vmul.f32 %v3476_v22, %v502_v9  ;;  %v504_v34 = vld [vmem:[%s3452_s11 + $0x30] sm:$0xff] }
  0x1b   : > { %s3495_s23 = sshll.u32 %s4237_s16, 1  ;;  %v562_v33 = vadd.f32 %v3481_v23, %v560_v27  ;;  %v563_v35 = vadd.f32 %v3481_v23, %v561_v29 }
  0x1c   : > { %2694 = vmatpush3.bf16.msra.mxu0 %v3188_v14  ;;  %2934 = vmatpush3.bf16.msra.mxu1 %v3187_v13  ;;  %s469_s14 = sadd.s32 %s3495_s23, %s3421_s13  ;;  %v567_v38 = vstv %s566_s20  ;;  %v606_v43 = vrot.slane %v542_v36, 7  ;;  %v607_v44 = vrot.slane %v543_v39, 7  ;;  %v523_v14 = vmul.f32 %v3476_v22, %v501_v62  ;;  %v506_v36 = vld [vmem:[%s3452_s11 + $0x40] sm:$0xff] }
  0x1d   : > { %2695 = vmatprep.subr.bf16.mxu0 %v3189_v15  ;;  %2935 = vmatprep.subr.bf16.mxu1 %v3190_v16  ;;  %v568_v41 = vmul.f32 %v567_v38, %v562_v33  ;;  %v569_v42 = vmul.f32 %v567_v38, %v563_v35  ;;  %v544_v15 = vadd.f32 %v3481_v23, %v522_v63  ;;  %v3204_v33 = vld [vmem:[%s4207_s5 + $0x110] sm:$0xff]   ;;  %v505_v35 = vld [vmem:[%s3452_s11 + $0x38] sm:$0xff]  ;;  %s3637_s25 = scalar_select %p489_p11, %s3268_s27, 1 }
  0x1e   : > { %v664_v47 = vsel %vm602_vm0, 0.0, %v606_v43  ;;  %v608_v48 = vsel %vm602_vm0, %v606_v43, %v607_v44  ;;  %v674_v49 = vsel %vm602_vm0, %v607_v44, 0.0  ;;  %v545_v27 = vadd.f32 %v3481_v23, %v523_v14  ;;  %s3850_s15 = scalar_select %p489_p11, 1, 0 }
  0x1f   : > { %v3513_v45 = vrot.slane %v568_v41, 7  ;;  %v604_v46 = vrot.slane %v569_v42, 7  ;;  %v685_v54 = vpack.c.bf16 %v608_v48, %v664_v47  ;;  %v686_v57 = vpack.c.bf16 %v674_v49, %v674_v49  ;;  %v507_v42 = vld [vmem:[%s3452_s11 + $0x48] sm:$0xff]  ;;  %s3678_s24 = sadd.s32 %s2412_s19, %s3637_s25  ;;  %s2407_s19 = sshll.u32 %s469_s14, 3 }
  0x20   : > { %2696 = vmatpush3.bf16.msra.mxu0 %v3191_v17  ;;  %2936 = vmatpush3.bf16.msra.mxu1 %v3190_v16  ;;  %v609_v28 = vrot.slane %v544_v15, 7  ;;  %v3567_v30 = vpack.c.bf16 %v608_v48, %v606_v43  ;;  %v610_v38 = vrot.slane %v545_v27, 7  ;;  %v526_v41 = vmul.f32 %v3476_v22, %v504_v34  ;;  %s471_s14 = scalar_lea.vmem %s4204_s2, %s2407_s19  ;;  %s578_s17 = scvt.s32.f32 %s3850_s15 }
  0x21   : > { %2697 = vmatprep.subr.bf16.mxu0 %v3192_v18  ;;  %2937 = vmatprep.subr.bf16.mxu1 %v3193_v19  ;;  %v3521_v51 = vsel %vm602_vm0, %v3513_v45, %v604_v46  ;;  %v663_v52 = vsel %vm602_vm0, 0.0, %v3513_v45  ;;  %v673_v53 = vsel %vm602_vm0, %v604_v46, 0.0  ;;  %v858_v59 = vrot.slane %v685_v54, 1  ;;  %v3201_v18 = vld [vmem:[%s4207_s5 + $0x180] sm:$0xff]   ;;  %s2413_s18 = sshll.u32 %s3678_s24, 3 }
  0x22   : > { %v683_v55 = vpack.c.bf16 %v3521_v51, %v663_v52  ;;  %v684_v56 = vpack.c.bf16 %v673_v53, %v673_v53  ;;  %v717_v60 = vshrl.u32 %v685_v54, 16  ;;  %v719_v61 = vshll.u32 %v685_v54, 16  ;;  %v3206_v54 = vld [vmem:[%s4207_s5 + $0xd0] sm:$0xff]   ;;  %s494_s21 = scalar_lea.vmem %s4210_s8, %s2413_s18 }
  0x23   : > { %v859_v6 = vrot.slane %v686_v57, 1  ;;  %v724_v8 = vshll.u32 %v686_v57, 16  ;;  %v665_v39 = vsel %vm602_vm0, 0.0, %v609_v28  ;;  %v546_v43 = vadd.f32 %v3481_v23, %v524_v31 }
  0x24   : > { %2698 = vmatpush3.bf16.msra.mxu0 %v3194_v20  ;;  %2938 = vmatpush3.bf16.msra.mxu1 %v3193_v19  ;;  %v705_v0 = vshrl.u32 %v683_v55, 16  ;;  %v707_v1 = vshll.u32 %v683_v55, 16  ;;  %v712_v2 = vshll.u32 %v684_v56, 16  ;;  %v855_v3 = vrot.slane %v683_v55, 1  ;;  %v3202_v19 = vld [vmem:[%s4207_s5 + $0x108] sm:$0xff]  }
  0x25   : > { %2699 = vmatprep.subr.bf16.mxu0 %v3195_v21  ;;  %2939 = vmatprep.subr.bf16.mxu1 %v3196_v25  ;;  %v856_v5 = vrot.slane %v684_v56, 1  ;;  %v721_v7 = vrot.slane %v719_v61, 1  ;;  %v3549_v17 = vsel %vm854_vm1, %v858_v59, %v859_v6  ;;  %v726_v21 = vrot.slane %v724_v8, 1  ;;  %v3207_v55 = vld [vmem:[%s4207_s5 + $0x188] sm:$0xff]   ;;  %v3208_v56 = vld [vmem:[%s4207_s5 + $0x118] sm:$0xff]  }
  0x26   : > { %v709_v11 = vrot.slane %v707_v1, 1  ;;  %v714_v12 = vrot.slane %v712_v2, 1  ;;  %v611_v46 = vsel %vm602_vm0, %v609_v28, %v610_v38  ;;  %v675_v47 = vsel %vm602_vm0, %v610_v38, 0.0  ;;  %v3211_v1 = vld [vmem:[%s4207_s5 + $0x1d0] sm:$0xff]   ;;  %v3209_v8 = vld [vmem:[%s4207_s5 + $0xd8] sm:$0xff]  }
  0x27   : > { %v857_v16 = vsel %vm854_vm1, %v855_v3, %v856_v5  ;;  %v722_v20 = vor.u32 %v721_v7, %v717_v60  ;;  %v548_v48 = vadd.f32 %v3481_v23, %v526_v41  ;;  %v528_v49 = vmul.f32 %v3476_v22, %v506_v36  ;;  %v509_v38 = vld [vmem:[%s3452_s11 + $0x58] sm:$0xff] }
  0x28   : > { %2700 = vmatpush3.bf16.msra.mxu0 %v3197_v32  ;;  %2940 = vmatpush3.bf16.msra.mxu1 %v3196_v25  ;;  %v710_v24 = vor.u32 %v709_v11, %v705_v0  ;;  %v2443_v25 = vpack.c.bf16 %v3521_v51, %v3513_v45  ;;  %v525_v32 = vmul.f32 %v3476_v22, %v503_v10  ;;  %v3595_v52 = vrot.slane %v546_v43, 7  ;;  %v3213_v11 = vld [vmem:[%s4207_s5 + $0x190] sm:$0xff]   ;;  %v3214_v43 = vld [vmem:[%s4207_s5 + $0x128] sm:$0xff]  }
  0x29   : > { %2765 = vmatprep.subr.bf16.mxu1 %v3198_v37  ;;  %2845 = vmatprep.subr.bf16.mxu0 %v3199_v40  ;;  %v3565_v29 = vsel %vm703_vm2, %v722_v20, %v726_v21  ;;  %v3205_v40 = vld [vmem:[%s4207_s5 + $0x1c8] sm:$0xff]   ;;  %v527_v45 = vmul.f32 %v3476_v22, %v505_v35  ;;  %v687_v50 = vpack.c.bf16 %v611_v46, %v665_v39  ;;  %v3607_v58 = vrot.slane %v548_v48, 7  ;;  %v3212_v35 = vld [vmem:[%s4207_s5 + $0xe0] sm:$0xff]  }
  0x2a   : > { %2941 = vmatprep.mubr.bf16.mxu1 %v857_v16  ;;  %v715_v37 = vsel %vm703_vm2, %v710_v24, %v714_v12  ;;  %v547_v44 = vadd.f32 %v3481_v23, %v525_v32  ;;  %v688_v51 = vpack.c.bf16 %v675_v47, %v675_v47  ;;  %v3609_v59 = vpack.c.bf16 %v611_v46, %v609_v28  ;;  %v3217_v32 = vld [vmem:[%s4207_s5 + $0x1d8] sm:$0xff]  }
  0x2b   : > { %2942 = vmatmul.mubr.bf16.vlgmr.msra.gmra.mrb[0].mxu1 %v3549_v17  ;;  %1126 = vmatprep.mubr.bf16.mxu0 %v715_v37  ;;  %v549_v57 = vadd.f32 %v3481_v23, %v527_v45  ;;  %v529_v60 = vmul.f32 %v3476_v22, %v507_v42  ;;  %v861_v61 = vrot.slane %v687_v50, 1  ;;  %v666_v0 = vsel %vm602_vm0, 0.0, %v3595_v52 }
  0x2c   : > { %2766 = vmatpush3.bf16.msra.mxu1 %v3200_v4  ;;  %2444 = vmatmul.mubr.msk.bf16.vlgmr.msra.gmra.mrb[0].mxu0 %vm3541_vm5, %v2443_v25  ;;  %v613_v53 = vrot.slane %v547_v44, 7  ;;  %v862_v62 = vrot.slane %v688_v51, 1  ;;  %v729_v4 = vshrl.u32 %v687_v50, 16  ;;  %v731_v5 = vshll.u32 %v687_v50, 16  ;;  %v508_v25 = vld [vmem:[%s3452_s11 + $0x50] sm:$0xff]  ;;  %v3219_v44 = vld [vmem:[%s4207_s5 + $0x198] sm:$0xff]  }
  0x2d   : > { %2767 = vmatprep.subr.bf16.mxu1 %v3202_v19  ;;  %2846 = vmatpush3.bf16.msra.mxu0 %v3201_v18  ;;  %v736_v9 = vshll.u32 %v688_v51, 16  ;;  %v616_v10 = vrot.slane %v549_v57, 7  ;;  %v667_v15 = vsel %vm602_vm0, 0.0, %v3607_v58  ;;  %v550_v16 = vadd.f32 %v3481_v23, %v528_v49  ;;  %v3210_v18 = vld [vmem:[%s4207_s5 + $0x120] sm:$0xff]  }
  0x2e   : > { %1134 = vmatprep.mubr.bf16.mxu0 %v3565_v29  ;;  %2847 = vmatprep.subr.bf16.mxu0 %v3205_v40  ;;  %v3614_v63 = vsel %vm602_vm0, %v3595_v52, %v613_v53  ;;  %v676_v2 = vsel %vm602_vm0, %v613_v53, 0.0  ;;  %v3626_v6 = vsel %vm854_vm1, %v861_v61, %v862_v62  ;;  %v733_v14 = vrot.slane %v731_v5, 1  ;;  %v510_v49 = vld [vmem:[%s3452_s11 + $0x60] sm:$0xff] }
  0x2f   : > { %v3623_v3 = vpack.c.bf16 %v3614_v63, %v666_v0  ;;  %v690_v7 = vpack.c.bf16 %v676_v2, %v676_v2  ;;  %2945 = vmatprep.mubr.bf16.mxu1 %v3626_v6  ;;  %v738_v20 = vrot.slane %v736_v9, 1  ;;  %v3649_v21 = vsel %vm602_vm0, %v3607_v58, %v616_v10  ;;  %v3222_v0 = vld [vmem:[%s4207_s5 + $0x1e0] sm:$0xff]  }
  0x30   : > { %2768 = vmatpush3.bf16.msra.mxu1 %v3203_v26  ;;  %v677_v24 = vsel %vm602_vm0, %v616_v10, 0.0  ;;  %v734_v26 = vor.u32 %v733_v14, %v729_v4  ;;  %v3657_v27 = vpack.c.bf16 %v3649_v21, %v667_v15  ;;  %v551_v31 = vadd.f32 %v3481_v23, %v529_v60  ;;  %v3215_v60 = vld [vmem:[%s4207_s5 + $0xe8] sm:$0xff]   ;;  %v3216_v4 = vld [vmem:[%s4207_s5 + $0x130] sm:$0xff]   ;;  %v3223_v15 = vld [vmem:[%s4207_s5 + $0x1a0] sm:$0xff]  }
  0x31   : > { %2769 = vmatprep.subr.bf16.mxu1 %v3204_v33  ;;  %2848 = vmatpush3.bf16.msra.mxu0 %v3207_v55  ;;  %v864_v12 = vrot.slane %v3623_v3, 1  ;;  %v865_v19 = vrot.slane %v690_v7, 1  ;;  %v3659_v28 = vpack.c.bf16 %v677_v24, %v677_v24  ;;  %v3669_v34 = vrot.slane %v550_v16, 7  ;;  %v511_v55 = vld [vmem:[%s3452_s11 + $0x68] sm:$0xff] }
  0x32   : > { %2849 = vmatprep.subr.bf16.mxu0 %v3211_v1  ;;  %v741_v36 = vshrl.u32 %v3623_v3, 16  ;;  %v743_v37 = vshll.u32 %v3623_v3, 16  ;;  %v3682_v39 = vsel %vm703_vm2, %v734_v26, %v738_v20  ;;  %v867_v40 = vrot.slane %v3657_v27, 1 }
  0x33   : > { %v3667_v33 = vsel %vm854_vm1, %v864_v12, %v865_v19  ;;  %v868_v41 = vrot.slane %v3659_v28, 1  ;;  %v619_v42 = vrot.slane %v551_v31, 7  ;;  %v668_v45 = vsel %vm602_vm0, 0.0, %v3669_v34  ;;  %v3218_v19 = vld [vmem:[%s4207_s5 + $0xf0] sm:$0xff]  }
  0x34   : > { %2770 = vmatpush3.bf16.msra.mxu1 %v3206_v54  ;;  %2448 = vmatmul.mubr.msk.bf16.gmra.mrb[4].mxu0 %vm3541_vm5, %v3567_v30  ;;  %v745_v46 = vrot.slane %v743_v37, 1  ;;  %v748_v47 = vshll.u32 %v690_v7, 16  ;;  %v530_v48 = vmul.f32 %v3476_v22, %v508_v25  ;;  %v531_v54 = vmul.f32 %v3476_v22, %v509_v38  ;;  %v3224_v25 = vld [vmem:[%s4207_s5 + $0x1e8] sm:$0xff]  }
  0x35   : > { %2771 = vmatprep.subr.bf16.mxu1 %v3208_v56  ;;  %2850 = vmatpush3.bf16.msra.mxu0 %v3213_v11  ;;  %v3698_v50 = vsel %vm854_vm1, %v867_v40, %v868_v41  ;;  %v3702_v51 = vsel %vm602_vm0, %v3669_v34, %v619_v42  ;;  %v678_v53 = vsel %vm602_vm0, %v619_v42, 0.0  ;;  %v532_v3 = vmul.f32 %v3476_v22, %v510_v49 }
  0x36   : > { %2946 = vmatmul.mubr.bf16.gmra.mrb[4].mxu1 %v3667_v33  ;;  %2851 = vmatprep.subr.bf16.mxu0 %v3217_v32  ;;  %v3709_v56 = vpack.c.bf16 %v3702_v51, %v668_v45  ;;  %v3711_v57 = vpack.c.bf16 %v678_v53, %v678_v53  ;;  %v746_v61 = vor.u32 %v745_v46, %v741_v36  ;;  %v750_v62 = vrot.slane %v748_v47, 1 }
  0x37   : > { %1142 = vmatprep.mubr.bf16.mxu0 %v3682_v39  ;;  %2949 = vmatprep.mubr.bf16.mxu1 %v3698_v50  ;;  %v552_v1 = vadd.f32 %v3481_v23, %v530_v48  ;;  %v553_v2 = vadd.f32 %v3481_v23, %v531_v54  ;;  %v533_v9 = vmul.f32 %v3476_v22, %v511_v55  ;;  %v753_v14 = vshrl.u32 %v3657_v27, 16  ;;  %v3228_v55 = vld [vmem:[%s4207_s5 + $0x1b0] sm:$0xff]  }
  0x38   : > { %2772 = vmatpush3.bf16.msra.mxu1 %v3209_v8  ;;  %v870_v5 = vrot.slane %v3709_v56, 1  ;;  %v871_v7 = vrot.slane %v3711_v57, 1  ;;  %v3728_v8 = vsel %vm703_vm2, %v746_v61, %v750_v62  ;;  %v554_v12 = vadd.f32 %v3481_v23, %v532_v3  ;;  %v3221_v61 = vld [vmem:[%s4207_s5 + $0xf8] sm:$0xff]  }
  0x39   : > { %2773 = vmatprep.subr.bf16.mxu1 %v3210_v18  ;;  %2852 = vmatpush3.bf16.msra.mxu0 %v3219_v44  ;;  %v3734_v10 = vrot.slane %v552_v1, 7  ;;  %v622_v11 = vrot.slane %v553_v2, 7  ;;  %v555_v18 = vadd.f32 %v3481_v23, %v533_v9  ;;  %v755_v20 = vshll.u32 %v3657_v27, 16  ;;  %v3225_v27 = vld [vmem:[%s4207_s5 + $0x1a8] sm:$0xff]   ;;  %v3227_v44 = vld [vmem:[%s4207_s5 + $0x1f0] sm:$0xff]   ;;  %v3230_v3 = vld [vmem:[%s4207_s5 + $0x1f8] sm:$0xff]  }
  0x3a   : > { %2853 = vmatprep.subr.bf16.mxu0 %v3222_v0  ;;  %v3742_v16 = vsel %vm854_vm1, %v870_v5, %v871_v7  ;;  %v760_v24 = vshll.u32 %v3659_v28, 16  ;;  %v3770_v40 = vpack.c.bf16 %v3614_v63, %v3595_v52  ;;  %v3220_v63 = vld [vmem:[%s4207_s5 + $0x138] sm:$0xff]   ;;  %v767_v54 = vshll.u32 %v3709_v56, 16 }
  0x3b   : > { %v3757_v26 = vsel %vm602_vm0, %v3734_v10, %v622_v11  ;;  %v669_v31 = vsel %vm602_vm0, 0.0, %v3734_v10  ;;  %v679_v32 = vsel %vm602_vm0, %v622_v11, 0.0  ;;  %v625_v37 = vrot.slane %v555_v18, 7  ;;  %v3231_v11 = vld [vmem:[%s4207_s5 + $0x1b8] sm:$0xff]  }
  0x3c   : > { %2774 = vmatpush3.bf16.msra.mxu1 %v3212_v35  ;;  %2452 = vmatmul.mubr.msk.bf16.gmra.mrb[8].mxu0 %vm3541_vm5, %v3609_v59  ;;  %v3762_v35 = vrot.slane %v554_v12, 7  ;;  %v695_v28 = vpack.c.bf16 %v3757_v26, %v669_v31  ;;  %v696_v36 = vpack.c.bf16 %v679_v32, %v679_v32  ;;  %v757_v38 = vrot.slane %v755_v20, 1  ;;  %v513_v31 = vld [vmem:[%s3452_s11 + $0x78] sm:$0xff] }
  0x3d   : > { %2775 = vmatprep.subr.bf16.mxu1 %v3214_v43  ;;  %1150 = vmatprep.mubr.bf16.mxu0 %v3728_v8  ;;  %v762_v42 = vrot.slane %v760_v24, 1  ;;  %v765_v43 = vshrl.u32 %v3709_v56, 16  ;;  %v680_v52 = vsel %vm602_vm0, %v625_v37, 0.0  ;;  %v772_v62 = vshll.u32 %v3711_v57, 16 }
  0x3e   : > { %2950 = vmatmul.mubr.bf16.gmra.mrb[8].mxu1 %v3742_v16  ;;  %2854 = vmatpush3.bf16.msra.mxu0 %v3223_v15  ;;  %v670_v41 = vsel %vm602_vm0, 0.0, %v3762_v35  ;;  %v873_v45 = vrot.slane %v695_v28, 1  ;;  %v874_v46 = vrot.slane %v696_v36, 1  ;;  %v3780_v47 = vsel %vm602_vm0, %v3762_v35, %v625_v37  ;;  %v3833_v15 = vld [vmem:[%s4207_s5 + $0x200] sm:$0xff]  }
  0x3f   : > { %2855 = vmatprep.subr.bf16.mxu0 %v3224_v25  ;;  %v3787_v48 = vpack.c.bf16 %v3780_v47, %v670_v41  ;;  %v3789_v49 = vpack.c.bf16 %v680_v52, %v680_v52  ;;  %v758_v53 = vor.u32 %v757_v38, %v753_v14  ;;  %v769_v2 = vrot.slane %v767_v54, 1  ;;  %v512_v25 = vld [vmem:[%s3452_s11 + $0x70] sm:$0xff] }
  0x40   : > { %2776 = vmatpush3.bf16.msra.mxu1 %v3215_v60  ;;  %v3796_v60 = vsel %vm854_vm1, %v873_v45, %v874_v46  ;;  %v779_v57 = vshll.u32 %v695_v28, 16  ;;  %v774_v9 = vrot.slane %v772_v62, 1  ;;  %v3828_v12 = vpack.c.bf16 %v3649_v21, %v3607_v58  ;;  %v3229_v21 = vld [vmem:[%s4207_s5 + $0x148] sm:$0xff]   ;;  %v3232_v38 = vld [vmem:[%s4207_s5 + $0x150] sm:$0xff]   ;;  %v3234_v46 = vld [vmem:[%s4207_s5 + $0x158] sm:$0xff]  }
  0x41   : > { %2777 = vmatprep.subr.bf16.mxu1 %v3216_v4  ;;  %2953 = vmatprep.mubr.bf16.mxu1 %v3796_v60  ;;  %v876_v56 = vrot.slane %v3787_v48, 1  ;;  %v877_v0 = vrot.slane %v3789_v49, 1  ;;  %v3809_v1 = vsel %vm703_vm2, %v758_v53, %v762_v42  ;;  %v3226_v4 = vld [vmem:[%s4207_s5 + $0x140] sm:$0xff]   ;;  %v770_v7 = vor.u32 %v769_v2, %v765_v43 }
  0x42   : > { %2856 = vmatpush3.bf16.msra.mxu0 %v3225_v27  ;;  %v777_v14 = vshrl.u32 %v695_v28, 16  ;;  %v781_v18 = vrot.slane %v779_v57, 1  ;;  %v791_v58 = vshll.u32 %v3787_v48, 16  ;;  %v534_v32 = vmul.f32 %v3476_v22, %v512_v25  ;;  %v3236_v57 = vld [vmem:[%s4207_s5 + $0x160] sm:$0xff]  }
  0x43   : > { %2857 = vmatprep.subr.bf16.mxu0 %v3227_v44  ;;  %v3819_v5 = vsel %vm854_vm1, %v876_v56, %v877_v0  ;;  %v3863_v27 = vpack.c.bf16 %v3702_v51, %v3669_v34  ;;  %v789_v28 = vshrl.u32 %v3787_v48, 16  ;;  %v535_v37 = vmul.f32 %v3476_v22, %v513_v31  ;;  %v571_v48 = vld [vmem:[%s471_s14 + $0x8] sm:$0xff] }
  0x44   : > { %2778 = vmatpush3.bf16.msra.mxu1 %v3218_v19  ;;  %2456 = vmatmul.mubr.msk.bf16.gmra.mrb[12].mxu0 %vm3541_vm5, %v3770_v40  ;;  %v784_v19 = vshll.u32 %v696_v36, 16  ;;  %v782_v20 = vor.u32 %v781_v18, %v777_v14  ;;  %v796_v36 = vshll.u32 %v3789_v49, 16  ;;  %v556_v41 = vadd.f32 %v3481_v23, %v534_v32 }
  0x45   : > { %2779 = vmatprep.subr.bf16.mxu1 %v3220_v63  ;;  %1158 = vmatprep.mubr.bf16.mxu0 %v3809_v1  ;;  %v557_v34 = vadd.f32 %v3481_v23, %v535_v37  ;;  %v570_v63 = vld [vmem:[%s471_s14] sm:$0xff]  ;;  %v579_v0 = vstv %s578_s17  ;;  %v3900_v2 = vpack.c.bf16 %v3757_v26, %v3734_v10  ;;  %s4155_s14 = scalar_lea.vmem %s4209_s7, %s2390_s12 }
  0x46   : > { %2858 = vmatpush3.bf16.msra.mxu0 %v3228_v55  ;;  %2954 = vmatmul.mubr.bf16.gmra.mrb[12].mxu1 %v3819_v5  ;;  %v786_v24 = vrot.slane %v784_v19, 1  ;;  %v627_v51 = vrot.slane %v556_v41, 7  ;;  %v798_v45 = vrot.slane %v796_v36, 1  ;;  %v572_v54 = vmul.f32 %v3476_v22, %v570_v63 }
  0x47   : > { %2859 = vmatprep.subr.bf16.mxu0 %v3230_v3  ;;  %1529 = vmatprep.mubr.bf16.mxu1 %v3565_v29  ;;  %v3836_v29 = vsel %vm703_vm2, %v770_v7, %v774_v9  ;;  %v628_v43 = vrot.slane %v557_v34, 7  ;;  %v573_v55 = vmul.f32 %v3476_v22, %v571_v48  ;;  %v3941_v41 = vpack.c.bf16 %v3780_v47, %v3762_v35  ;;  %v3239_v34 = vld [vmem:[%s4207_s5 + $0x170] sm:$0xff]   ;;  %v3241_v47 = vld [vmem:[%s4207_s5 + $0x178] sm:$0xff]  }
  0x48   : > { %2780 = vmatpush3.bf16.msra.mxu1 %v3221_v61  ;;  %v3873_v42 = vsel %vm703_vm2, %v782_v20, %v786_v24  ;;  %v671_v52 = vsel %vm602_vm0, 0.0, %v627_v51  ;;  %v574_v3 = vadd.f32 %v3481_v23, %v572_v54  ;;  %v3238_v24 = vld [vmem:[%s4207_s5 + $0x168] sm:$0xff]  }
  0x49   : > { %2957 = vmatprep.subr.bf16.mxu1 %v3226_v4  ;;  %v629_v49 = vsel %vm602_vm0, %v627_v51, %v628_v43  ;;  %v681_v53 = vsel %vm602_vm0, %v628_v43, 0.0  ;;  %v575_v22 = vadd.f32 %v3481_v23, %v573_v55 }
  0x4a   : > { %2860 = vmatpush3.bf16.msra.mxu0 %v3231_v11  ;;  %v699_v61 = vpack.c.bf16 %v629_v49, %v671_v52  ;;  %v700_v62 = vpack.c.bf16 %v681_v53, %v681_v53  ;;  %v3895_v56 = vpack.c.bf16 %v629_v49, %v627_v51  ;;  %v580_v18 = vmul.f32 %v579_v0, %v574_v3  ;;  %v3237_v53 = vld [vmem:[%s4207_s5 + $0x210] sm:$0xff]  }
  0x4b   : > { %2989 = vmatprep.subr.bf16.mxu0 %v3833_v15  ;;  %v581_v10 = vmul.f32 %v579_v0, %v575_v22 }
  0x4c   : > { %2460 = vmatmul.mubr.msk.bf16.gmra.mrb[16].mxu0 %vm3541_vm5, %v3828_v12  ;;  %v803_v7 = vshll.u32 %v699_v61, 16  ;;  %v808_v9 = vshll.u32 %v700_v62, 16  ;;  %v879_v11 = vrot.slane %v699_v61, 1  ;;  %v880_v26 = vrot.slane %v700_v62, 1 }
  0x4d   : > { %1166 = vmatprep.mubr.bf16.mxu0 %v3836_v29  ;;  %v3913_v23 = vrot.slane %v580_v18, 7 }
  0x4e   : > { %2548 = vmatmul.mubr.msk.bf16.vlgmr.msra.gmra.mrb[16].mxu1 %vm3541_vm5, %v3567_v30  ;;  %v793_v30 = vrot.slane %v791_v58, 1  ;;  %v805_v19 = vrot.slane %v803_v7, 1  ;;  %v810_v58 = vrot.slane %v808_v9, 1  ;;  %v3916_v20 = vsel %vm854_vm1, %v879_v11, %v880_v26 }
  0x4f   : > { %1537 = vmatprep.mubr.bf16.mxu1 %v3682_v39  ;;  %2958 = vmatpush3.bf16.msra.mxu1 %v3226_v4  ;;  %v801_v4 = vshrl.u32 %v699_v61, 16  ;;  %v672_v32 = vsel %vm602_vm0, 0.0, %v3913_v23 }
  0x50   : > { %2959 = vmatprep.subr.bf16.mxu1 %v3229_v21  ;;  %v794_v44 = vor.u32 %v793_v30, %v789_v28 }
  0x51   : > { %v806_v25 = vor.u32 %v805_v19, %v801_v4 }
  0x52   : > { %v3908_v14 = vsel %vm703_vm2, %v794_v44, %v798_v45 }
  0x53   : > { %2960 = vmatpush3.bf16.msra.mxu1 %v3229_v21  ;;  %v631_v21 = vrot.slane %v581_v10, 7  ;;  %v3933_v36 = vsel %vm703_vm2, %v806_v25, %v810_v58 }
  0x54   : > { %2464 = vmatmul.mubr.msk.bf16.gmra.mrb[20].mxu0 %vm3541_vm5, %v3863_v27  ;;  %2961 = vmatprep.subr.bf16.mxu1 %v3232_v38 }
  0x55   : > { %1174 = vmatprep.mubr.bf16.mxu0 %v3873_v42  ;;  %v3924_v31 = vsel %vm602_vm0, %v3913_v23, %v631_v21  ;;  %v682_v28 = vsel %vm602_vm0, %v631_v21, 0.0 }
  0x56   : > { %2552 = vmatmul.mubr.msk.bf16.gmra.mrb[20].mxu1 %vm3541_vm5, %v3609_v59  ;;  %v701_v37 = vpack.c.bf16 %v3924_v31, %v672_v32  ;;  %v702_v30 = vpack.c.bf16 %v682_v28, %v682_v28 }
  0x57   : > { %1545 = vmatprep.mubr.bf16.mxu1 %v3728_v8  ;;  %2962 = vmatpush3.bf16.msra.mxu1 %v3232_v38  ;;  %v2679_v38 = vpack.c.bf16 %v3924_v31, %v3913_v23 }
  0x58   : > { %2963 = vmatprep.subr.bf16.mxu1 %v3234_v46  ;;  %v813_v51 = vshrl.u32 %v701_v37, 16  ;;  %v815_v43 = vshll.u32 %v701_v37, 16  ;;  %v820_v44 = vshll.u32 %v702_v30, 16  ;;  %v882_v45 = vrot.slane %v701_v37, 1 }
  0x5a   : > { %v817_v52 = vrot.slane %v815_v43, 1  ;;  %v822_v63 = vrot.slane %v820_v44, 1 }
  0x5b   : > { %2964 = vmatpush3.bf16.msra.mxu1 %v3234_v46  ;;  %v883_v46 = vrot.slane %v702_v30, 1 }
  0x5c   : > { %2468 = vmatmul.mubr.msk.bf16.gmra.mrb[24].mxu0 %vm3541_vm5, %v3900_v2  ;;  %2965 = vmatprep.subr.bf16.mxu1 %v3236_v57  ;;  %v818_v48 = vor.u32 %v817_v52, %v813_v51 }
  0x5d   : > { %1182 = vmatprep.mubr.bf16.mxu0 %v3908_v14  ;;  %v3950_v35 = vsel %vm854_vm1, %v882_v45, %v883_v46 }
  0x5e   : > { %2556 = vmatmul.mubr.msk.bf16.gmra.mrb[24].mxu1 %vm3541_vm5, %v3770_v40  ;;  %v823_v49 = vsel %vm703_vm2, %v818_v48, %v822_v63 }
  0x5f   : > { %1553 = vmatprep.mubr.bf16.mxu1 %v3809_v1  ;;  %2966 = vmatpush3.bf16.msra.mxu1 %v3236_v57 }
  0x60   : > { %2967 = vmatprep.subr.bf16.mxu1 %v3238_v24 }
  0x63   : > { %2968 = vmatpush3.bf16.msra.mxu1 %v3238_v24 }
  0x64   : > { %2472 = vmatmul.mubr.msk.bf16.gmra.mrb[28].mxu0 %vm3541_vm5, %v3941_v41  ;;  %2969 = vmatprep.subr.bf16.mxu1 %v3239_v34 }
  0x65   : > { %1932 = vmatprep.mubr.bf16.mxu0 %v3682_v39  ;;  %v3235_v39 = vld [vmem:[%s4207_s5 + $0x208] sm:$0xff]  }
  0x66   : > { %2560 = vmatmul.mubr.msk.bf16.gmra.mrb[28].mxu1 %vm3541_vm5, %v3828_v12 }
  0x67   : > { %1561 = vmatprep.mubr.bf16.mxu1 %v3836_v29  ;;  %2970 = vmatpush3.bf16.msra.mxu1 %v3239_v34 }
  0x68   : > { %2971 = vmatprep.subr.bf16.mxu1 %v3241_v47 }
  0x6b   : > { %2972 = vmatpush3.bf16.msra.mxu1 %v3241_v47 }
  0x6c   : > { %2652 = vmatmul.mubr.msk.bf16.vlgmr.msra.gmra.mrb[32].mxu0 %vm3541_vm5, %v3609_v59  ;;  %3021 = vmatprep.subr.bf16.mxu1 %v3833_v15  ;;  %v3240_v59 = vld [vmem:[%s4207_s5 + $0x218] sm:$0xff]  }
  0x6d   : > { %2990 = vmatpush3.bf16.msra.mxu0 %v3833_v15  ;;  %1940 = vmatprep.mubr.bf16.mxu0 %v3728_v8  ;;  %v3242_v8 = vld [vmem:[%s4207_s5 + $0x220] sm:$0xff]  }
  0x6e   : > { %2991 = vmatprep.subr.bf16.mxu0 %v3235_v39  ;;  %2564 = vmatmul.mubr.msk.bf16.gmra.mrb[32].mxu1 %vm3541_vm5, %v3863_v27 }
  0x6f   : > { %1569 = vmatprep.mubr.bf16.mxu1 %v3873_v42 }
  0x71   : > { %2992 = vmatpush3.bf16.msra.mxu0 %v3235_v39 }
  0x72   : > { %2993 = vmatprep.subr.bf16.mxu0 %v3237_v53 }
  0x74   : > { %2656 = vmatmul.mubr.msk.bf16.gmra.mrb[36].mxu0 %vm3541_vm5, %v3770_v40  ;;  %v3243_v40 = vld [vmem:[%s4207_s5 + $0x228] sm:$0xff]  }
  0x75   : > { %1948 = vmatprep.mubr.bf16.mxu0 %v3809_v1  ;;  %2994 = vmatpush3.bf16.msra.mxu0 %v3237_v53  ;;  %v3244_v1 = vld [vmem:[%s4207_s5 + $0x230] sm:$0xff]  }
  0x76   : > { %2995 = vmatprep.subr.bf16.mxu0 %v3240_v59  ;;  %2568 = vmatmul.mubr.msk.bf16.gmra.mrb[36].mxu1 %vm3541_vm5, %v3900_v2 }
  0x77   : > { %1577 = vmatprep.mubr.bf16.mxu1 %v3908_v14 }
  0x79   : > { %2996 = vmatpush3.bf16.msra.mxu0 %v3240_v59 }
  0x7a   : > { %2997 = vmatprep.subr.bf16.mxu0 %v3242_v8 }
  0x7c   : > { %2660 = vmatmul.mubr.msk.bf16.gmra.mrb[40].mxu0 %vm3541_vm5, %v3828_v12  ;;  %v3245_v12 = vld [vmem:[%s4207_s5 + $0x238] sm:$0xff]  }
  0x7d   : > { %1956 = vmatprep.mubr.bf16.mxu0 %v3836_v29  ;;  %2998 = vmatpush3.bf16.msra.mxu0 %v3242_v8 }
  0x7e   : > { %2999 = vmatprep.subr.bf16.mxu0 %v3243_v40  ;;  %2572 = vmatmul.mubr.msk.bf16.gmra.mrb[40].mxu1 %vm3541_vm5, %v3941_v41 }
  0x7f   : > { %1585 = vmatprep.mubr.bf16.mxu1 %v3933_v36 }
  0x81   : > { %3000 = vmatpush3.bf16.msra.mxu0 %v3243_v40 }
  0x82   : > { %3001 = vmatprep.subr.bf16.mxu0 %v3244_v1 }
  0x84   : > { %2664 = vmatmul.mubr.msk.bf16.gmra.mrb[44].mxu0 %vm3541_vm5, %v3863_v27 }
  0x85   : > { %1964 = vmatprep.mubr.bf16.mxu0 %v3873_v42  ;;  %3002 = vmatpush3.bf16.msra.mxu0 %v3244_v1 }
  0x86   : > { %3003 = vmatprep.subr.bf16.mxu0 %v3245_v12  ;;  %2576 = vmatmul.mubr.msk.bf16.gmra.mrb[44].mxu1 %vm3541_vm5, %v3895_v56 }
  0x87   : > { %2973 = vmatprep.mubr.bf16.mxu1 %v3549_v17 }
  0x89   : > { %3004 = vmatpush3.bf16.msra.mxu0 %v3245_v12 }
  0x8c   : > { %2668 = vmatmul.mubr.msk.bf16.gmra.mrb[48].mxu0 %vm3541_vm5, %v3900_v2 }
  0x8d   : > { %1972 = vmatprep.mubr.bf16.mxu0 %v3908_v14  ;;  %v4051_v14 = vld [vmem:[%s4208_s6] ss:$0 sm:$0xff] }
  0x8e   : > { %2974 = vmatmul.mubr.bf16.vlgmr.msra.gmra.mrb[0].mxu1 %v3626_v6 }
  0x8f   : > { %3029 = vmatpush3.bf16.msra.mxu1 %v3833_v15  ;;  %2977 = vmatprep.mubr.bf16.mxu1 %v3667_v33 }
  0x90   : > { %3022 = vmatprep.subr.bf16.mxu1 %v3235_v39 }
  0x93   : > { %3030 = vmatpush3.bf16.msra.mxu1 %v3235_v39 }
  0x94   : > { %2672 = vmatmul.mubr.msk.bf16.gmra.mrb[52].mxu0 %vm3541_vm5, %v3941_v41  ;;  %3023 = vmatprep.subr.bf16.mxu1 %v3237_v53 }
  0x95   : > { %1980 = vmatprep.mubr.bf16.mxu0 %v3933_v36 }
  0x96   : > { %2978 = vmatmul.mubr.bf16.gmra.mrb[4].mxu1 %v3698_v50 }
  0x97   : > { %3031 = vmatpush3.bf16.msra.mxu1 %v3237_v53  ;;  %2981 = vmatprep.mubr.bf16.mxu1 %v3742_v16 }
  0x98   : > { %3024 = vmatprep.subr.bf16.mxu1 %v3240_v59 }
  0x9b   : > { %3032 = vmatpush3.bf16.msra.mxu1 %v3240_v59 }
  0x9c   : > { %2676 = vmatmul.mubr.msk.bf16.gmra.mrb[56].mxu0 %vm3541_vm5, %v3895_v56  ;;  %3025 = vmatprep.subr.bf16.mxu1 %v3242_v8 }
  0x9d   : > { %1988 = vmatprep.mubr.bf16.mxu0 %v823_v49 }
  0x9e   : > { %2982 = vmatmul.mubr.bf16.gmra.mrb[8].mxu1 %v3796_v60 }
  0x9f   : > { %3033 = vmatpush3.bf16.msra.mxu1 %v3242_v8  ;;  %2985 = vmatprep.mubr.bf16.mxu1 %v3819_v5 }
  0xa0   : > { %3026 = vmatprep.subr.bf16.mxu1 %v3243_v40 }
  0xa3   : > { %3034 = vmatpush3.bf16.msra.mxu1 %v3243_v40 }
  0xa4   : > { %2680 = vmatmul.mubr.msk.bf16.gmra.mrb[60].mxu0 %vm3541_vm5, %v2679_v38  ;;  %3027 = vmatprep.subr.bf16.mxu1 %v3244_v1 }
  0xa5   : > { %3005 = vmatprep.mubr.bf16.mxu0 %v3626_v6 }
  0xa6   : > { %2986 = vmatmul.mubr.bf16.gmra.mrb[12].mxu1 %v3916_v20 }
  0xa7   : > { %3035 = vmatpush3.bf16.msra.mxu1 %v3244_v1  ;;  %3013 = vmatprep.mubr.bf16.mxu1 %v3796_v60 }
  0xa8   : > { %3028 = vmatprep.subr.bf16.mxu1 %v3245_v12 }
  0xab   : > { %3036 = vmatpush3.bf16.msra.mxu1 %v3245_v12 }
  0xac   : > { %3006 = vmatmul.mubr.bf16.vlgmr.msra.gmra.mrb[64].mxu0 %v3667_v33 }
  0xad   : > { %3009 = vmatprep.mubr.bf16.mxu0 %v3698_v50 }
  0xae   : > { %3014 = vmatmul.mubr.bf16.vlgmr.msra.gmra.mrb[8].mxu1 %v3819_v5 }
  0xaf   : > { %3017 = vmatprep.mubr.bf16.mxu1 %v3916_v20 }
  0xb4   : > { %3010 = vmatmul.mubr.bf16.gmra.mrb[68].mxu0 %v3742_v16 }
  0xb6   : > { %3018 = vmatmul.mubr.bf16.gmra.mrb[12].mxu1 %v3950_v35 }
  0xff   : > { %v2701_v13 = vpop.f32.mrb[0].mxu0 }
 0x100   : > { %v2702_v17 = vpop.f32.mrb[1].mxu0 }
 0x101   : > { %v2703_v6 = vadd.f32 %v2702_v17, %v2701_v13  ;;  %v2704_v15 = vpop.f32.mrb[2].mxu0 }
 0x102   : > { %v2705_v29 = vpop.f32.mrb[3].mxu0 }
 0x103   : > { %v2706_v60 = vadd.f32 %v2705_v29, %v2704_v15  ;;  %v3042_v21 = vadd.f32 %v2703_v6, %v4051_v14 }
 0x105   : > { %v3052_v31 = vadd.f32 %v2706_v60, %v4051_v14 }
 0x107   : > { %v2707_v27 = vpop.f32.mrb[4].mxu0 }
 0x108   : > { %v2708_v42 = vpop.f32.mrb[5].mxu0 }
 0x109   : > { %v2709_v54 = vadd.f32 %v2708_v42, %v2707_v27  ;;  %v2710_v33 = vpop.f32.mrb[6].mxu0 }
 0x10a   : > { %v2711_v55 = vpop.f32.mrb[7].mxu0 }
 0x10b   : > { %v2712_v50 = vadd.f32 %v2711_v55, %v2710_v33  ;;  %v3037_v45 = vadd.f32 %v2709_v54, %v4051_v14 }
 0x10d   : > { %v3047_v35 = vadd.f32 %v2712_v50, %v4051_v14 }
 0x10f   : > { %v2713_v61 = vpop.f32.mrb[8].mxu0 }
 0x110   : > { %v2714_v5 = vpop.f32.mrb[9].mxu0 }
 0x111   : > { %v2715_v62 = vadd.f32 %v2714_v5, %v2713_v61  ;;  %v2716_v56 = vpop.f32.mrb[10].mxu0 }
 0x112   : > { %v2717_v0 = vpop.f32.mrb[11].mxu0 }
 0x113   : > { %v2718_v16 = vadd.f32 %v2717_v0, %v2716_v56  ;;  %v3062_v17 = vadd.f32 %v2715_v62, %v4051_v14 }
 0x115   : > { %v3072_v60 = vadd.f32 %v2718_v16, %v4051_v14 }
 0x117   : > { %v2719_v2 = vpop.f32.mrb[12].mxu0 }
 0x118   : > { %v2720_v3 = vpop.f32.mrb[13].mxu0 }
 0x119   : > { %v2721_v22 = vadd.f32 %v2720_v3, %v2719_v2  ;;  %v2722_v57 = vpop.f32.mrb[14].mxu0 }
 0x11a   : > { %v2723_v4 = vpop.f32.mrb[15].mxu0 }
 0x11b   : > { %v2724_v7 = vadd.f32 %v2723_v4, %v2722_v57  ;;  %v3057_v62 = vadd.f32 %v2721_v22, %v4051_v14 }
 0x11d   : > { %v3067_v4 = vadd.f32 %v2724_v7, %v4051_v14 }
 0x11f   : > { %v2725_v9 = vpop.f32.mrb[16].mxu0 }
 0x120   : > { %v2726_v11 = vpop.f32.mrb[17].mxu0 }
 0x121   : > { %v4053_v18 = vadd.f32 %v2726_v11, %v2725_v9  ;;  %v2728_v10 = vpop.f32.mrb[18].mxu0  ;;  %v2781_v26 = vpop.f32.mrb[16].mxu1 }
 0x122   : > { %v2729_v19 = vpop.f32.mrb[19].mxu0  ;;  %v2782_v58 = vpop.f32.mrb[17].mxu1 }
 0x123   : > { %v4055_v23 = vadd.f32 %v2729_v19, %v2728_v10  ;;  %v2783_v20 = vadd.f32 %v2782_v58, %v2781_v26  ;;  %v2784_v24 = vpop.f32.mrb[18].mxu1  ;;  %v3081_v22 = vadd.f32 %v4053_v18, %v4051_v14 }
 0x124   : > { %v2785_v25 = vpop.f32.mrb[19].mxu1 }
 0x125   : > { %v2786_v32 = vadd.f32 %v2785_v25, %v2784_v24  ;;  %v4059_v28 = vadd.f32 %v3042_v21, %v2783_v20 }
 0x127   : > { %v2731_v36 = vpop.f32.mrb[20].mxu0  ;;  %v4061_v30 = vadd.f32 %v3052_v31, %v2786_v32 }
 0x128   : > { %v2732_v37 = vpop.f32.mrb[21].mxu0 }
 0x129   : > { %v4063_v38 = vadd.f32 %v2732_v37, %v2731_v36  ;;  %v2734_v41 = vpop.f32.mrb[22].mxu0  ;;  %v2787_v34 = vpop.f32.mrb[20].mxu1  ;;  %v3089_v37 = vadd.f32 %v4055_v23, %v4051_v14 }
 0x12a   : > { %v2735_v51 = vpop.f32.mrb[23].mxu0  ;;  %v2788_v43 = vpop.f32.mrb[21].mxu1 }
 0x12b   : > { %v4065_v44 = vadd.f32 %v2735_v51, %v2734_v41  ;;  %v2789_v46 = vadd.f32 %v2788_v43, %v2787_v34  ;;  %v2790_v52 = vpop.f32.mrb[22].mxu1  ;;  %v3077_v18 = vadd.f32 %v4063_v38, %v4051_v14 }
 0x12c   : > { %v2791_v63 = vpop.f32.mrb[23].mxu1 }
 0x12d   : > { %v2792_v47 = vadd.f32 %v2791_v63, %v2790_v52  ;;  %v4069_v48 = vadd.f32 %v3037_v45, %v2789_v46  ;;  %v3085_v23 = vadd.f32 %v4065_v44, %v4051_v14 }
 0x12f   : > { %v2737_v49 = vpop.f32.mrb[24].mxu0  ;;  %v4071_v53 = vadd.f32 %v3047_v35, %v2792_v47 }
 0x130   : > { %v2738_v39 = vpop.f32.mrb[25].mxu0 }
 0x131   : > { %v4073_v59 = vadd.f32 %v2738_v39, %v2737_v49  ;;  %v2740_v8 = vpop.f32.mrb[26].mxu0  ;;  %v2793_v40 = vpop.f32.mrb[24].mxu1 }
 0x132   : > { %v2741_v1 = vpop.f32.mrb[27].mxu0  ;;  %v2794_v12 = vpop.f32.mrb[25].mxu1 }
 0x133   : > { %v4075_v13 = vadd.f32 %v2741_v1, %v2740_v8  ;;  %v2795_v6 = vadd.f32 %v2794_v12, %v2793_v40  ;;  %v2796_v15 = vpop.f32.mrb[26].mxu1 }
 0x134   : > { %v2797_v29 = vpop.f32.mrb[27].mxu1 }
 0x135   : > { %v2798_v27 = vadd.f32 %v2797_v29, %v2796_v15  ;;  %v4079_v42 = vadd.f32 %v3062_v17, %v2795_v6 }
 0x137   : > { %v2743_v54 = vpop.f32.mrb[28].mxu0  ;;  %v4081_v55 = vadd.f32 %v3072_v60, %v2798_v27 }
 0x138   : > { %v2744_v33 = vpop.f32.mrb[29].mxu0 }
 0x139   : > { %v4083_v50 = vadd.f32 %v2744_v33, %v2743_v54  ;;  %v2746_v61 = vpop.f32.mrb[30].mxu0  ;;  %v2799_v5 = vpop.f32.mrb[28].mxu1 }
 0x13a   : > { %v2747_v56 = vpop.f32.mrb[31].mxu0  ;;  %v2800_v0 = vpop.f32.mrb[29].mxu1 }
 0x13b   : > { %v4085_v2 = vadd.f32 %v2747_v56, %v2746_v61  ;;  %v2801_v3 = vadd.f32 %v2800_v0, %v2799_v5  ;;  %v2802_v57 = vpop.f32.mrb[30].mxu1  ;;  %v3097_v61 = vadd.f32 %v4073_v59, %v4051_v14  ;;  %v3105_v0 = vadd.f32 %v4075_v13, %v4051_v14 }
 0x13c   : > { %v2803_v16 = vpop.f32.mrb[31].mxu1  ;;  %v3093_v59 = vadd.f32 %v4083_v50, %v4051_v14 }
 0x13d   : > { %v2804_v9 = vadd.f32 %v2803_v16, %v2802_v57  ;;  %v4089_v11 = vadd.f32 %v3057_v62, %v2801_v3  ;;  %v3101_v13 = vadd.f32 %v4085_v2, %v4051_v14 }
 0x13f   : > { %v2861_v10 = vpop.f32.mrb[32].mxu0  ;;  %v4091_v19 = vadd.f32 %v3067_v4, %v2804_v9 }
 0x140   : > { %v2862_v26 = vpop.f32.mrb[33].mxu0 }
 0x141   : > { %v4093_v58 = vadd.f32 %v2862_v26, %v2861_v10  ;;  %v2864_v21 = vpop.f32.mrb[34].mxu0  ;;  %v2805_v20 = vpop.f32.mrb[32].mxu1 }
 0x142   : > { %v2865_v24 = vpop.f32.mrb[35].mxu0  ;;  %v2806_v25 = vpop.f32.mrb[33].mxu1 }
 0x143   : > { %v4095_v31 = vadd.f32 %v2865_v24, %v2864_v21  ;;  %v2807_v32 = vadd.f32 %v2806_v25, %v2805_v20  ;;  %v2808_v7 = vpop.f32.mrb[34].mxu1 }
 0x144   : > { %v2809_v36 = vpop.f32.mrb[35].mxu1 }
 0x145   : > { %v3082_v41 = vadd.f32 %v3081_v22, %v2807_v32  ;;  %v2810_v34 = vadd.f32 %v2809_v36, %v2808_v7 }
 0x147   : > { %v2867_v51 = vpop.f32.mrb[36].mxu0  ;;  %v4101_v43 = vadd.f32 %v3089_v37, %v2810_v34 }
 0x148   : > { %v2868_v45 = vpop.f32.mrb[37].mxu0 }
 0x149   : > { %v2869_v46 = vadd.f32 %v2868_v45, %v2867_v51  ;;  %v2870_v52 = vpop.f32.mrb[38].mxu0  ;;  %v2811_v63 = vpop.f32.mrb[36].mxu1 }
 0x14a   : > { %v2871_v35 = vpop.f32.mrb[39].mxu0  ;;  %v2812_v47 = vpop.f32.mrb[37].mxu1 }
 0x14b   : > { %v2872_v49 = vadd.f32 %v2871_v35, %v2870_v52  ;;  %v2813_v39 = vadd.f32 %v2812_v47, %v2811_v63  ;;  %v2814_v8 = vpop.f32.mrb[38].mxu1 }
 0x14c   : > { %v2815_v40 = vpop.f32.mrb[39].mxu1 }
 0x14d   : > { %v4107_v1 = vadd.f32 %v3077_v18, %v2813_v39  ;;  %v2816_v12 = vadd.f32 %v2815_v40, %v2814_v8 }
 0x14f   : > { %v2873_v17 = vpop.f32.mrb[40].mxu0  ;;  %v4109_v6 = vadd.f32 %v3085_v23, %v2816_v12 }
 0x150   : > { %v2874_v15 = vpop.f32.mrb[41].mxu0 }
 0x151   : > { %v4111_v29 = vadd.f32 %v2874_v15, %v2873_v17  ;;  %v2876_v60 = vpop.f32.mrb[42].mxu0  ;;  %v2817_v27 = vpop.f32.mrb[40].mxu1 }
 0x152   : > { %v2877_v54 = vpop.f32.mrb[43].mxu0  ;;  %v2818_v33 = vpop.f32.mrb[41].mxu1 }
 0x153   : > { %v4113_v38 = vadd.f32 %v2877_v54, %v2876_v60  ;;  %v2819_v5 = vadd.f32 %v2818_v33, %v2817_v27  ;;  %v2820_v44 = vpop.f32.mrb[42].mxu1 }
 0x154   : > { %v2821_v56 = vpop.f32.mrb[43].mxu1 }
 0x155   : > { %v4119_v62 = vadd.f32 %v3097_v61, %v2819_v5  ;;  %v2822_v3 = vadd.f32 %v2821_v56, %v2820_v44 }
 0x157   : > { %v2879_v57 = vpop.f32.mrb[44].mxu0  ;;  %v4121_v16 = vadd.f32 %v3105_v0, %v2822_v3 }
 0x158   : > { %v2880_v4 = vpop.f32.mrb[45].mxu0 }
 0x159   : > { %v2881_v9 = vadd.f32 %v2880_v4, %v2879_v57  ;;  %v2882_v10 = vpop.f32.mrb[46].mxu0  ;;  %v2823_v26 = vpop.f32.mrb[44].mxu1 }
 0x15a   : > { %v2883_v21 = vpop.f32.mrb[47].mxu0  ;;  %v2824_v20 = vpop.f32.mrb[45].mxu1 }
 0x15b   : > { %v2884_v24 = vadd.f32 %v2883_v21, %v2882_v10  ;;  %v2825_v25 = vadd.f32 %v2824_v20, %v2823_v26  ;;  %v2826_v22 = vpop.f32.mrb[46].mxu1 }
 0x15c   : > { %v2827_v32 = vpop.f32.mrb[47].mxu1 }
 0x15d   : > { %v3094_v7 = vadd.f32 %v3093_v59, %v2825_v25  ;;  %v2828_v36 = vadd.f32 %v2827_v32, %v2826_v22 }
 0x15f   : > { %v2885_v37 = vpop.f32.mrb[48].mxu0  ;;  %v3102_v34 = vadd.f32 %v3101_v13, %v2828_v36 }
 0x160   : > { %v2886_v51 = vpop.f32.mrb[49].mxu0 }
 0x161   : > { %v2887_v45 = vadd.f32 %v2886_v51, %v2885_v37  ;;  %v2888_v52 = vpop.f32.mrb[50].mxu0  ;;  %v2975_v63 = vpop.f32.mrb[0].mxu1 }
 0x162   : > { %v2889_v35 = vpop.f32.mrb[51].mxu0  ;;  %v3039_v47 = vadd.f32 %v4069_v48, %v2975_v63  ;;  %v1628_v18 = vpop.f32.mrb[1].mxu1 }
 0x163   : > { %v2890_v39 = vadd.f32 %v2889_v35, %v2888_v52  ;;  %v3083_v50 = vadd.f32 %v3082_v41, %v2887_v45  ;;  %v3044_v8 = vadd.f32 %v4059_v28, %v1628_v18  ;;  %v2976_v40 = vpop.f32.mrb[2].mxu1 }
 0x164   : > { %v3049_v23 = vadd.f32 %v4071_v53, %v2976_v40  ;;  %v1631_v14 = vpop.f32.mrb[3].mxu1  ;;  %v3040_v2 = vadd.f32 %v3039_v47, %v2869_v46 }
 0x165   : > { %v4131_v12 = vadd.f32 %v4101_v43, %v2890_v39  ;;  %v3054_v17 = vadd.f32 %v4061_v30, %v1631_v14  ;;  %v3045_v15 = vadd.f32 %v3044_v8, %v4093_v58 }
 0x166   : > { %v3050_v27 = vadd.f32 %v3049_v23, %v2872_v49 }
 0x167   : > { %v2891_v60 = vpop.f32.mrb[52].mxu0  ;;  %v3055_v54 = vadd.f32 %v3054_v17, %v4095_v31 }
 0x168   : > { %v2892_v48 = vpop.f32.mrb[53].mxu0 }
 0x169   : > { %v2893_v41 = vadd.f32 %v2892_v48, %v2891_v60  ;;  %v2894_v33 = vpop.f32.mrb[54].mxu0  ;;  %v2979_v28 = vpop.f32.mrb[4].mxu1 }
 0x16a   : > { %v2895_v61 = vpop.f32.mrb[55].mxu0  ;;  %v3059_v53 = vadd.f32 %v4089_v11, %v2979_v28  ;;  %v1644_v5 = vpop.f32.mrb[5].mxu1 }
 0x16b   : > { %v2896_v46 = vadd.f32 %v2895_v61, %v2894_v33  ;;  %v3079_v43 = vadd.f32 %v4107_v1, %v2893_v41  ;;  %v3064_v44 = vadd.f32 %v4079_v42, %v1644_v5  ;;  %v2980_v30 = vpop.f32.mrb[6].mxu1 }
 0x16c   : > { %v3069_v58 = vadd.f32 %v4091_v19, %v2980_v30  ;;  %v1647_v56 = vpop.f32.mrb[7].mxu1  ;;  %v3060_v0 = vadd.f32 %v3059_v53, %v2881_v9 }
 0x16d   : > { %v3087_v49 = vadd.f32 %v4109_v6, %v2896_v46  ;;  %v3074_v31 = vadd.f32 %v4081_v55, %v1647_v56  ;;  %v3065_v3 = vadd.f32 %v3064_v44, %v4111_v29 }
 0x16e   : > { %v3070_v4 = vadd.f32 %v3069_v58, %v2884_v24 }
 0x16f   : > { %v2897_v57 = vpop.f32.mrb[56].mxu0  ;;  %v4144_v10 = vadd.f32 %v3074_v31, %v4113_v38 }
 0x170   : > { %v2898_v11 = vpop.f32.mrb[57].mxu0 }
 0x171   : > { %v2899_v1 = vadd.f32 %v2898_v11, %v2897_v57  ;;  %v2900_v42 = vpop.f32.mrb[58].mxu0 }
 0x172   : > { %v2901_v26 = vpop.f32.mrb[59].mxu0 }
 0x173   : > { %v2902_v21 = vadd.f32 %v2901_v26, %v2900_v42  ;;  %v3099_v19 = vadd.f32 %v4119_v62, %v2899_v1 }
 0x175   : > { %v4148_v6 = vadd.f32 %v4121_v16, %v2902_v21 }
 0x177   : > { %v2903_v9 = vpop.f32.mrb[60].mxu0 }
 0x178   : > { %v2904_v55 = vpop.f32.mrb[61].mxu0 }
 0x179   : > { %v2905_v20 = vadd.f32 %v2904_v55, %v2903_v9  ;;  %v2906_v29 = vpop.f32.mrb[62].mxu0 }
 0x17a   : > { %v2907_v59 = vpop.f32.mrb[63].mxu0 }
 0x17b   : > { %v2908_v24 = vadd.f32 %v2907_v59, %v2906_v29  ;;  %v3095_v25 = vadd.f32 %v3094_v7, %v2905_v20 }
 0x17d   : > { %v3103_v22 = vadd.f32 %v3102_v34, %v2908_v24 }
 0x17f   : > { %v3007_v38 = vpop.f32.mrb[64].mxu0 }
 0x180   : > { %v3041_v62 = vadd.f32 %v3040_v2, %v3007_v38  ;;  %v2031_v16 = vpop.f32.mrb[65].mxu0 }
 0x181   : > { %v3046_v32 = vadd.f32 %v3045_v15, %v2031_v16  ;;  %v3008_v13 = vpop.f32.mrb[66].mxu0  ;;  %v3015_v36 = vpop.f32.mrb[8].mxu1 }
 0x182   : > { %2112 = vst [vmem:[%s4155_s14 + $0x10] sm:$0xff] %v3041_v62  ;;  %v3051_v7 = vadd.f32 %v3050_v27, %v3008_v13  ;;  %v2034_v37 = vpop.f32.mrb[67].mxu0  ;;  %v4158_v34 = vadd.f32 %v3079_v43, %v3015_v36  ;;  %v2063_v51 = vpop.f32.mrb[9].mxu1  ;;  %v2149_v23 = vmul.f32 %v3041_v62, %v3041_v62 }
 0x183   : > { %2110 = vst [vmem:[%s4155_s14] sm:$0xff] %v3046_v32  ;;  %v3056_v45 = vadd.f32 %v3055_v54, %v2034_v37  ;;  %v3084_v52 = vadd.f32 %v3083_v50, %v2063_v51  ;;  %v3016_v63 = vpop.f32.mrb[10].mxu1  ;;  %v2147_v35 = vmul.f32 %v3046_v32, %v3046_v32 }
 0x184   : > { %2113 = vst [vmem:[%s4155_s14 + $0x18] sm:$0xff] %v3051_v7  ;;  %2120 = vst [vmem:[%s4155_s14 + $0x50] sm:$0xff] %v4158_v34  ;;  %v3088_v47 = vadd.f32 %v3087_v49, %v3016_v63  ;;  %v2066_v8 = vpop.f32.mrb[11].mxu1  ;;  %v2150_v60 = vmul.f32 %v3051_v7, %v3051_v7  ;;  %v2157_v59 = vmul.f32 %v4158_v34, %v4158_v34 }
 0x185   : > { %2111 = vst [vmem:[%s4155_s14 + $0x8] sm:$0xff] %v3056_v45  ;;  %v2126_v18 = vadd.f32 %v3056_v45, %v3046_v32  ;;  %v2148_v39 = vmul.f32 %v3056_v45, %v3056_v45  ;;  %2118 = vst [vmem:[%s4155_s14 + $0x40] sm:$0xff] %v3084_v52  ;;  %v3092_v40 = vadd.f32 %v4131_v12, %v2066_v8 }
 0x186   : > { %2121 = vst [vmem:[%s4155_s14 + $0x58] sm:$0xff] %v3088_v47 }
 0x187   : > { %v2127_v14 = vadd.f32 %v3041_v62, %v2126_v18  ;;  %v2163_v50 = vadd.f32 %v2148_v39, %v2147_v35  ;;  %v3011_v2 = vpop.f32.mrb[68].mxu0  ;;  %2119 = vst [vmem:[%s4155_s14 + $0x48] sm:$0xff] %v3092_v40  ;;  %v2156_v55 = vmul.f32 %v3092_v40, %v3092_v40 }
 0x188   : > { %v3061_v17 = vadd.f32 %v3060_v0, %v3011_v2  ;;  %v2047_v15 = vpop.f32.mrb[69].mxu0 }
 0x189   : > { %v2164_v27 = vadd.f32 %v2163_v50, %v2149_v23  ;;  %v3066_v48 = vadd.f32 %v3065_v3, %v2047_v15  ;;  %v2128_v54 = vadd.f32 %v3051_v7, %v2127_v14  ;;  %v3012_v41 = vpop.f32.mrb[70].mxu0  ;;  %v3019_v33 = vpop.f32.mrb[12].mxu1 }
 0x18a   : > { %2116 = vst [vmem:[%s4155_s14 + $0x30] sm:$0xff] %v3061_v17  ;;  %v3071_v28 = vadd.f32 %v3070_v4, %v3012_v41  ;;  %v2050_v12 = vpop.f32.mrb[71].mxu0  ;;  %v3096_v61 = vadd.f32 %v3095_v25, %v3019_v33  ;;  %v2079_v43 = vpop.f32.mrb[13].mxu1  ;;  %v2153_v4 = vmul.f32 %v3061_v17, %v3061_v17  ;;  %v2158_v25 = vmul.f32 %v3088_v47, %v3088_v47 }
 0x18b   : > { %2114 = vst [vmem:[%s4155_s14 + $0x20] sm:$0xff] %v3066_v48  ;;  %v2129_v53 = vadd.f32 %v3066_v48, %v2128_v54  ;;  %v2151_v5 = vmul.f32 %v3066_v48, %v3066_v48  ;;  %v2165_v46 = vadd.f32 %v2164_v27, %v2150_v60  ;;  %v3100_v44 = vadd.f32 %v3099_v19, %v2079_v43  ;;  %v3020_v30 = vpop.f32.mrb[14].mxu1 }
 0x18c   : > { %2117 = vst [vmem:[%s4155_s14 + $0x38] sm:$0xff] %v3071_v28  ;;  %v3076_v58 = vadd.f32 %v4144_v10, %v2050_v12  ;;  %2124 = vst [vmem:[%s4155_s14 + $0x70] sm:$0xff] %v3096_v61  ;;  %v3104_v49 = vadd.f32 %v3103_v22, %v3020_v30  ;;  %v2082_v0 = vpop.f32.mrb[15].mxu1  ;;  %v2154_v42 = vmul.f32 %v3071_v28, %v3071_v28 }
 0x18d   : > { %v2166_v56 = vadd.f32 %v2165_v46, %v2151_v5  ;;  %2122 = vst [vmem:[%s4155_s14 + $0x60] sm:$0xff] %v3100_v44  ;;  %v3108_v57 = vadd.f32 %v4148_v6, %v2082_v0  ;;  %v2155_v19 = vmul.f32 %v3084_v52, %v3084_v52  ;;  %v2159_v62 = vmul.f32 %v3100_v44, %v3100_v44 }
 0x18e   : > { %2115 = vst [vmem:[%s4155_s14 + $0x28] sm:$0xff] %v3076_v58  ;;  %v2130_v31 = vadd.f32 %v3076_v58, %v2129_v53  ;;  %v2152_v3 = vmul.f32 %v3076_v58, %v3076_v58  ;;  %2125 = vst [vmem:[%s4155_s14 + $0x78] sm:$0xff] %v3104_v49  ;;  %v2161_v37 = vmul.f32 %v3096_v61, %v3096_v61 }
 0x18f   : > { %2123 = vst [vmem:[%s4155_s14 + $0x68] sm:$0xff] %v3108_v57  ;;  %v2160_v36 = vmul.f32 %v3108_v57, %v3108_v57 }
 0x190   : > { %v2131_v11 = vadd.f32 %v3061_v17, %v2130_v31  ;;  %v2167_v1 = vadd.f32 %v2166_v56, %v2152_v3 }
 0x192   : > { %v2132_v26 = vadd.f32 %v3071_v28, %v2131_v11  ;;  %v2168_v21 = vadd.f32 %v2167_v1, %v2153_v4 }
 0x194   : > { %v2133_v10 = vadd.f32 %v3084_v52, %v2132_v26  ;;  %v2169_v9 = vadd.f32 %v2168_v21, %v2154_v42  ;;  %v2162_v52 = vmul.f32 %v3104_v49, %v3104_v49 }
 0x196   : > { %v2170_v20 = vadd.f32 %v2169_v9, %v2155_v19  ;;  %v2134_v29 = vadd.f32 %v3092_v40, %v2133_v10 }
 0x198   : > { %v2135_v24 = vadd.f32 %v4158_v34, %v2134_v29  ;;  %v2171_v6 = vadd.f32 %v2170_v20, %v2156_v55 }
 0x19a   : > { %v2136_v22 = vadd.f32 %v3088_v47, %v2135_v24  ;;  %v2172_v38 = vadd.f32 %v2171_v6, %v2157_v59 }
 0x19c   : > { %v2137_v16 = vadd.f32 %v3100_v44, %v2136_v22  ;;  %v2173_v32 = vadd.f32 %v2172_v38, %v2158_v25 }
 0x19e   : > { %v2138_v13 = vadd.f32 %v3108_v57, %v2137_v16  ;;  %v2174_v7 = vadd.f32 %v2173_v32, %v2159_v62 }
 0x1a0   : > { %v2139_v51 = vadd.f32 %v3096_v61, %v2138_v13  ;;  %v2175_v45 = vadd.f32 %v2174_v7, %v2160_v36 }
 0x1a2   : > { %v2140_v63 = vadd.f32 %v3104_v49, %v2139_v51  ;;  %v2176_v35 = vadd.f32 %v2175_v45, %v2161_v37 }
 0x1a4   : > { %v2141_v18 = vrot.slane %v2140_v63, 4  ;;  %v2177_v39 = vadd.f32 %v2176_v35, %v2162_v52 }
 0x1a6   : > { %v2142_v34 = vadd.f32 %v2141_v18, %v2140_v63  ;;  %v2178_v8 = vrot.slane %v2177_v39, 4 }
 0x1a8   : > { %v2143_v40 = vrot.slane %v2142_v34, 2  ;;  %v2179_v47 = vadd.f32 %v2178_v8, %v2177_v39 }
 0x1aa   : > { %v2144_v23 = vadd.f32 %v2143_v40, %v2142_v34  ;;  %v2180_v14 = vrot.slane %v2179_v47, 2 }
 0x1ac   : > { %v2145_v50 = vrot.slane %v2144_v23, 1  ;;  %v2181_v2 = vadd.f32 %v2180_v14, %v2179_v47 }
 0x1ae   : > { %v2182_v17 = vrot.slane %v2181_v2, 1  ;;  %v2146_v15 = vadd.f32 %v2145_v50, %v2144_v23 }
 0x1b0   : > { %v2183_v60 = vadd.f32 %v2182_v17, %v2181_v2 }
 0x1b2   : > { %v2184_v27 = vsel %vm602_vm0, %v2146_v15, %v2183_v60 }
 0x1b3   : > { %v2186_v48 = vsel %vm2185_vm6, %v2184_v27, 0.0 }
 0x1b4   : > { %2187 = vst [vmem:[%s494_s21] sm:$0xff] %v2186_v48 }
 0x1b5 PF: > { %s19_s9 = sadd.s32 1, %s3284_s9   ;;  %s4217_s24 = sld [smem:[#allocation2_spill]] }
 0x1b6   : > { %p16_p12 = scmp.ge.s32.totalorder %s19_s9, 6   ;;  %s4218_s27 = smov %s3276_s29 }
 0x1b7   : > { %s4219_s28 = smov %s3280_s30  ;;  %s4220_s29 = smov %s4223_s10 }
 0x1b8   :  { %18 = sbr.rel (!%p16_p12) target bundleno = 3 (0x3), region = 98 }
 0x1bb   : > { %s4221_s30 = smov %s4217_s24 }

</bundles_post_ra>
